<compile_context>
chip_gen: v7x
topology: tpu7x:2x2x1
jax: 0.10.0
libtpu: 0.0.40
codegen_flags: <defaults>
</compile_context>

<pallas_src>
import math
from functools import partial

import jax
import jax.numpy as jnp
import numpy as np
from jax import lax
from jax.experimental import pallas as pl
from jax.experimental.pallas import tpu as pltpu

# ----------------------------- configuration -----------------------------
VOCAB_SIZE = 16
D_MODEL = 32
NUM_LAYERS = 2
NUM_HEADS = 4
D_FF = 64
MAX_SEQ_LEN = 16
BATCH = 2
TGT_LEN = 8
SRC_LEN = 8
HEAD_DIM = D_MODEL // NUM_HEADS
LN_EPS = 1e-5
NEG_INF = -1e9

W_COLS = 64   # weight slab lane width (max weight dout = D_FF = 64)
B_COLS = 64   # bias slab lane width   (max bias len  = D_FF = 64)


# --------------------------- packed-slab layout -----------------------------
def _build_w_layout():
    offs, r = {}, 0

    def add(key, rows):
        nonlocal r
        offs[key] = r
        r += rows

    add("emb_aug", VOCAB_SIZE + TGT_LEN)                      # [emb*sqrt(d); pe[:T]]
    for l in range(NUM_LAYERS):
        for name, rows in (("sa_wq", D_MODEL), ("sa_wk", D_MODEL), ("sa_wv", D_MODEL),
                           ("sa_wo", D_MODEL), ("ca_wq", D_MODEL), ("ca_wo", D_MODEL),
                           ("ff_w1", D_MODEL), ("ff_w2", D_FF)):
            add(f"l{l}_{name}", rows)
    for l in range(NUM_LAYERS):                               # hoisted cross-attn K/V
        add(f"l{l}_ca_wk", D_MODEL)
        add(f"l{l}_ca_wv", D_MODEL)
    add("out_w", D_MODEL)
    return offs, ((r + 7) // 8) * 8


def _build_b_layout():
    offs, r = {}, 0

    def add(key):
        nonlocal r
        offs[key] = r
        r += 1

    for l in range(NUM_LAYERS):
        for name in ("sa_bq", "sa_bk", "sa_bv", "sa_bo", "ca_bq", "ca_bo",
                     "ff_b1", "ff_b2", "ln1_g", "ln1_b", "ln2_g", "ln2_b",
                     "ln3_g", "ln3_b"):
            add(f"l{l}_{name}")
    for l in range(NUM_LAYERS):
        add(f"l{l}_ca_bk")
        add(f"l{l}_ca_bv")
    for name in ("norm_g", "norm_b", "out_b"):
        add(name)
    return offs, ((r + 7) // 8) * 8


W_OFF, W_ROWS = _build_w_layout()
B_OFF, B_ROWS = _build_b_layout()


# ------------------------------ small helpers -------------------------------
def _mod(x, n):
    if n & (n - 1) == 0:                      # power of two -> bit ops (VPU-native)
        return jnp.bitwise_and(x, n - 1)
    return x % n


def _div(x, n):
    if n & (n - 1) == 0:
        return jnp.right_shift(x, n.bit_length() - 1)
    return x // n


# ------------------------------ fused kernel -------------------------------
def _decoder_kernel(ids_ref, mem_ref, w_ref, b_ref, o_ref, *, batch, tgt_len, src_len):
    n_tok = batch * tgt_len
    n_emb = VOCAB_SIZE + tgt_len

    def W(key, din, dout):
        r = W_OFF[key]
        return w_ref[r:r + din, 0:dout]

    def Bv(key, dout):
        r = B_OFF[key]
        return b_ref[r:r + 1, 0:dout]

    def mm(a, bmat):
        return jnp.dot(a, bmat, preferred_element_type=jnp.float32)

    def layer_norm(z, g, bvec):
        mu = jnp.mean(z, axis=-1, keepdims=True)
        d = z - mu
        var = jnp.mean(d * d, axis=-1, keepdims=True)
        return d * lax.rsqrt(var + LN_EPS) * g + bvec

    # ---- embedding*sqrt(d_model) + positional encoding, one fused matmul ----
    ids = ids_ref[...]                                               # [n_tok, 1] int32
    col = lax.broadcasted_iota(jnp.int32, (n_tok, n_emb), 1)
    row = lax.broadcasted_iota(jnp.int32, (n_tok, n_emb), 0)
    pos = _mod(row, tgt_len)
    onehot = jnp.where((col == ids) | (col == VOCAB_SIZE + pos), 1.0, 0.0).astype(jnp.float32)
    x = mm(onehot, W("emb_aug", n_emb, D_MODEL))                     # [n_tok, D]

    # ---- head lane-masks and additive score biases (layer-invariant) ----
    lane = lax.broadcasted_iota(jnp.int32, (n_tok, D_MODEL), 1)
    head_masks = [_div(lane, HEAD_DIM) == h for h in range(NUM_HEADS)]

    def make_bias(t_kv, causal):
        rq, rk = NUM_HEADS * n_tok, batch * t_kv
        r = _mod(lax.broadcasted_iota(jnp.int32, (rq, rk), 0), n_tok)
        c = lax.broadcasted_iota(jnp.int32, (rq, rk), 1)
        bad = _div(r, tgt_len) != _div(c, t_kv)                      # cross-batch
        if causal:
            bad = bad | (_mod(c, t_kv) > _mod(r, tgt_len))           # causal
        return jnp.where(bad, NEG_INF, 0.0).astype(jnp.float32)

    self_bias = make_bias(tgt_len, True)                             # [H*n_tok, n_tok]
    cross_bias = make_bias(src_len, False)                           # [H*n_tok, n_mem]

    def mha(q, k, v, bias):
        # Heads stacked along sublanes via lane masking (no lane slices/concats).
        # Q scale (1/sqrt(head_dim)) is pre-folded into the Q weights/biases.
        q_stack = jnp.concatenate([jnp.where(m, q, 0.0) for m in head_masks], axis=0)
        s = lax.dot_general(q_stack, k, (((1,), (1,)), ((), ())),
                            preferred_element_type=jnp.float32) + bias
        s_max = jnp.max(s, axis=-1, keepdims=True)
        p = jnp.exp(s - s_max)
        p = p / jnp.sum(p, axis=-1, keepdims=True)
        ctx_stack = mm(p, v)                                         # [H*n_tok, D]
        ctx = jnp.where(head_masks[0], ctx_stack[0:n_tok, :], 0.0)
        for h in range(1, NUM_HEADS):
            ctx = ctx + jnp.where(head_masks[h],
                                  ctx_stack[h * n_tok:(h + 1) * n_tok, :], 0.0)
        return ctx                                                   # [n_tok, D]

    # ---- cross-attention K/V projections hoisted out of the layer loop ----
    mem = mem_ref[...]
    ca_k = [mm(mem, W(f"l{l}_ca_wk", D_MODEL, D_MODEL)) + Bv(f"l{l}_ca_bk", D_MODEL)
            for l in range(NUM_LAYERS)]
    ca_v = [mm(mem, W(f"l{l}_ca_wv", D_MODEL, D_MODEL)) + Bv(f"l{l}_ca_bv", D_MODEL)
            for l in range(NUM_LAYERS)]

    for l in range(NUM_LAYERS):
        # --- self-attention ---
        q = mm(x, W(f"l{l}_sa_wq", D_MODEL, D_MODEL)) + Bv(f"l{l}_sa_bq", D_MODEL)
        k = mm(x, W(f"l{l}_sa_wk", D_MODEL, D_MODEL)) + Bv(f"l{l}_sa_bk", D_MODEL)
        v = mm(x, W(f"l{l}_sa_wv", D_MODEL, D_MODEL)) + Bv(f"l{l}_sa_bv", D_MODEL)
        sa = mm(mha(q, k, v, self_bias), W(f"l{l}_sa_wo", D_MODEL, D_MODEL)) \
            + Bv(f"l{l}_sa_bo", D_MODEL)
        x = layer_norm(x + sa, Bv(f"l{l}_ln1_g", D_MODEL), Bv(f"l{l}_ln1_b", D_MODEL))

        # --- cross-attention ---
        q = mm(x, W(f"l{l}_ca_wq", D_MODEL, D_MODEL)) + Bv(f"l{l}_ca_bq", D_MODEL)
        ca = mm(mha(q, ca_k[l], ca_v[l], cross_bias), W(f"l{l}_ca_wo", D_MODEL, D_MODEL)) \
            + Bv(f"l{l}_ca_bo", D_MODEL)
        x = layer_norm(x + ca, Bv(f"l{l}_ln2_g", D_MODEL), Bv(f"l{l}_ln2_b", D_MODEL))

        # --- position-wise FFN ---
        h1 = jnp.maximum(mm(x, W(f"l{l}_ff_w1", D_MODEL, D_FF)) + Bv(f"l{l}_ff_b1", D_FF), 0.0)
        ff = mm(h1, W(f"l{l}_ff_w2", D_FF, D_MODEL)) + Bv(f"l{l}_ff_b2", D_MODEL)
        x = layer_norm(x + ff, Bv(f"l{l}_ln3_g", D_MODEL), Bv(f"l{l}_ln3_b", D_MODEL))

    # final LayerNorm + output projection to vocab logits
    x = layer_norm(x, Bv("norm_g", D_MODEL), Bv("norm_b", D_MODEL))
    o_ref[...] = (mm(x, W("out_w", D_MODEL, VOCAB_SIZE))
                  + Bv("out_b", VOCAB_SIZE)).astype(o_ref.dtype)


# ------------------------------ wrapper ------------------------------------
@jax.jit
def decoder_forward(wslab, bslab, tgt_ids, memory):
    B, T = tgt_ids.shape
    S = memory.shape[1]
    ids2d = tgt_ids.reshape(B * T, 1).astype(jnp.int32)
    mem2d = memory.reshape(B * S, D_MODEL).astype(jnp.float32)
    flat = [ids2d, mem2d, wslab, bslab]

    logits2d = pl.pallas_call(
        partial(_decoder_kernel, batch=B, tgt_len=T, src_len=S),
        out_shape=jax.ShapeDtypeStruct((B * T, VOCAB_SIZE), jnp.float32),
        grid=(1,),
        in_specs=[pl.BlockSpec(a.shape, lambda i, nd=a.ndim: (0,) * nd) for a in flat],
        out_specs=pl.BlockSpec((B * T, VOCAB_SIZE), lambda i: (0, 0)),
        compiler_params=pltpu.CompilerParams(dimension_semantics=("arbitrary",)),
    )(*flat)
    return logits2d.reshape(B, T, VOCAB_SIZE)


# --------------------------- parameter construction ------------------------
def _init_linear(key, din, dout):
    k1, k2 = jax.random.split(key)
    lim = 1.0 / math.sqrt(din)
    w = jax.random.uniform(k1, (din, dout), jnp.float32, -lim, lim)
    b = jax.random.uniform(k2, (dout,), jnp.float32, -lim, lim)
    return w, b


def _init_attn(key):
    ks = jax.random.split(key, 4)
    wq, bq = _init_linear(ks[0], D_MODEL, D_MODEL)
    wk, bk = _init_linear(ks[1], D_MODEL, D_MODEL)
    wv, bv = _init_linear(ks[2], D_MODEL, D_MODEL)
    wo, bo = _init_linear(ks[3], D_MODEL, D_MODEL)
    return dict(wq=wq, bq=bq, wk=wk, bk=bk, wv=wv, bv=bv, wo=wo, bo=bo)


def make_params(key):
    keys = jax.random.split(key, 3 + NUM_LAYERS)
    params = {}
    params["embedding"] = jax.random.normal(keys[0], (VOCAB_SIZE, D_MODEL), jnp.float32)

    # standard sinusoidal positional encoding table [MAX_SEQ_LEN, D_MODEL]
    pos = np.arange(MAX_SEQ_LEN, dtype=np.float32)[:, None]
    div = np.exp(np.arange(0, D_MODEL, 2, dtype=np.float32) * (-math.log(10000.0) / D_MODEL))
    pe = np.zeros((MAX_SEQ_LEN, D_MODEL), np.float32)
    pe[:, 0::2] = np.sin(pos * div)
    pe[:, 1::2] = np.cos(pos * div)
    params["pe"] = jnp.asarray(pe)

    layers = []
    for li in range(NUM_LAYERS):
        lk = jax.random.split(keys[1 + li], 4)
        ff_w1, ff_b1 = _init_linear(lk[2], D_MODEL, D_FF)
        ff_w2, ff_b2 = _init_linear(lk[3], D_FF, D_MODEL)
        layers.append(
            dict(
                self_attn=_init_attn(lk[0]),
                cross_attn=_init_attn(lk[1]),
                ff_w1=ff_w1, ff_b1=ff_b1, ff_w2=ff_w2, ff_b2=ff_b2,
                ln1_g=jnp.ones((D_MODEL,), jnp.float32), ln1_b=jnp.zeros((D_MODEL,), jnp.float32),
                ln2_g=jnp.ones((D_MODEL,), jnp.float32), ln2_b=jnp.zeros((D_MODEL,), jnp.float32),
                ln3_g=jnp.ones((D_MODEL,), jnp.float32), ln3_b=jnp.zeros((D_MODEL,), jnp.float32),
            )
        )
    params["layers"] = layers
    params["norm_g"] = jnp.ones((D_MODEL,), jnp.float32)
    params["norm_b"] = jnp.zeros((D_MODEL,), jnp.float32)
    params["out_w"], params["out_b"] = _init_linear(keys[1 + NUM_LAYERS], D_MODEL, VOCAB_SIZE)
    return params


def prepare_fused_params(params):
    """Pack all weights into one [W_ROWS, 64] slab and all biases/LN params
    into one [B_ROWS, 64] slab, folding sqrt(d_model) into the embedding,
    PE into the augmented embedding rows, and 1/sqrt(head_dim) into Q."""
    w = np.zeros((W_ROWS, W_COLS), np.float32)
    b = np.zeros((B_ROWS, B_COLS), np.float32)
    q_scale = 1.0 / math.sqrt(HEAD_DIM)

    def put_w(key, arr):
        arr = np.asarray(arr, np.float32)
        r = W_OFF[key]
        w[r:r + arr.shape[0], :arr.shape[1]] = arr

    def put_b(key, vec):
        vec = np.asarray(vec, np.float32).reshape(-1)
        b[B_OFF[key], :vec.shape[0]] = vec

    emb_aug = np.concatenate(
        [np.asarray(params["embedding"], np.float32) * math.sqrt(D_MODEL),
         np.asarray(params["pe"], np.float32)[:TGT_LEN]], axis=0)
    put_w("emb_aug", emb_aug)

    for l, lp in enumerate(params["layers"]):
        sa, ca = lp["self_attn"], lp["cross_attn"]
        put_w(f"l{l}_sa_wq", np.asarray(sa["wq"]) * q_scale)
        put_b(f"l{l}_sa_bq", np.asarray(sa["bq"]) * q_scale)
        put_w(f"l{l}_sa_wk", sa["wk"]); put_b(f"l{l}_sa_bk", sa["bk"])
        put_w(f"l{l}_sa_wv", sa["wv"]); put_b(f"l{l}_sa_bv", sa["bv"])
        put_w(f"l{l}_sa_wo", sa["wo"]); put_b(f"l{l}_sa_bo", sa["bo"])
        put_w(f"l{l}_ca_wq", np.asarray(ca["wq"]) * q_scale)
        put_b(f"l{l}_ca_bq", np.asarray(ca["bq"]) * q_scale)
        put_w(f"l{l}_ca_wo", ca["wo"]); put_b(f"l{l}_ca_bo", ca["bo"])
        put_w(f"l{l}_ca_wk", ca["wk"]); put_b(f"l{l}_ca_bk", ca["bk"])
        put_w(f"l{l}_ca_wv", ca["wv"]); put_b(f"l{l}_ca_bv", ca["bv"])
        put_w(f"l{l}_ff_w1", lp["ff_w1"]); put_b(f"l{l}_ff_b1", lp["ff_b1"])
        put_w(f"l{l}_ff_w2", lp["ff_w2"]); put_b(f"l{l}_ff_b2", lp["ff_b2"])
        put_b(f"l{l}_ln1_g", lp["ln1_g"]); put_b(f"l{l}_ln1_b", lp["ln1_b"])
        put_b(f"l{l}_ln2_g", lp["ln2_g"]); put_b(f"l{l}_ln2_b", lp["ln2_b"])
        put_b(f"l{l}_ln3_g", lp["ln3_g"]); put_b(f"l{l}_ln3_b", lp["ln3_b"])

    put_w("out_w", params["out_w"]); put_b("out_b", params["out_b"])
    put_b("norm_g", params["norm_g"]); put_b("norm_b", params["norm_b"])
    return jnp.asarray(w), jnp.asarray(b)


# --------------------------- pure-JAX reference -----------------------------
def _reference_forward(params, tgt_ids, memory):
    B, T = tgt_ids.shape
    x = params["embedding"][tgt_ids] * math.sqrt(D_MODEL) + params["pe"][:T][None, :, :]

    def ln(z, g, b):
        mu = jnp.mean(z, axis=-1, keepdims=True)
        var = jnp.mean((z - mu) ** 2, axis=-1, keepdims=True)
        return (z - mu) / jnp.sqrt(var + LN_EPS) * g + b

    def mha(q_in, kv_in, p, mask):
        q = q_in @ p["wq"] + p["bq"]
        k = kv_in @ p["wk"] + p["bk"]
        v = kv_in @ p["wv"] + p["bv"]
        Lq, Lk = q.shape[1], k.shape[1]
        q = q.reshape(B, Lq, NUM_HEADS, HEAD_DIM).transpose(0, 2, 1, 3)
        k = k.reshape(B, Lk, NUM_HEADS, HEAD_DIM).transpose(0, 2, 1, 3)
        v = v.reshape(B, Lk, NUM_HEADS, HEAD_DIM).transpose(0, 2, 1, 3)
        s = jnp.einsum("bhqd,bhkd->bhqk", q, k) / math.sqrt(HEAD_DIM)
        if mask is not None:
            s = s + mask
        a = jax.nn.softmax(s, axis=-1)
        ctx = jnp.einsum("bhqk,bhkd->bhqd", a, v).transpose(0, 2, 1, 3).reshape(B, Lq, D_MODEL)
        return ctx @ p["wo"] + p["bo"]

    causal = jnp.where(jnp.triu(jnp.ones((T, T)), 1) > 0, NEG_INF, 0.0)
    for lp in params["layers"]:
        x = ln(x + mha(x, x, lp["self_attn"], causal), lp["ln1_g"], lp["ln1_b"])
        x = ln(x + mha(x, memory, lp["cross_attn"], None), lp["ln2_g"], lp["ln2_b"])
        h = jax.nn.relu(x @ lp["ff_w1"] + lp["ff_b1"])
        x = ln(x + h @ lp["ff_w2"] + lp["ff_b2"], lp["ln3_g"], lp["ln3_b"])
    x = ln(x, params["norm_g"], params["norm_b"])
    return x @ params["out_w"] + params["out_b"]


# ---------------------------------- main -----------------------------------
if __name__ == "__main__":
    key = jax.random.PRNGKey(0)
    k_param, k_tgt, k_mem = jax.random.split(key, 3)

    params = make_params(k_param)
    wslab, bslab = prepare_fused_params(params)

    tgt_ids = jax.random.randint(k_tgt, (BATCH, TGT_LEN), 0, VOCAB_SIZE, dtype=jnp.int32)
    memory = jax.random.normal(k_mem, (BATCH, SRC_LEN, D_MODEL), jnp.float32)

    logits = decoder_forward(wslab, bslab, tgt_ids, memory)
    logits = jax.block_until_ready(logits)

    assert logits.shape == (BATCH, TGT_LEN, VOCAB_SIZE)
    assert bool(jnp.all(jnp.isfinite(logits)))

    ref = _reference_forward(params, tgt_ids, memory)
    max_err = float(jnp.max(jnp.abs(logits - ref)))
    assert max_err < 2e-2, f"mismatch vs pure-JAX reference: {max_err}"

    print("KERNEL_OK")
</pallas_src>

<mosaic_0001>
module attributes {stable_mosaic.version = 11 : i64} {
  func.func @_decoder_kernel(%arg0: i32, %arg1: memref<16x1xi32, #tpu.memory_space<vmem>>, %arg2: memref<16x32xf32, #tpu.memory_space<vmem>>, %arg3: memref<760x64xf32, #tpu.memory_space<vmem>>, %arg4: memref<40x64xf32, #tpu.memory_space<vmem>>, %arg5: memref<16x16xf32, #tpu.memory_space<vmem>>) attributes {dimension_semantics = [#tpu.dimension_semantics<arbitrary>], iteration_bounds = array<i64: 1>, scalar_prefetch = 0 : i64, scratch_operands = 0 : i64, tpu.core_type = #tpu.core_type<tc>, window_params = [{pipeline_mode = #tpu.pipeline_mode<synchronous>, transform_indices = @transform_0, window_bounds = array<i64: 16, 1>}, {pipeline_mode = #tpu.pipeline_mode<synchronous>, transform_indices = @transform_1, window_bounds = array<i64: 16, 32>}, {pipeline_mode = #tpu.pipeline_mode<synchronous>, transform_indices = @transform_2, window_bounds = array<i64: 760, 64>}, {pipeline_mode = #tpu.pipeline_mode<synchronous>, transform_indices = @transform_3, window_bounds = array<i64: 40, 64>}, {pipeline_mode = #tpu.pipeline_mode<synchronous>, transform_indices = @transform_4, window_bounds = array<i64: 16, 16>}]} {
    %c0 = arith.constant 0 : index
    %c0_0 = arith.constant 0 : index
    %0 = vector.load %arg1[%c0, %c0_0] : memref<16x1xi32, #tpu.memory_space<vmem>>, vector<16x1xi32>
    %1 = tpu.iota {dimensions = array<i32: 1>} : vector<16x24xi32>
    %2 = tpu.iota {dimensions = array<i32: 0>} : vector<16x24xi32>
    %c7_i32 = arith.constant 7 : i32
    %3 = vector.broadcast %c7_i32 : i32 to vector<16x24xi32>
    %4 = arith.andi %2, %3 : vector<16x24xi32>
    %5 = vector.broadcast %0 : vector<16x1xi32> to vector<16x24xi32>
    %6 = arith.cmpi eq, %1, %5 : vector<16x24xi32>
    %c16_i32 = arith.constant 16 : i32
    %7 = vector.broadcast %c16_i32 : i32 to vector<16x24xi32>
    %8 = arith.addi %7, %4 : vector<16x24xi32>
    %9 = arith.cmpi eq, %1, %8 : vector<16x24xi32>
    %10 = arith.ori %6, %9 : vector<16x24xi1>
    %cst = arith.constant 1.000000e+00 : f32
    %cst_1 = arith.constant 0.000000e+00 : f32
    %11 = vector.broadcast %cst : f32 to vector<16x24xf32>
    %12 = vector.broadcast %cst_1 : f32 to vector<16x24xf32>
    %13 = arith.select %10, %11, %12 : vector<16x24xi1>, vector<16x24xf32>
    %c0_2 = arith.constant 0 : index
    %c0_3 = arith.constant 0 : index
    %14 = vector.load %arg3[%c0_2, %c0_3] : memref<760x64xf32, #tpu.memory_space<vmem>>, vector<24x32xf32>
    %cst_4 = arith.constant dense<0.000000e+00> : vector<16x32xf32>
    %15 = tpu.matmul %13, %14, %cst_4 {dimension_numbers = #tpu.dot_dimension_numbers<[1], [0], [0], [1], [0, 0, 1, 1], [], []>} : vector<16x24xf32>, vector<24x32xf32>, vector<16x32xf32> -> vector<16x32xf32>
    %16 = tpu.iota {dimensions = array<i32: 1>} : vector<16x32xi32>
    %c3_i32 = arith.constant 3 : i32
    %17 = vector.broadcast %c3_i32 : i32 to vector<16x32xi32>
    %18 = arith.shrsi %16, %17 : vector<16x32xi32>
    %c0_i32 = arith.constant 0 : i32
    %19 = vector.broadcast %c0_i32 : i32 to vector<16x32xi32>
    %20 = arith.cmpi eq, %18, %19 : vector<16x32xi32>
    %c3_i32_5 = arith.constant 3 : i32
    %21 = vector.broadcast %c3_i32_5 : i32 to vector<16x32xi32>
    %22 = arith.shrsi %16, %21 : vector<16x32xi32>
    %c1_i32 = arith.constant 1 : i32
    %23 = vector.broadcast %c1_i32 : i32 to vector<16x32xi32>
    %24 = arith.cmpi eq, %22, %23 : vector<16x32xi32>
    %c3_i32_6 = arith.constant 3 : i32
    %25 = vector.broadcast %c3_i32_6 : i32 to vector<16x32xi32>
    %26 = arith.shrsi %16, %25 : vector<16x32xi32>
    %c2_i32 = arith.constant 2 : i32
    %27 = vector.broadcast %c2_i32 : i32 to vector<16x32xi32>
    %28 = arith.cmpi eq, %26, %27 : vector<16x32xi32>
    %c3_i32_7 = arith.constant 3 : i32
    %29 = vector.broadcast %c3_i32_7 : i32 to vector<16x32xi32>
    %30 = arith.shrsi %16, %29 : vector<16x32xi32>
    %c3_i32_8 = arith.constant 3 : i32
    %31 = vector.broadcast %c3_i32_8 : i32 to vector<16x32xi32>
    %32 = arith.cmpi eq, %30, %31 : vector<16x32xi32>
    %33 = tpu.iota {dimensions = array<i32: 0>} : vector<64x16xi32>
    %c15_i32 = arith.constant 15 : i32
    %34 = vector.broadcast %c15_i32 : i32 to vector<64x16xi32>
    %35 = arith.andi %33, %34 : vector<64x16xi32>
    %36 = tpu.iota {dimensions = array<i32: 1>} : vector<64x16xi32>
    %c3_i32_9 = arith.constant 3 : i32
    %37 = vector.broadcast %c3_i32_9 : i32 to vector<64x16xi32>
    %38 = arith.shrsi %35, %37 : vector<64x16xi32>
    %c3_i32_10 = arith.constant 3 : i32
    %39 = vector.broadcast %c3_i32_10 : i32 to vector<64x16xi32>
    %40 = arith.shrsi %36, %39 : vector<64x16xi32>
    %41 = arith.cmpi ne, %38, %40 : vector<64x16xi32>
    %c7_i32_11 = arith.constant 7 : i32
    %42 = vector.broadcast %c7_i32_11 : i32 to vector<64x16xi32>
    %43 = arith.andi %36, %42 : vector<64x16xi32>
    %c7_i32_12 = arith.constant 7 : i32
    %44 = vector.broadcast %c7_i32_12 : i32 to vector<64x16xi32>
    %45 = arith.andi %35, %44 : vector<64x16xi32>
    %46 = arith.cmpi sgt, %43, %45 : vector<64x16xi32>
    %47 = arith.ori %41, %46 : vector<64x16xi1>
    %cst_13 = arith.constant -1.000000e+09 : f32
    %cst_14 = arith.constant 0.000000e+00 : f32
    %48 = vector.broadcast %cst_13 : f32 to vector<64x16xf32>
    %49 = vector.broadcast %cst_14 : f32 to vector<64x16xf32>
    %50 = arith.select %47, %48, %49 : vector<64x16xi1>, vector<64x16xf32>
    %51 = tpu.iota {dimensions = array<i32: 0>} : vector<64x16xi32>
    %c15_i32_15 = arith.constant 15 : i32
    %52 = vector.broadcast %c15_i32_15 : i32 to vector<64x16xi32>
    %53 = arith.andi %51, %52 : vector<64x16xi32>
    %54 = tpu.iota {dimensions = array<i32: 1>} : vector<64x16xi32>
    %c3_i32_16 = arith.constant 3 : i32
    %55 = vector.broadcast %c3_i32_16 : i32 to vector<64x16xi32>
    %56 = arith.shrsi %53, %55 : vector<64x16xi32>
    %c3_i32_17 = arith.constant 3 : i32
    %57 = vector.broadcast %c3_i32_17 : i32 to vector<64x16xi32>
    %58 = arith.shrsi %54, %57 : vector<64x16xi32>
    %59 = arith.cmpi ne, %56, %58 : vector<64x16xi32>
    %cst_18 = arith.constant -1.000000e+09 : f32
    %cst_19 = arith.constant 0.000000e+00 : f32
    %60 = vector.broadcast %cst_18 : f32 to vector<64x16xf32>
    %61 = vector.broadcast %cst_19 : f32 to vector<64x16xf32>
    %62 = arith.select %59, %60, %61 : vector<64x16xi1>, vector<64x16xf32>
    %c0_20 = arith.constant 0 : index
    %c0_21 = arith.constant 0 : index
    %63 = vector.load %arg2[%c0_20, %c0_21] : memref<16x32xf32, #tpu.memory_space<vmem>>, vector<16x32xf32>
    %c600 = arith.constant 600 : index
    %c0_22 = arith.constant 0 : index
    %64 = vector.load %arg3[%c600, %c0_22] : memref<760x64xf32, #tpu.memory_space<vmem>>, vector<32x32xf32>
    %cst_23 = arith.constant dense<0.000000e+00> : vector<16x32xf32>
    %65 = tpu.matmul %63, %64, %cst_23 {dimension_numbers = #tpu.dot_dimension_numbers<[1], [0], [0], [1], [0, 0, 1, 1], [], []>} : vector<16x32xf32>, vector<32x32xf32>, vector<16x32xf32> -> vector<16x32xf32>
    %c28 = arith.constant 28 : index
    %c0_24 = arith.constant 0 : index
    %66 = vector.load %arg4[%c28, %c0_24] : memref<40x64xf32, #tpu.memory_space<vmem>>, vector<1x32xf32>
    %67 = vector.broadcast %66 : vector<1x32xf32> to vector<16x32xf32>
    %68 = arith.addf %65, %67 : vector<16x32xf32>
    %c664 = arith.constant 664 : index
    %c0_25 = arith.constant 0 : index
    %69 = vector.load %arg3[%c664, %c0_25] : memref<760x64xf32, #tpu.memory_space<vmem>>, vector<32x32xf32>
    %cst_26 = arith.constant dense<0.000000e+00> : vector<16x32xf32>
    %70 = tpu.matmul %63, %69, %cst_26 {dimension_numbers = #tpu.dot_dimension_numbers<[1], [0], [0], [1], [0, 0, 1, 1], [], []>} : vector<16x32xf32>, vector<32x32xf32>, vector<16x32xf32> -> vector<16x32xf32>
    %c30 = arith.constant 30 : index
    %c0_27 = arith.constant 0 : index
    %71 = vector.load %arg4[%c30, %c0_27] : memref<40x64xf32, #tpu.memory_space<vmem>>, vector<1x32xf32>
    %72 = vector.broadcast %71 : vector<1x32xf32> to vector<16x32xf32>
    %73 = arith.addf %70, %72 : vector<16x32xf32>
    %c632 = arith.constant 632 : index
    %c0_28 = arith.constant 0 : index
    %74 = vector.load %arg3[%c632, %c0_28] : memref<760x64xf32, #tpu.memory_space<vmem>>, vector<32x32xf32>
    %cst_29 = arith.constant dense<0.000000e+00> : vector<16x32xf32>
    %75 = tpu.matmul %63, %74, %cst_29 {dimension_numbers = #tpu.dot_dimension_numbers<[1], [0], [0], [1], [0, 0, 1, 1], [], []>} : vector<16x32xf32>, vector<32x32xf32>, vector<16x32xf32> -> vector<16x32xf32>
    %c29 = arith.constant 29 : index
    %c0_30 = arith.constant 0 : index
    %76 = vector.load %arg4[%c29, %c0_30] : memref<40x64xf32, #tpu.memory_space<vmem>>, vector<1x32xf32>
    %77 = vector.broadcast %76 : vector<1x32xf32> to vector<16x32xf32>
    %78 = arith.addf %75, %77 : vector<16x32xf32>
    %c696 = arith.constant 696 : index
    %c0_31 = arith.constant 0 : index
    %79 = vector.load %arg3[%c696, %c0_31] : memref<760x64xf32, #tpu.memory_space<vmem>>, vector<32x32xf32>
    %cst_32 = arith.constant dense<0.000000e+00> : vector<16x32xf32>
    %80 = tpu.matmul %63, %79, %cst_32 {dimension_numbers = #tpu.dot_dimension_numbers<[1], [0], [0], [1], [0, 0, 1, 1], [], []>} : vector<16x32xf32>, vector<32x32xf32>, vector<16x32xf32> -> vector<16x32xf32>
    %c31 = arith.constant 31 : index
    %c0_33 = arith.constant 0 : index
    %81 = vector.load %arg4[%c31, %c0_33] : memref<40x64xf32, #tpu.memory_space<vmem>>, vector<1x32xf32>
    %82 = vector.broadcast %81 : vector<1x32xf32> to vector<16x32xf32>
    %83 = arith.addf %80, %82 : vector<16x32xf32>
    %c24 = arith.constant 24 : index
    %c0_34 = arith.constant 0 : index
    %84 = vector.load %arg3[%c24, %c0_34] : memref<760x64xf32, #tpu.memory_space<vmem>>, vector<32x32xf32>
    %cst_35 = arith.constant dense<0.000000e+00> : vector<16x32xf32>
    %85 = tpu.matmul %15, %84, %cst_35 {dimension_numbers = #tpu.dot_dimension_numbers<[1], [0], [0], [1], [0, 0, 1, 1], [], []>} : vector<16x32xf32>, vector<32x32xf32>, vector<16x32xf32> -> vector<16x32xf32>
    %c0_36 = arith.constant 0 : index
    %c0_37 = arith.constant 0 : index
    %86 = vector.load %arg4[%c0_36, %c0_37] : memref<40x64xf32, #tpu.memory_space<vmem>>, vector<1x32xf32>
    %87 = vector.broadcast %86 : vector<1x32xf32> to vector<16x32xf32>
    %88 = arith.addf %85, %87 : vector<16x32xf32>
    %c56 = arith.constant 56 : index
    %c0_38 = arith.constant 0 : index
    %89 = vector.load %arg3[%c56, %c0_38] : memref<760x64xf32, #tpu.memory_space<vmem>>, vector<32x32xf32>
    %cst_39 = arith.constant dense<0.000000e+00> : vector<16x32xf32>
    %90 = tpu.matmul %15, %89, %cst_39 {dimension_numbers = #tpu.dot_dimension_numbers<[1], [0], [0], [1], [0, 0, 1, 1], [], []>} : vector<16x32xf32>, vector<32x32xf32>, vector<16x32xf32> -> vector<16x32xf32>
    %c1 = arith.constant 1 : index
    %c0_40 = arith.constant 0 : index
    %91 = vector.load %arg4[%c1, %c0_40] : memref<40x64xf32, #tpu.memory_space<vmem>>, vector<1x32xf32>
    %92 = vector.broadcast %91 : vector<1x32xf32> to vector<16x32xf32>
    %93 = arith.addf %90, %92 : vector<16x32xf32>
    %c88 = arith.constant 88 : index
    %c0_41 = arith.constant 0 : index
    %94 = vector.load %arg3[%c88, %c0_41] : memref<760x64xf32, #tpu.memory_space<vmem>>, vector<32x32xf32>
    %cst_42 = arith.constant dense<0.000000e+00> : vector<16x32xf32>
    %95 = tpu.matmul %15, %94, %cst_42 {dimension_numbers = #tpu.dot_dimension_numbers<[1], [0], [0], [1], [0, 0, 1, 1], [], []>} : vector<16x32xf32>, vector<32x32xf32>, vector<16x32xf32> -> vector<16x32xf32>
    %c2 = arith.constant 2 : index
    %c0_43 = arith.constant 0 : index
    %96 = vector.load %arg4[%c2, %c0_43] : memref<40x64xf32, #tpu.memory_space<vmem>>, vector<1x32xf32>
    %97 = vector.broadcast %96 : vector<1x32xf32> to vector<16x32xf32>
    %98 = arith.addf %95, %97 : vector<16x32xf32>
    %cst_44 = arith.constant 0.000000e+00 : f32
    %99 = vector.broadcast %cst_44 : f32 to vector<16x32xf32>
    %100 = arith.select %20, %88, %99 : vector<16x32xi1>, vector<16x32xf32>
    %cst_45 = arith.constant 0.000000e+00 : f32
    %101 = vector.broadcast %cst_45 : f32 to vector<16x32xf32>
    %102 = arith.select %24, %88, %101 : vector<16x32xi1>, vector<16x32xf32>
    %cst_46 = arith.constant 0.000000e+00 : f32
    %103 = vector.broadcast %cst_46 : f32 to vector<16x32xf32>
    %104 = arith.select %28, %88, %103 : vector<16x32xi1>, vector<16x32xf32>
    %cst_47 = arith.constant 0.000000e+00 : f32
    %105 = vector.broadcast %cst_47 : f32 to vector<16x32xf32>
    %106 = arith.select %32, %88, %105 : vector<16x32xi1>, vector<16x32xf32>
    %107 = tpu.concatenate %100, %102, %104, %106 in 0 : vector<16x32xf32>, vector<16x32xf32>, vector<16x32xf32>, vector<16x32xf32> -> vector<64x32xf32>
    %cst_48 = arith.constant dense<0.000000e+00> : vector<64x16xf32>
    %108 = tpu.matmul %107, %93, %cst_48 {dimension_numbers = #tpu.dot_dimension_numbers<[1], [1], [0], [0], [0, 0, 1, 0], [], []>} : vector<64x32xf32>, vector<16x32xf32>, vector<64x16xf32> -> vector<64x16xf32>
    %109 = arith.addf %108, %50 : vector<64x16xf32>
    %cst_49 = arith.constant dense<0xFF800000> : vector<64xf32>
    %110 = vector.multi_reduction <maximumf>, %109, %cst_49 [1] : vector<64x16xf32> to vector<64xf32>
    %111 = vector.shape_cast %110 : vector<64xf32> to vector<64x1xf32>
    %112 = vector.broadcast %111 : vector<64x1xf32> to vector<64x16xf32>
    %113 = arith.subf %109, %112 : vector<64x16xf32>
    %114 = math.exp %113 : vector<64x16xf32>
    %cst_50 = arith.constant dense<0.000000e+00> : vector<64xf32>
    %115 = vector.multi_reduction <add>, %114, %cst_50 [1] : vector<64x16xf32> to vector<64xf32>
    %116 = vector.shape_cast %115 : vector<64xf32> to vector<64x1xf32>
    %117 = vector.broadcast %116 : vector<64x1xf32> to vector<64x16xf32>
    %118 = arith.divf %114, %117 : vector<64x16xf32>
    %cst_51 = arith.constant dense<0.000000e+00> : vector<64x32xf32>
    %119 = tpu.matmul %118, %98, %cst_51 {dimension_numbers = #tpu.dot_dimension_numbers<[1], [0], [0], [1], [0, 0, 1, 1], [], []>} : vector<64x16xf32>, vector<16x32xf32>, vector<64x32xf32> -> vector<64x32xf32>
    %120 = vector.extract_strided_slice %119 {offsets = [0, 0], sizes = [16, 32], strides = [1, 1]} : vector<64x32xf32> to vector<16x32xf32>
    %cst_52 = arith.constant 0.000000e+00 : f32
    %121 = vector.broadcast %cst_52 : f32 to vector<16x32xf32>
    %122 = arith.select %20, %120, %121 : vector<16x32xi1>, vector<16x32xf32>
    %123 = vector.extract_strided_slice %119 {offsets = [16, 0], sizes = [16, 32], strides = [1, 1]} : vector<64x32xf32> to vector<16x32xf32>
    %cst_53 = arith.constant 0.000000e+00 : f32
    %124 = vector.broadcast %cst_53 : f32 to vector<16x32xf32>
    %125 = arith.select %24, %123, %124 : vector<16x32xi1>, vector<16x32xf32>
    %126 = arith.addf %122, %125 : vector<16x32xf32>
    %127 = vector.extract_strided_slice %119 {offsets = [32, 0], sizes = [16, 32], strides = [1, 1]} : vector<64x32xf32> to vector<16x32xf32>
    %cst_54 = arith.constant 0.000000e+00 : f32
    %128 = vector.broadcast %cst_54 : f32 to vector<16x32xf32>
    %129 = arith.select %28, %127, %128 : vector<16x32xi1>, vector<16x32xf32>
    %130 = arith.addf %126, %129 : vector<16x32xf32>
    %131 = vector.extract_strided_slice %119 {offsets = [48, 0], sizes = [16, 32], strides = [1, 1]} : vector<64x32xf32> to vector<16x32xf32>
    %cst_55 = arith.constant 0.000000e+00 : f32
    %132 = vector.broadcast %cst_55 : f32 to vector<16x32xf32>
    %133 = arith.select %32, %131, %132 : vector<16x32xi1>, vector<16x32xf32>
    %134 = arith.addf %130, %133 : vector<16x32xf32>
    %c120 = arith.constant 120 : index
    %c0_56 = arith.constant 0 : index
    %135 = vector.load %arg3[%c120, %c0_56] : memref<760x64xf32, #tpu.memory_space<vmem>>, vector<32x32xf32>
    %cst_57 = arith.constant dense<0.000000e+00> : vector<16x32xf32>
    %136 = tpu.matmul %134, %135, %cst_57 {dimension_numbers = #tpu.dot_dimension_numbers<[1], [0], [0], [1], [0, 0, 1, 1], [], []>} : vector<16x32xf32>, vector<32x32xf32>, vector<16x32xf32> -> vector<16x32xf32>
    %c3 = arith.constant 3 : index
    %c0_58 = arith.constant 0 : index
    %137 = vector.load %arg4[%c3, %c0_58] : memref<40x64xf32, #tpu.memory_space<vmem>>, vector<1x32xf32>
    %138 = vector.broadcast %137 : vector<1x32xf32> to vector<16x32xf32>
    %139 = arith.addf %136, %138 : vector<16x32xf32>
    %140 = arith.addf %15, %139 : vector<16x32xf32>
    %c8 = arith.constant 8 : index
    %c0_59 = arith.constant 0 : index
    %141 = vector.load %arg4[%c8, %c0_59] : memref<40x64xf32, #tpu.memory_space<vmem>>, vector<1x32xf32>
    %c9 = arith.constant 9 : index
    %c0_60 = arith.constant 0 : index
    %142 = vector.load %arg4[%c9, %c0_60] : memref<40x64xf32, #tpu.memory_space<vmem>>, vector<1x32xf32>
    %cst_61 = arith.constant dense<0.000000e+00> : vector<16xf32>
    %143 = vector.multi_reduction <add>, %140, %cst_61 [1] : vector<16x32xf32> to vector<16xf32>
    %144 = vector.shape_cast %143 : vector<16xf32> to vector<16x1xf32>
    %cst_62 = arith.constant 3.200000e+01 : f32
    %145 = vector.broadcast %cst_62 : f32 to vector<16x1xf32>
    %146 = arith.divf %144, %145 : vector<16x1xf32>
    %147 = vector.broadcast %146 : vector<16x1xf32> to vector<16x32xf32>
    %148 = arith.subf %140, %147 : vector<16x32xf32>
    %149 = arith.mulf %148, %148 : vector<16x32xf32>
    %cst_63 = arith.constant dense<0.000000e+00> : vector<16xf32>
    %150 = vector.multi_reduction <add>, %149, %cst_63 [1] : vector<16x32xf32> to vector<16xf32>
    %151 = vector.shape_cast %150 : vector<16xf32> to vector<16x1xf32>
    %cst_64 = arith.constant 3.200000e+01 : f32
    %152 = vector.broadcast %cst_64 : f32 to vector<16x1xf32>
    %153 = arith.divf %151, %152 : vector<16x1xf32>
    %cst_65 = arith.constant 9.99999974E-6 : f32
    %154 = vector.broadcast %cst_65 : f32 to vector<16x1xf32>
    %155 = arith.addf %153, %154 : vector<16x1xf32>
    %156 = math.rsqrt %155 : vector<16x1xf32>
    %157 = vector.broadcast %156 : vector<16x1xf32> to vector<16x32xf32>
    %158 = arith.mulf %148, %157 : vector<16x32xf32>
    %159 = vector.broadcast %141 : vector<1x32xf32> to vector<16x32xf32>
    %160 = arith.mulf %158, %159 : vector<16x32xf32>
    %161 = vector.broadcast %142 : vector<1x32xf32> to vector<16x32xf32>
    %162 = arith.addf %160, %161 : vector<16x32xf32>
    %c152 = arith.constant 152 : index
    %c0_66 = arith.constant 0 : index
    %163 = vector.load %arg3[%c152, %c0_66] : memref<760x64xf32, #tpu.memory_space<vmem>>, vector<32x32xf32>
    %cst_67 = arith.constant dense<0.000000e+00> : vector<16x32xf32>
    %164 = tpu.matmul %162, %163, %cst_67 {dimension_numbers = #tpu.dot_dimension_numbers<[1], [0], [0], [1], [0, 0, 1, 1], [], []>} : vector<16x32xf32>, vector<32x32xf32>, vector<16x32xf32> -> vector<16x32xf32>
    %c4 = arith.constant 4 : index
    %c0_68 = arith.constant 0 : index
    %165 = vector.load %arg4[%c4, %c0_68] : memref<40x64xf32, #tpu.memory_space<vmem>>, vector<1x32xf32>
    %166 = vector.broadcast %165 : vector<1x32xf32> to vector<16x32xf32>
    %167 = arith.addf %164, %166 : vector<16x32xf32>
    %cst_69 = arith.constant 0.000000e+00 : f32
    %168 = vector.broadcast %cst_69 : f32 to vector<16x32xf32>
    %169 = arith.select %20, %167, %168 : vector<16x32xi1>, vector<16x32xf32>
    %cst_70 = arith.constant 0.000000e+00 : f32
    %170 = vector.broadcast %cst_70 : f32 to vector<16x32xf32>
    %171 = arith.select %24, %167, %170 : vector<16x32xi1>, vector<16x32xf32>
    %cst_71 = arith.constant 0.000000e+00 : f32
    %172 = vector.broadcast %cst_71 : f32 to vector<16x32xf32>
    %173 = arith.select %28, %167, %172 : vector<16x32xi1>, vector<16x32xf32>
    %cst_72 = arith.constant 0.000000e+00 : f32
    %174 = vector.broadcast %cst_72 : f32 to vector<16x32xf32>
    %175 = arith.select %32, %167, %174 : vector<16x32xi1>, vector<16x32xf32>
    %176 = tpu.concatenate %169, %171, %173, %175 in 0 : vector<16x32xf32>, vector<16x32xf32>, vector<16x32xf32>, vector<16x32xf32> -> vector<64x32xf32>
    %cst_73 = arith.constant dense<0.000000e+00> : vector<64x16xf32>
    %177 = tpu.matmul %176, %68, %cst_73 {dimension_numbers = #tpu.dot_dimension_numbers<[1], [1], [0], [0], [0, 0, 1, 0], [], []>} : vector<64x32xf32>, vector<16x32xf32>, vector<64x16xf32> -> vector<64x16xf32>
    %178 = arith.addf %177, %62 : vector<64x16xf32>
    %cst_74 = arith.constant dense<0xFF800000> : vector<64xf32>
    %179 = vector.multi_reduction <maximumf>, %178, %cst_74 [1] : vector<64x16xf32> to vector<64xf32>
    %180 = vector.shape_cast %179 : vector<64xf32> to vector<64x1xf32>
    %181 = vector.broadcast %180 : vector<64x1xf32> to vector<64x16xf32>
    %182 = arith.subf %178, %181 : vector<64x16xf32>
    %183 = math.exp %182 : vector<64x16xf32>
    %cst_75 = arith.constant dense<0.000000e+00> : vector<64xf32>
    %184 = vector.multi_reduction <add>, %183, %cst_75 [1] : vector<64x16xf32> to vector<64xf32>
    %185 = vector.shape_cast %184 : vector<64xf32> to vector<64x1xf32>
    %186 = vector.broadcast %185 : vector<64x1xf32> to vector<64x16xf32>
    %187 = arith.divf %183, %186 : vector<64x16xf32>
    %cst_76 = arith.constant dense<0.000000e+00> : vector<64x32xf32>
    %188 = tpu.matmul %187, %78, %cst_76 {dimension_numbers = #tpu.dot_dimension_numbers<[1], [0], [0], [1], [0, 0, 1, 1], [], []>} : vector<64x16xf32>, vector<16x32xf32>, vector<64x32xf32> -> vector<64x32xf32>
    %189 = vector.extract_strided_slice %188 {offsets = [0, 0], sizes = [16, 32], strides = [1, 1]} : vector<64x32xf32> to vector<16x32xf32>
    %cst_77 = arith.constant 0.000000e+00 : f32
    %190 = vector.broadcast %cst_77 : f32 to vector<16x32xf32>
    %191 = arith.select %20, %189, %190 : vector<16x32xi1>, vector<16x32xf32>
    %192 = vector.extract_strided_slice %188 {offsets = [16, 0], sizes = [16, 32], strides = [1, 1]} : vector<64x32xf32> to vector<16x32xf32>
    %cst_78 = arith.constant 0.000000e+00 : f32
    %193 = vector.broadcast %cst_78 : f32 to vector<16x32xf32>
    %194 = arith.select %24, %192, %193 : vector<16x32xi1>, vector<16x32xf32>
    %195 = arith.addf %191, %194 : vector<16x32xf32>
    %196 = vector.extract_strided_slice %188 {offsets = [32, 0], sizes = [16, 32], strides = [1, 1]} : vector<64x32xf32> to vector<16x32xf32>
    %cst_79 = arith.constant 0.000000e+00 : f32
    %197 = vector.broadcast %cst_79 : f32 to vector<16x32xf32>
    %198 = arith.select %28, %196, %197 : vector<16x32xi1>, vector<16x32xf32>
    %199 = arith.addf %195, %198 : vector<16x32xf32>
    %200 = vector.extract_strided_slice %188 {offsets = [48, 0], sizes = [16, 32], strides = [1, 1]} : vector<64x32xf32> to vector<16x32xf32>
    %cst_80 = arith.constant 0.000000e+00 : f32
    %201 = vector.broadcast %cst_80 : f32 to vector<16x32xf32>
    %202 = arith.select %32, %200, %201 : vector<16x32xi1>, vector<16x32xf32>
    %203 = arith.addf %199, %202 : vector<16x32xf32>
    %c184 = arith.constant 184 : index
    %c0_81 = arith.constant 0 : index
    %204 = vector.load %arg3[%c184, %c0_81] : memref<760x64xf32, #tpu.memory_space<vmem>>, vector<32x32xf32>
    %cst_82 = arith.constant dense<0.000000e+00> : vector<16x32xf32>
    %205 = tpu.matmul %203, %204, %cst_82 {dimension_numbers = #tpu.dot_dimension_numbers<[1], [0], [0], [1], [0, 0, 1, 1], [], []>} : vector<16x32xf32>, vector<32x32xf32>, vector<16x32xf32> -> vector<16x32xf32>
    %c5 = arith.constant 5 : index
    %c0_83 = arith.constant 0 : index
    %206 = vector.load %arg4[%c5, %c0_83] : memref<40x64xf32, #tpu.memory_space<vmem>>, vector<1x32xf32>
    %207 = vector.broadcast %206 : vector<1x32xf32> to vector<16x32xf32>
    %208 = arith.addf %205, %207 : vector<16x32xf32>
    %209 = arith.addf %162, %208 : vector<16x32xf32>
    %c10 = arith.constant 10 : index
    %c0_84 = arith.constant 0 : index
    %210 = vector.load %arg4[%c10, %c0_84] : memref<40x64xf32, #tpu.memory_space<vmem>>, vector<1x32xf32>
    %c11 = arith.constant 11 : index
    %c0_85 = arith.constant 0 : index
    %211 = vector.load %arg4[%c11, %c0_85] : memref<40x64xf32, #tpu.memory_space<vmem>>, vector<1x32xf32>
    %cst_86 = arith.constant dense<0.000000e+00> : vector<16xf32>
    %212 = vector.multi_reduction <add>, %209, %cst_86 [1] : vector<16x32xf32> to vector<16xf32>
    %213 = vector.shape_cast %212 : vector<16xf32> to vector<16x1xf32>
    %cst_87 = arith.constant 3.200000e+01 : f32
    %214 = vector.broadcast %cst_87 : f32 to vector<16x1xf32>
    %215 = arith.divf %213, %214 : vector<16x1xf32>
    %216 = vector.broadcast %215 : vector<16x1xf32> to vector<16x32xf32>
    %217 = arith.subf %209, %216 : vector<16x32xf32>
    %218 = arith.mulf %217, %217 : vector<16x32xf32>
    %cst_88 = arith.constant dense<0.000000e+00> : vector<16xf32>
    %219 = vector.multi_reduction <add>, %218, %cst_88 [1] : vector<16x32xf32> to vector<16xf32>
    %220 = vector.shape_cast %219 : vector<16xf32> to vector<16x1xf32>
    %cst_89 = arith.constant 3.200000e+01 : f32
    %221 = vector.broadcast %cst_89 : f32 to vector<16x1xf32>
    %222 = arith.divf %220, %221 : vector<16x1xf32>
    %cst_90 = arith.constant 9.99999974E-6 : f32
    %223 = vector.broadcast %cst_90 : f32 to vector<16x1xf32>
    %224 = arith.addf %222, %223 : vector<16x1xf32>
    %225 = math.rsqrt %224 : vector<16x1xf32>
    %226 = vector.broadcast %225 : vector<16x1xf32> to vector<16x32xf32>
    %227 = arith.mulf %217, %226 : vector<16x32xf32>
    %228 = vector.broadcast %210 : vector<1x32xf32> to vector<16x32xf32>
    %229 = arith.mulf %227, %228 : vector<16x32xf32>
    %230 = vector.broadcast %211 : vector<1x32xf32> to vector<16x32xf32>
    %231 = arith.addf %229, %230 : vector<16x32xf32>
    %c216 = arith.constant 216 : index
    %c0_91 = arith.constant 0 : index
    %232 = vector.load %arg3[%c216, %c0_91] : memref<760x64xf32, #tpu.memory_space<vmem>>, vector<32x64xf32>
    %cst_92 = arith.constant dense<0.000000e+00> : vector<16x64xf32>
    %233 = tpu.matmul %231, %232, %cst_92 {dimension_numbers = #tpu.dot_dimension_numbers<[1], [0], [0], [1], [0, 0, 1, 1], [], []>} : vector<16x32xf32>, vector<32x64xf32>, vector<16x64xf32> -> vector<16x64xf32>
    %c6 = arith.constant 6 : index
    %c0_93 = arith.constant 0 : index
    %234 = vector.load %arg4[%c6, %c0_93] : memref<40x64xf32, #tpu.memory_space<vmem>>, vector<1x64xf32>
    %235 = vector.broadcast %234 : vector<1x64xf32> to vector<16x64xf32>
    %236 = arith.addf %233, %235 : vector<16x64xf32>
    %cst_94 = arith.constant 0.000000e+00 : f32
    %237 = vector.broadcast %cst_94 : f32 to vector<16x64xf32>
    %238 = arith.maximumf %236, %237 : vector<16x64xf32>
    %c248 = arith.constant 248 : index
    %c0_95 = arith.constant 0 : index
    %239 = vector.load %arg3[%c248, %c0_95] : memref<760x64xf32, #tpu.memory_space<vmem>>, vector<64x32xf32>
    %cst_96 = arith.constant dense<0.000000e+00> : vector<16x32xf32>
    %240 = tpu.matmul %238, %239, %cst_96 {dimension_numbers = #tpu.dot_dimension_numbers<[1], [0], [0], [1], [0, 0, 1, 1], [], []>} : vector<16x64xf32>, vector<64x32xf32>, vector<16x32xf32> -> vector<16x32xf32>
    %c7 = arith.constant 7 : index
    %c0_97 = arith.constant 0 : index
    %241 = vector.load %arg4[%c7, %c0_97] : memref<40x64xf32, #tpu.memory_space<vmem>>, vector<1x32xf32>
    %242 = vector.broadcast %241 : vector<1x32xf32> to vector<16x32xf32>
    %243 = arith.addf %240, %242 : vector<16x32xf32>
    %244 = arith.addf %231, %243 : vector<16x32xf32>
    %c12 = arith.constant 12 : index
    %c0_98 = arith.constant 0 : index
    %245 = vector.load %arg4[%c12, %c0_98] : memref<40x64xf32, #tpu.memory_space<vmem>>, vector<1x32xf32>
    %c13 = arith.constant 13 : index
    %c0_99 = arith.constant 0 : index
    %246 = vector.load %arg4[%c13, %c0_99] : memref<40x64xf32, #tpu.memory_space<vmem>>, vector<1x32xf32>
    %cst_100 = arith.constant dense<0.000000e+00> : vector<16xf32>
    %247 = vector.multi_reduction <add>, %244, %cst_100 [1] : vector<16x32xf32> to vector<16xf32>
    %248 = vector.shape_cast %247 : vector<16xf32> to vector<16x1xf32>
    %cst_101 = arith.constant 3.200000e+01 : f32
    %249 = vector.broadcast %cst_101 : f32 to vector<16x1xf32>
    %250 = arith.divf %248, %249 : vector<16x1xf32>
    %251 = vector.broadcast %250 : vector<16x1xf32> to vector<16x32xf32>
    %252 = arith.subf %244, %251 : vector<16x32xf32>
    %253 = arith.mulf %252, %252 : vector<16x32xf32>
    %cst_102 = arith.constant dense<0.000000e+00> : vector<16xf32>
    %254 = vector.multi_reduction <add>, %253, %cst_102 [1] : vector<16x32xf32> to vector<16xf32>
    %255 = vector.shape_cast %254 : vector<16xf32> to vector<16x1xf32>
    %cst_103 = arith.constant 3.200000e+01 : f32
    %256 = vector.broadcast %cst_103 : f32 to vector<16x1xf32>
    %257 = arith.divf %255, %256 : vector<16x1xf32>
    %cst_104 = arith.constant 9.99999974E-6 : f32
    %258 = vector.broadcast %cst_104 : f32 to vector<16x1xf32>
    %259 = arith.addf %257, %258 : vector<16x1xf32>
    %260 = math.rsqrt %259 : vector<16x1xf32>
    %261 = vector.broadcast %260 : vector<16x1xf32> to vector<16x32xf32>
    %262 = arith.mulf %252, %261 : vector<16x32xf32>
    %263 = vector.broadcast %245 : vector<1x32xf32> to vector<16x32xf32>
    %264 = arith.mulf %262, %263 : vector<16x32xf32>
    %265 = vector.broadcast %246 : vector<1x32xf32> to vector<16x32xf32>
    %266 = arith.addf %264, %265 : vector<16x32xf32>
    %c312 = arith.constant 312 : index
    %c0_105 = arith.constant 0 : index
    %267 = vector.load %arg3[%c312, %c0_105] : memref<760x64xf32, #tpu.memory_space<vmem>>, vector<32x32xf32>
    %cst_106 = arith.constant dense<0.000000e+00> : vector<16x32xf32>
    %268 = tpu.matmul %266, %267, %cst_106 {dimension_numbers = #tpu.dot_dimension_numbers<[1], [0], [0], [1], [0, 0, 1, 1], [], []>} : vector<16x32xf32>, vector<32x32xf32>, vector<16x32xf32> -> vector<16x32xf32>
    %c14 = arith.constant 14 : index
    %c0_107 = arith.constant 0 : index
    %269 = vector.load %arg4[%c14, %c0_107] : memref<40x64xf32, #tpu.memory_space<vmem>>, vector<1x32xf32>
    %270 = vector.broadcast %269 : vector<1x32xf32> to vector<16x32xf32>
    %271 = arith.addf %268, %270 : vector<16x32xf32>
    %c344 = arith.constant 344 : index
    %c0_108 = arith.constant 0 : index
    %272 = vector.load %arg3[%c344, %c0_108] : memref<760x64xf32, #tpu.memory_space<vmem>>, vector<32x32xf32>
    %cst_109 = arith.constant dense<0.000000e+00> : vector<16x32xf32>
    %273 = tpu.matmul %266, %272, %cst_109 {dimension_numbers = #tpu.dot_dimension_numbers<[1], [0], [0], [1], [0, 0, 1, 1], [], []>} : vector<16x32xf32>, vector<32x32xf32>, vector<16x32xf32> -> vector<16x32xf32>
    %c15 = arith.constant 15 : index
    %c0_110 = arith.constant 0 : index
    %274 = vector.load %arg4[%c15, %c0_110] : memref<40x64xf32, #tpu.memory_space<vmem>>, vector<1x32xf32>
    %275 = vector.broadcast %274 : vector<1x32xf32> to vector<16x32xf32>
    %276 = arith.addf %273, %275 : vector<16x32xf32>
    %c376 = arith.constant 376 : index
    %c0_111 = arith.constant 0 : index
    %277 = vector.load %arg3[%c376, %c0_111] : memref<760x64xf32, #tpu.memory_space<vmem>>, vector<32x32xf32>
    %cst_112 = arith.constant dense<0.000000e+00> : vector<16x32xf32>
    %278 = tpu.matmul %266, %277, %cst_112 {dimension_numbers = #tpu.dot_dimension_numbers<[1], [0], [0], [1], [0, 0, 1, 1], [], []>} : vector<16x32xf32>, vector<32x32xf32>, vector<16x32xf32> -> vector<16x32xf32>
    %c16 = arith.constant 16 : index
    %c0_113 = arith.constant 0 : index
    %279 = vector.load %arg4[%c16, %c0_113] : memref<40x64xf32, #tpu.memory_space<vmem>>, vector<1x32xf32>
    %280 = vector.broadcast %279 : vector<1x32xf32> to vector<16x32xf32>
    %281 = arith.addf %278, %280 : vector<16x32xf32>
    %cst_114 = arith.constant 0.000000e+00 : f32
    %282 = vector.broadcast %cst_114 : f32 to vector<16x32xf32>
    %283 = arith.select %20, %271, %282 : vector<16x32xi1>, vector<16x32xf32>
    %cst_115 = arith.constant 0.000000e+00 : f32
    %284 = vector.broadcast %cst_115 : f32 to vector<16x32xf32>
    %285 = arith.select %24, %271, %284 : vector<16x32xi1>, vector<16x32xf32>
    %cst_116 = arith.constant 0.000000e+00 : f32
    %286 = vector.broadcast %cst_116 : f32 to vector<16x32xf32>
    %287 = arith.select %28, %271, %286 : vector<16x32xi1>, vector<16x32xf32>
    %cst_117 = arith.constant 0.000000e+00 : f32
    %288 = vector.broadcast %cst_117 : f32 to vector<16x32xf32>
    %289 = arith.select %32, %271, %288 : vector<16x32xi1>, vector<16x32xf32>
    %290 = tpu.concatenate %283, %285, %287, %289 in 0 : vector<16x32xf32>, vector<16x32xf32>, vector<16x32xf32>, vector<16x32xf32> -> vector<64x32xf32>
    %cst_118 = arith.constant dense<0.000000e+00> : vector<64x16xf32>
    %291 = tpu.matmul %290, %276, %cst_118 {dimension_numbers = #tpu.dot_dimension_numbers<[1], [1], [0], [0], [0, 0, 1, 0], [], []>} : vector<64x32xf32>, vector<16x32xf32>, vector<64x16xf32> -> vector<64x16xf32>
    %292 = arith.addf %291, %50 : vector<64x16xf32>
    %cst_119 = arith.constant dense<0xFF800000> : vector<64xf32>
    %293 = vector.multi_reduction <maximumf>, %292, %cst_119 [1] : vector<64x16xf32> to vector<64xf32>
    %294 = vector.shape_cast %293 : vector<64xf32> to vector<64x1xf32>
    %295 = vector.broadcast %294 : vector<64x1xf32> to vector<64x16xf32>
    %296 = arith.subf %292, %295 : vector<64x16xf32>
    %297 = math.exp %296 : vector<64x16xf32>
    %cst_120 = arith.constant dense<0.000000e+00> : vector<64xf32>
    %298 = vector.multi_reduction <add>, %297, %cst_120 [1] : vector<64x16xf32> to vector<64xf32>
    %299 = vector.shape_cast %298 : vector<64xf32> to vector<64x1xf32>
    %300 = vector.broadcast %299 : vector<64x1xf32> to vector<64x16xf32>
    %301 = arith.divf %297, %300 : vector<64x16xf32>
    %cst_121 = arith.constant dense<0.000000e+00> : vector<64x32xf32>
    %302 = tpu.matmul %301, %281, %cst_121 {dimension_numbers = #tpu.dot_dimension_numbers<[1], [0], [0], [1], [0, 0, 1, 1], [], []>} : vector<64x16xf32>, vector<16x32xf32>, vector<64x32xf32> -> vector<64x32xf32>
    %303 = vector.extract_strided_slice %302 {offsets = [0, 0], sizes = [16, 32], strides = [1, 1]} : vector<64x32xf32> to vector<16x32xf32>
    %cst_122 = arith.constant 0.000000e+00 : f32
    %304 = vector.broadcast %cst_122 : f32 to vector<16x32xf32>
    %305 = arith.select %20, %303, %304 : vector<16x32xi1>, vector<16x32xf32>
    %306 = vector.extract_strided_slice %302 {offsets = [16, 0], sizes = [16, 32], strides = [1, 1]} : vector<64x32xf32> to vector<16x32xf32>
    %cst_123 = arith.constant 0.000000e+00 : f32
    %307 = vector.broadcast %cst_123 : f32 to vector<16x32xf32>
    %308 = arith.select %24, %306, %307 : vector<16x32xi1>, vector<16x32xf32>
    %309 = arith.addf %305, %308 : vector<16x32xf32>
    %310 = vector.extract_strided_slice %302 {offsets = [32, 0], sizes = [16, 32], strides = [1, 1]} : vector<64x32xf32> to vector<16x32xf32>
    %cst_124 = arith.constant 0.000000e+00 : f32
    %311 = vector.broadcast %cst_124 : f32 to vector<16x32xf32>
    %312 = arith.select %28, %310, %311 : vector<16x32xi1>, vector<16x32xf32>
    %313 = arith.addf %309, %312 : vector<16x32xf32>
    %314 = vector.extract_strided_slice %302 {offsets = [48, 0], sizes = [16, 32], strides = [1, 1]} : vector<64x32xf32> to vector<16x32xf32>
    %cst_125 = arith.constant 0.000000e+00 : f32
    %315 = vector.broadcast %cst_125 : f32 to vector<16x32xf32>
    %316 = arith.select %32, %314, %315 : vector<16x32xi1>, vector<16x32xf32>
    %317 = arith.addf %313, %316 : vector<16x32xf32>
    %c408 = arith.constant 408 : index
    %c0_126 = arith.constant 0 : index
    %318 = vector.load %arg3[%c408, %c0_126] : memref<760x64xf32, #tpu.memory_space<vmem>>, vector<32x32xf32>
    %cst_127 = arith.constant dense<0.000000e+00> : vector<16x32xf32>
    %319 = tpu.matmul %317, %318, %cst_127 {dimension_numbers = #tpu.dot_dimension_numbers<[1], [0], [0], [1], [0, 0, 1, 1], [], []>} : vector<16x32xf32>, vector<32x32xf32>, vector<16x32xf32> -> vector<16x32xf32>
    %c17 = arith.constant 17 : index
    %c0_128 = arith.constant 0 : index
    %320 = vector.load %arg4[%c17, %c0_128] : memref<40x64xf32, #tpu.memory_space<vmem>>, vector<1x32xf32>
    %321 = vector.broadcast %320 : vector<1x32xf32> to vector<16x32xf32>
    %322 = arith.addf %319, %321 : vector<16x32xf32>
    %323 = arith.addf %266, %322 : vector<16x32xf32>
    %c22 = arith.constant 22 : index
    %c0_129 = arith.constant 0 : index
    %324 = vector.load %arg4[%c22, %c0_129] : memref<40x64xf32, #tpu.memory_space<vmem>>, vector<1x32xf32>
    %c23 = arith.constant 23 : index
    %c0_130 = arith.constant 0 : index
    %325 = vector.load %arg4[%c23, %c0_130] : memref<40x64xf32, #tpu.memory_space<vmem>>, vector<1x32xf32>
    %cst_131 = arith.constant dense<0.000000e+00> : vector<16xf32>
    %326 = vector.multi_reduction <add>, %323, %cst_131 [1] : vector<16x32xf32> to vector<16xf32>
    %327 = vector.shape_cast %326 : vector<16xf32> to vector<16x1xf32>
    %cst_132 = arith.constant 3.200000e+01 : f32
    %328 = vector.broadcast %cst_132 : f32 to vector<16x1xf32>
    %329 = arith.divf %327, %328 : vector<16x1xf32>
    %330 = vector.broadcast %329 : vector<16x1xf32> to vector<16x32xf32>
    %331 = arith.subf %323, %330 : vector<16x32xf32>
    %332 = arith.mulf %331, %331 : vector<16x32xf32>
    %cst_133 = arith.constant dense<0.000000e+00> : vector<16xf32>
    %333 = vector.multi_reduction <add>, %332, %cst_133 [1] : vector<16x32xf32> to vector<16xf32>
    %334 = vector.shape_cast %333 : vector<16xf32> to vector<16x1xf32>
    %cst_134 = arith.constant 3.200000e+01 : f32
    %335 = vector.broadcast %cst_134 : f32 to vector<16x1xf32>
    %336 = arith.divf %334, %335 : vector<16x1xf32>
    %cst_135 = arith.constant 9.99999974E-6 : f32
    %337 = vector.broadcast %cst_135 : f32 to vector<16x1xf32>
    %338 = arith.addf %336, %337 : vector<16x1xf32>
    %339 = math.rsqrt %338 : vector<16x1xf32>
    %340 = vector.broadcast %339 : vector<16x1xf32> to vector<16x32xf32>
    %341 = arith.mulf %331, %340 : vector<16x32xf32>
    %342 = vector.broadcast %324 : vector<1x32xf32> to vector<16x32xf32>
    %343 = arith.mulf %341, %342 : vector<16x32xf32>
    %344 = vector.broadcast %325 : vector<1x32xf32> to vector<16x32xf32>
    %345 = arith.addf %343, %344 : vector<16x32xf32>
    %c440 = arith.constant 440 : index
    %c0_136 = arith.constant 0 : index
    %346 = vector.load %arg3[%c440, %c0_136] : memref<760x64xf32, #tpu.memory_space<vmem>>, vector<32x32xf32>
    %cst_137 = arith.constant dense<0.000000e+00> : vector<16x32xf32>
    %347 = tpu.matmul %345, %346, %cst_137 {dimension_numbers = #tpu.dot_dimension_numbers<[1], [0], [0], [1], [0, 0, 1, 1], [], []>} : vector<16x32xf32>, vector<32x32xf32>, vector<16x32xf32> -> vector<16x32xf32>
    %c18 = arith.constant 18 : index
    %c0_138 = arith.constant 0 : index
    %348 = vector.load %arg4[%c18, %c0_138] : memref<40x64xf32, #tpu.memory_space<vmem>>, vector<1x32xf32>
    %349 = vector.broadcast %348 : vector<1x32xf32> to vector<16x32xf32>
    %350 = arith.addf %347, %349 : vector<16x32xf32>
    %cst_139 = arith.constant 0.000000e+00 : f32
    %351 = vector.broadcast %cst_139 : f32 to vector<16x32xf32>
    %352 = arith.select %20, %350, %351 : vector<16x32xi1>, vector<16x32xf32>
    %cst_140 = arith.constant 0.000000e+00 : f32
    %353 = vector.broadcast %cst_140 : f32 to vector<16x32xf32>
    %354 = arith.select %24, %350, %353 : vector<16x32xi1>, vector<16x32xf32>
    %cst_141 = arith.constant 0.000000e+00 : f32
    %355 = vector.broadcast %cst_141 : f32 to vector<16x32xf32>
    %356 = arith.select %28, %350, %355 : vector<16x32xi1>, vector<16x32xf32>
    %cst_142 = arith.constant 0.000000e+00 : f32
    %357 = vector.broadcast %cst_142 : f32 to vector<16x32xf32>
    %358 = arith.select %32, %350, %357 : vector<16x32xi1>, vector<16x32xf32>
    %359 = tpu.concatenate %352, %354, %356, %358 in 0 : vector<16x32xf32>, vector<16x32xf32>, vector<16x32xf32>, vector<16x32xf32> -> vector<64x32xf32>
    %cst_143 = arith.constant dense<0.000000e+00> : vector<64x16xf32>
    %360 = tpu.matmul %359, %73, %cst_143 {dimension_numbers = #tpu.dot_dimension_numbers<[1], [1], [0], [0], [0, 0, 1, 0], [], []>} : vector<64x32xf32>, vector<16x32xf32>, vector<64x16xf32> -> vector<64x16xf32>
    %361 = arith.addf %360, %62 : vector<64x16xf32>
    %cst_144 = arith.constant dense<0xFF800000> : vector<64xf32>
    %362 = vector.multi_reduction <maximumf>, %361, %cst_144 [1] : vector<64x16xf32> to vector<64xf32>
    %363 = vector.shape_cast %362 : vector<64xf32> to vector<64x1xf32>
    %364 = vector.broadcast %363 : vector<64x1xf32> to vector<64x16xf32>
    %365 = arith.subf %361, %364 : vector<64x16xf32>
    %366 = math.exp %365 : vector<64x16xf32>
    %cst_145 = arith.constant dense<0.000000e+00> : vector<64xf32>
    %367 = vector.multi_reduction <add>, %366, %cst_145 [1] : vector<64x16xf32> to vector<64xf32>
    %368 = vector.shape_cast %367 : vector<64xf32> to vector<64x1xf32>
    %369 = vector.broadcast %368 : vector<64x1xf32> to vector<64x16xf32>
    %370 = arith.divf %366, %369 : vector<64x16xf32>
    %cst_146 = arith.constant dense<0.000000e+00> : vector<64x32xf32>
    %371 = tpu.matmul %370, %83, %cst_146 {dimension_numbers = #tpu.dot_dimension_numbers<[1], [0], [0], [1], [0, 0, 1, 1], [], []>} : vector<64x16xf32>, vector<16x32xf32>, vector<64x32xf32> -> vector<64x32xf32>
    %372 = vector.extract_strided_slice %371 {offsets = [0, 0], sizes = [16, 32], strides = [1, 1]} : vector<64x32xf32> to vector<16x32xf32>
    %cst_147 = arith.constant 0.000000e+00 : f32
    %373 = vector.broadcast %cst_147 : f32 to vector<16x32xf32>
    %374 = arith.select %20, %372, %373 : vector<16x32xi1>, vector<16x32xf32>
    %375 = vector.extract_strided_slice %371 {offsets = [16, 0], sizes = [16, 32], strides = [1, 1]} : vector<64x32xf32> to vector<16x32xf32>
    %cst_148 = arith.constant 0.000000e+00 : f32
    %376 = vector.broadcast %cst_148 : f32 to vector<16x32xf32>
    %377 = arith.select %24, %375, %376 : vector<16x32xi1>, vector<16x32xf32>
    %378 = arith.addf %374, %377 : vector<16x32xf32>
    %379 = vector.extract_strided_slice %371 {offsets = [32, 0], sizes = [16, 32], strides = [1, 1]} : vector<64x32xf32> to vector<16x32xf32>
    %cst_149 = arith.constant 0.000000e+00 : f32
    %380 = vector.broadcast %cst_149 : f32 to vector<16x32xf32>
    %381 = arith.select %28, %379, %380 : vector<16x32xi1>, vector<16x32xf32>
    %382 = arith.addf %378, %381 : vector<16x32xf32>
    %383 = vector.extract_strided_slice %371 {offsets = [48, 0], sizes = [16, 32], strides = [1, 1]} : vector<64x32xf32> to vector<16x32xf32>
    %cst_150 = arith.constant 0.000000e+00 : f32
    %384 = vector.broadcast %cst_150 : f32 to vector<16x32xf32>
    %385 = arith.select %32, %383, %384 : vector<16x32xi1>, vector<16x32xf32>
    %386 = arith.addf %382, %385 : vector<16x32xf32>
    %c472 = arith.constant 472 : index
    %c0_151 = arith.constant 0 : index
    %387 = vector.load %arg3[%c472, %c0_151] : memref<760x64xf32, #tpu.memory_space<vmem>>, vector<32x32xf32>
    %cst_152 = arith.constant dense<0.000000e+00> : vector<16x32xf32>
    %388 = tpu.matmul %386, %387, %cst_152 {dimension_numbers = #tpu.dot_dimension_numbers<[1], [0], [0], [1], [0, 0, 1, 1], [], []>} : vector<16x32xf32>, vector<32x32xf32>, vector<16x32xf32> -> vector<16x32xf32>
    %c19 = arith.constant 19 : index
    %c0_153 = arith.constant 0 : index
    %389 = vector.load %arg4[%c19, %c0_153] : memref<40x64xf32, #tpu.memory_space<vmem>>, vector<1x32xf32>
    %390 = vector.broadcast %389 : vector<1x32xf32> to vector<16x32xf32>
    %391 = arith.addf %388, %390 : vector<16x32xf32>
    %392 = arith.addf %345, %391 : vector<16x32xf32>
    %c24_154 = arith.constant 24 : index
    %c0_155 = arith.constant 0 : index
    %393 = vector.load %arg4[%c24_154, %c0_155] : memref<40x64xf32, #tpu.memory_space<vmem>>, vector<1x32xf32>
    %c25 = arith.constant 25 : index
    %c0_156 = arith.constant 0 : index
    %394 = vector.load %arg4[%c25, %c0_156] : memref<40x64xf32, #tpu.memory_space<vmem>>, vector<1x32xf32>
    %cst_157 = arith.constant dense<0.000000e+00> : vector<16xf32>
    %395 = vector.multi_reduction <add>, %392, %cst_157 [1] : vector<16x32xf32> to vector<16xf32>
    %396 = vector.shape_cast %395 : vector<16xf32> to vector<16x1xf32>
    %cst_158 = arith.constant 3.200000e+01 : f32
    %397 = vector.broadcast %cst_158 : f32 to vector<16x1xf32>
    %398 = arith.divf %396, %397 : vector<16x1xf32>
    %399 = vector.broadcast %398 : vector<16x1xf32> to vector<16x32xf32>
    %400 = arith.subf %392, %399 : vector<16x32xf32>
    %401 = arith.mulf %400, %400 : vector<16x32xf32>
    %cst_159 = arith.constant dense<0.000000e+00> : vector<16xf32>
    %402 = vector.multi_reduction <add>, %401, %cst_159 [1] : vector<16x32xf32> to vector<16xf32>
    %403 = vector.shape_cast %402 : vector<16xf32> to vector<16x1xf32>
    %cst_160 = arith.constant 3.200000e+01 : f32
    %404 = vector.broadcast %cst_160 : f32 to vector<16x1xf32>
    %405 = arith.divf %403, %404 : vector<16x1xf32>
    %cst_161 = arith.constant 9.99999974E-6 : f32
    %406 = vector.broadcast %cst_161 : f32 to vector<16x1xf32>
    %407 = arith.addf %405, %406 : vector<16x1xf32>
    %408 = math.rsqrt %407 : vector<16x1xf32>
    %409 = vector.broadcast %408 : vector<16x1xf32> to vector<16x32xf32>
    %410 = arith.mulf %400, %409 : vector<16x32xf32>
    %411 = vector.broadcast %393 : vector<1x32xf32> to vector<16x32xf32>
    %412 = arith.mulf %410, %411 : vector<16x32xf32>
    %413 = vector.broadcast %394 : vector<1x32xf32> to vector<16x32xf32>
    %414 = arith.addf %412, %413 : vector<16x32xf32>
    %c504 = arith.constant 504 : index
    %c0_162 = arith.constant 0 : index
    %415 = vector.load %arg3[%c504, %c0_162] : memref<760x64xf32, #tpu.memory_space<vmem>>, vector<32x64xf32>
    %cst_163 = arith.constant dense<0.000000e+00> : vector<16x64xf32>
    %416 = tpu.matmul %414, %415, %cst_163 {dimension_numbers = #tpu.dot_dimension_numbers<[1], [0], [0], [1], [0, 0, 1, 1], [], []>} : vector<16x32xf32>, vector<32x64xf32>, vector<16x64xf32> -> vector<16x64xf32>
    %c20 = arith.constant 20 : index
    %c0_164 = arith.constant 0 : index
    %417 = vector.load %arg4[%c20, %c0_164] : memref<40x64xf32, #tpu.memory_space<vmem>>, vector<1x64xf32>
    %418 = vector.broadcast %417 : vector<1x64xf32> to vector<16x64xf32>
    %419 = arith.addf %416, %418 : vector<16x64xf32>
    %cst_165 = arith.constant 0.000000e+00 : f32
    %420 = vector.broadcast %cst_165 : f32 to vector<16x64xf32>
    %421 = arith.maximumf %419, %420 : vector<16x64xf32>
    %c536 = arith.constant 536 : index
    %c0_166 = arith.constant 0 : index
    %422 = vector.load %arg3[%c536, %c0_166] : memref<760x64xf32, #tpu.memory_space<vmem>>, vector<64x32xf32>
    %cst_167 = arith.constant dense<0.000000e+00> : vector<16x32xf32>
    %423 = tpu.matmul %421, %422, %cst_167 {dimension_numbers = #tpu.dot_dimension_numbers<[1], [0], [0], [1], [0, 0, 1, 1], [], []>} : vector<16x64xf32>, vector<64x32xf32>, vector<16x32xf32> -> vector<16x32xf32>
    %c21 = arith.constant 21 : index
    %c0_168 = arith.constant 0 : index
    %424 = vector.load %arg4[%c21, %c0_168] : memref<40x64xf32, #tpu.memory_space<vmem>>, vector<1x32xf32>
    %425 = vector.broadcast %424 : vector<1x32xf32> to vector<16x32xf32>
    %426 = arith.addf %423, %425 : vector<16x32xf32>
    %427 = arith.addf %414, %426 : vector<16x32xf32>
    %c26 = arith.constant 26 : index
    %c0_169 = arith.constant 0 : index
    %428 = vector.load %arg4[%c26, %c0_169] : memref<40x64xf32, #tpu.memory_space<vmem>>, vector<1x32xf32>
    %c27 = arith.constant 27 : index
    %c0_170 = arith.constant 0 : index
    %429 = vector.load %arg4[%c27, %c0_170] : memref<40x64xf32, #tpu.memory_space<vmem>>, vector<1x32xf32>
    %cst_171 = arith.constant dense<0.000000e+00> : vector<16xf32>
    %430 = vector.multi_reduction <add>, %427, %cst_171 [1] : vector<16x32xf32> to vector<16xf32>
    %431 = vector.shape_cast %430 : vector<16xf32> to vector<16x1xf32>
    %cst_172 = arith.constant 3.200000e+01 : f32
    %432 = vector.broadcast %cst_172 : f32 to vector<16x1xf32>
    %433 = arith.divf %431, %432 : vector<16x1xf32>
    %434 = vector.broadcast %433 : vector<16x1xf32> to vector<16x32xf32>
    %435 = arith.subf %427, %434 : vector<16x32xf32>
    %436 = arith.mulf %435, %435 : vector<16x32xf32>
    %cst_173 = arith.constant dense<0.000000e+00> : vector<16xf32>
    %437 = vector.multi_reduction <add>, %436, %cst_173 [1] : vector<16x32xf32> to vector<16xf32>
    %438 = vector.shape_cast %437 : vector<16xf32> to vector<16x1xf32>
    %cst_174 = arith.constant 3.200000e+01 : f32
    %439 = vector.broadcast %cst_174 : f32 to vector<16x1xf32>
    %440 = arith.divf %438, %439 : vector<16x1xf32>
    %cst_175 = arith.constant 9.99999974E-6 : f32
    %441 = vector.broadcast %cst_175 : f32 to vector<16x1xf32>
    %442 = arith.addf %440, %441 : vector<16x1xf32>
    %443 = math.rsqrt %442 : vector<16x1xf32>
    %444 = vector.broadcast %443 : vector<16x1xf32> to vector<16x32xf32>
    %445 = arith.mulf %435, %444 : vector<16x32xf32>
    %446 = vector.broadcast %428 : vector<1x32xf32> to vector<16x32xf32>
    %447 = arith.mulf %445, %446 : vector<16x32xf32>
    %448 = vector.broadcast %429 : vector<1x32xf32> to vector<16x32xf32>
    %449 = arith.addf %447, %448 : vector<16x32xf32>
    %c32 = arith.constant 32 : index
    %c0_176 = arith.constant 0 : index
    %450 = vector.load %arg4[%c32, %c0_176] : memref<40x64xf32, #tpu.memory_space<vmem>>, vector<1x32xf32>
    %c33 = arith.constant 33 : index
    %c0_177 = arith.constant 0 : index
    %451 = vector.load %arg4[%c33, %c0_177] : memref<40x64xf32, #tpu.memory_space<vmem>>, vector<1x32xf32>
    %cst_178 = arith.constant dense<0.000000e+00> : vector<16xf32>
    %452 = vector.multi_reduction <add>, %449, %cst_178 [1] : vector<16x32xf32> to vector<16xf32>
    %453 = vector.shape_cast %452 : vector<16xf32> to vector<16x1xf32>
    %cst_179 = arith.constant 3.200000e+01 : f32
    %454 = vector.broadcast %cst_179 : f32 to vector<16x1xf32>
    %455 = arith.divf %453, %454 : vector<16x1xf32>
    %456 = vector.broadcast %455 : vector<16x1xf32> to vector<16x32xf32>
    %457 = arith.subf %449, %456 : vector<16x32xf32>
    %458 = arith.mulf %457, %457 : vector<16x32xf32>
    %cst_180 = arith.constant dense<0.000000e+00> : vector<16xf32>
    %459 = vector.multi_reduction <add>, %458, %cst_180 [1] : vector<16x32xf32> to vector<16xf32>
    %460 = vector.shape_cast %459 : vector<16xf32> to vector<16x1xf32>
    %cst_181 = arith.constant 3.200000e+01 : f32
    %461 = vector.broadcast %cst_181 : f32 to vector<16x1xf32>
    %462 = arith.divf %460, %461 : vector<16x1xf32>
    %cst_182 = arith.constant 9.99999974E-6 : f32
    %463 = vector.broadcast %cst_182 : f32 to vector<16x1xf32>
    %464 = arith.addf %462, %463 : vector<16x1xf32>
    %465 = math.rsqrt %464 : vector<16x1xf32>
    %466 = vector.broadcast %465 : vector<16x1xf32> to vector<16x32xf32>
    %467 = arith.mulf %457, %466 : vector<16x32xf32>
    %468 = vector.broadcast %450 : vector<1x32xf32> to vector<16x32xf32>
    %469 = arith.mulf %467, %468 : vector<16x32xf32>
    %470 = vector.broadcast %451 : vector<1x32xf32> to vector<16x32xf32>
    %471 = arith.addf %469, %470 : vector<16x32xf32>
    %c728 = arith.constant 728 : index
    %c0_183 = arith.constant 0 : index
    %472 = vector.load %arg3[%c728, %c0_183] : memref<760x64xf32, #tpu.memory_space<vmem>>, vector<32x16xf32>
    %cst_184 = arith.constant dense<0.000000e+00> : vector<16x16xf32>
    %473 = tpu.matmul %471, %472, %cst_184 {dimension_numbers = #tpu.dot_dimension_numbers<[1], [0], [0], [1], [0, 0, 1, 1], [], []>} : vector<16x32xf32>, vector<32x16xf32>, vector<16x16xf32> -> vector<16x16xf32>
    %c34 = arith.constant 34 : index
    %c0_185 = arith.constant 0 : index
    %474 = vector.load %arg4[%c34, %c0_185] : memref<40x64xf32, #tpu.memory_space<vmem>>, vector<1x16xf32>
    %475 = vector.broadcast %474 : vector<1x16xf32> to vector<16x16xf32>
    %476 = arith.addf %473, %475 : vector<16x16xf32>
    %c0_186 = arith.constant 0 : index
    %c0_187 = arith.constant 0 : index
    %477 = vector.load %arg5[%c0_186, %c0_187] : memref<16x16xf32, #tpu.memory_space<vmem>>, vector<16x16xf32>
    tpu.vector_store %arg5[%c0_186, %c0_187], %476 {strides = array<i32>} : memref<16x16xf32, #tpu.memory_space<vmem>>, vector<16x16xf32>,
    return
  }
  func.func @transform_0(%arg0: i32) -> (i32, i32) {
    %c0_i32 = arith.constant 0 : i32
    %c0_i32_0 = arith.constant 0 : i32
    %c0_i32_1 = arith.constant 0 : i32
    return %c0_i32, %c0_i32_0 : i32, i32
  }
  func.func @transform_1(%arg0: i32) -> (i32, i32) {
    %c0_i32 = arith.constant 0 : i32
    %c0_i32_0 = arith.constant 0 : i32
    %c0_i32_1 = arith.constant 0 : i32
    return %c0_i32, %c0_i32_0 : i32, i32
  }
  func.func @transform_2(%arg0: i32) -> (i32, i32) {
    %c0_i32 = arith.constant 0 : i32
    %c0_i32_0 = arith.constant 0 : i32
    %c0_i32_1 = arith.constant 0 : i32
    return %c0_i32, %c0_i32_0 : i32, i32
  }
  func.func @transform_3(%arg0: i32) -> (i32, i32) {
    %c0_i32 = arith.constant 0 : i32
    %c0_i32_0 = arith.constant 0 : i32
    %c0_i32_1 = arith.constant 0 : i32
    return %c0_i32, %c0_i32_0 : i32, i32
  }
  func.func @transform_4(%arg0: i32) -> (i32, i32) {
    %c0_i32 = arith.constant 0 : i32
    %c0_i32_0 = arith.constant 0 : i32
    %c0_i32_1 = arith.constant 0 : i32
    return %c0_i32, %c0_i32_0 : i32, i32
  }
}

</mosaic_0001>

<bundles_post_ra>
// kernel: decoder_forward.1
= control target key start
LH: loop header
LB: loop body
LE: loop exit
PB: predicated region body
PF: predicated region fallthrough
CT: control target
= control target key end

     0   :  { %v5044_v2 = vmov 0   ;;  %s6107_s0 = inlined_call_operand.vmem [shape: s32[16,1], index: 0, kind: input, shape index: {}]   ;;  %s6108_s1 = inlined_call_operand.vmem [shape: f32[16,32], index: 1, kind: input, shape index: {}]   ;;  %s6109_s2 = inlined_call_operand.vmem [shape: f32[760,64], index: 2, kind: input, shape index: {}]   ;;  %s6110_s3 = inlined_call_operand.vmem [shape: f32[40,64], index: 3, kind: input, shape index: {}]   ;;  %s6111_s4 = inlined_call_operand.hbm [shape: f32[16,16], index: 4, kind: output, shape index: {}]  }
   0x1   :  { %v18_v0 = vld [vmem:[%s6107_s0] sm:$0xff]  ;;  %4863 = vset.pattern.permute.xlu0 %v5044_v2  ;;  %v44_v3 = vld [vmem:[%s6109_s2 + $0x8] sm:$0xff] }
   0x2   :  { %v43_v1 = vld [vmem:[%s6109_s2] sm:$0xff] }
   0x3   :  { %9 = vsyncpa [#allocation3], 0  ;;  %28 = vperm.xlu0 %4863, %v18_v0   ;;  %v4630_v4 = vpack.c.bf16 %v44_v3, %v43_v1  ;;  %v19_v5 = vld [vmem:[%s6107_s0 + $0x8] sm:$0xff]  ;;  %v45_v6 = vld [vmem:[%s6109_s2 + $0x10] sm:$0xff]  ;;  %vm215_vm0 = vcmask 261120   ;;  %v20_v30 = vlaneseq  ;;  %vm46_vm3 = vcmask 195584  }
   0x4   :  { %v206_v7 = vld [vmem:[%s6109_s2 + $0x258] sm:$0xff]  ;;  %v207_v8 = vld [vmem:[%s6109_s2 + $0x260] sm:$0xff]  ;;  %v208_v12 = vld [vmem:[%s6109_s2 + $0x268] sm:$0xff]  ;;  %v5045_v39 = vmov 0.0   ;;  %s5046_s30 = smov [#allocation2]  }
   0x5   :  { %4631 = vmatprep.subr.bf16.mxu0 %v4630_v4  ;;  %v297_v9 = vld [vmem:[%s6109_s2 + $0x298] sm:$0xff]  ;;  %v4634_v10 = vpack.c.bf16 %v207_v8, %v206_v7  ;;  %v298_v11 = vld [vmem:[%s6109_s2 + $0x2a0] sm:$0xff]  ;;  %v209_v13 = vld [vmem:[%s6109_s2 + $0x270] sm:$0xff]  ;;  %v5149_v31 = vshrl.u32 %v20_v30, 7  ;;  %v5155_v34 = vand.u32 127, %v20_v30  ;;  %s3865_s0 = sshll.u32 %s5046_s30, 4  ;;  %s3866_s0 = int_to_ptr.vmem [resolvable:$true] %s3865_s0 }
   0x6   :  { %4633 = vmatpush3.bf16.msra.mxu0 %v4630_v4  ;;  %v4642_v14 = vpack.c.bf16 %v298_v11, %v297_v9  ;;  %v4638_v15 = vpack.c.bf16 %v209_v13, %v208_v12  ;;  %v5110_v16 = vld [vmem:[%s6108_s1] sm:$0xff]  ;;  %v381_v17 = vld [vmem:[%s6109_s2 + $0x278] sm:$0xff]  ;;  %v5123_v20 = vld [vmem:[%s6108_s1 + $0x8] sm:$0xff]  ;;  %s5020_s5 = scalar_lea.vmem %s3866_s0, 256  ;;  %p5025_p1 = scmp.lt.s32.totalorder %s3866_s0, %s3866_s0 }
   0x7   :  { %31 = vperm.xlu0 %4863, %v19_v5   ;;  %4250 = vmatprep.subr.mxu0 %v45_v6  ;;  %v382_v18 = vld [vmem:[%s6109_s2 + $0x280] sm:$0xff]  ;;  %v383_v21 = vld [vmem:[%s6109_s2 + $0x288] sm:$0xff]  ;;  %v384_v22 = vld [vmem:[%s6109_s2 + $0x290] sm:$0xff]  ;;  %v25_v32 = vand.u32 7, %v5149_v31  ;;  %v5153_v33 = vadd.s32 8, %v5149_v31  ;;  %p5021_p0 = scmp.ne.s32.totalorder %s3866_s0, %s5020_s5  ;;  %p5026_p2 = scmp.lt.s32.totalorder %s5020_s5, %s5020_s5 }
   0x8   :  { %4635 = vmatprep.subr.bf16.mxu1 %v4634_v10  ;;  %4263 = vmatprep.mubr.msk.f32.mxu1 %vm215_vm0, %v5110_v16  ;;  %v4650_v19 = vpack.c.bf16 %v382_v18, %v381_v17  ;;  %v4654_v23 = vpack.c.bf16 %v384_v22, %v383_v21  ;;  %v549_v24 = vld [vmem:[%s6109_s2 + $0x18] sm:$0xff]  ;;  %v550_v25 = vld [vmem:[%s6109_s2 + $0x20] sm:$0xff]  ;;  %v551_v27 = vld [vmem:[%s6109_s2 + $0x28] sm:$0xff] }
   0x9   :  { %4637 = vmatpush3.bf16.msra.mxu1 %v4634_v10  ;;  %v4666_v26 = vpack.c.bf16 %v550_v25, %v549_v24  ;;  %v552_v28 = vld [vmem:[%s6109_s2 + $0x30] sm:$0xff]  ;;  %v35_v35 = vadd.s32 16, %v25_v32  ;;  %v26_v36 = vand.u32 7, %v5153_v33  ;;  %v299_v41 = vld [vmem:[%s6109_s2 + $0x2a8] sm:$0xff]  ;;  %v465_v46 = vld [vmem:[%s6109_s2 + $0x2b8] sm:$0xff]  ;;  %p5027_p3 = por %p5026_p2, %p5025_p1 }
   0xa   :  { %4251 = vmatpush3.msra.mxu0 %v45_v6  ;;  %4639 = vmatprep.subr.bf16.mxu1 %v4638_v15  ;;  %v4670_v29 = vpack.c.bf16 %v552_v28, %v551_v27  ;;  %v300_v42 = vld [vmem:[%s6109_s2 + $0x2b0] sm:$0xff]  ;;  %v466_v47 = vld [vmem:[%s6109_s2 + $0x2c0] sm:$0xff]  ;;  %v467_v49 = vld [vmem:[%s6109_s2 + $0x2c8] sm:$0xff] }
   0xb   :  { %4643 = vmatprep.subr.bf16.mxu0 %v4642_v14  ;;  %vm37_vm1 = vcmp.eq.s32.totalorder %v5155_v34, %v35_v35  ;;  %v36_v37 = vadd.s32 16, %v26_v36  ;;  %v4646_v44 = vpack.c.bf16 %v300_v42, %v299_v41  ;;  %v4658_v48 = vpack.c.bf16 %v466_v47, %v465_v46  ;;  %v468_v50 = vld [vmem:[%s6109_s2 + $0x2d0] sm:$0xff]  ;;  %v639_v52 = vld [vmem:[%s6109_s2 + $0x38] sm:$0xff]  ;;  %v640_v53 = vld [vmem:[%s6109_s2 + $0x40] sm:$0xff]  ;;  %p5028_p4 = pnand %p5027_p3, %p5021_p0 }
   0xc   :  { %v4662_v51 = vpack.c.bf16 %v468_v50, %v467_v49  ;;  %v4674_v54 = vpack.c.bf16 %v640_v53, %v639_v52  ;;  %v641_v55 = vld [vmem:[%s6109_s2 + $0x48] sm:$0xff]  ;;  %v642_v56 = vld [vmem:[%s6109_s2 + $0x50] sm:$0xff]  ;;  %v723_v58 = vld [vmem:[%s6109_s2 + $0x58] sm:$0xff] }
   0xd   :  { %4641 = vmatpush3.bf16.msra.mxu1 %v4638_v15  ;;  %vm38_vm5 = vcmp.eq.s32.totalorder %v5155_v34, %v36_v37  ;;  %v4678_v57 = vpack.c.bf16 %v642_v56, %v641_v55  ;;  %v724_v59 = vld [vmem:[%s6109_s2 + $0x60] sm:$0xff]  ;;  %v3878_v62 = vld [vmem:[%s6110_s3 + $0x1c] ss:$0 sm:$0xff]  ;;  %v3884_v4 = vld [vmem:[%s6110_s3 + $0x1d] ss:$0 sm:$0xff] }
   0xe   :  { %4651 = vmatprep.subr.bf16.mxu1 %v4650_v19  ;;  %v4682_v60 = vpack.c.bf16 %v724_v59, %v723_v58  ;;  %v725_v9 = vld [vmem:[%s6109_s2 + $0x68] sm:$0xff]  ;;  %v726_v10 = vld [vmem:[%s6109_s2 + $0x70] sm:$0xff]  ;;  %v3893_v27 = vld [vmem:[%s6110_s3 + $0x1] ss:$0 sm:$0xff] }
   0xf   :  { %v4686_v13 = vpack.c.bf16 %v726_v10, %v725_v9  ;;  %v3890_v28 = vld [vmem:[%s6110_s3] ss:$0 sm:$0xff]  ;;  %v1315_v37 = vld [vmem:[%s6109_s2 + $0x98] sm:$0xff]  ;;  %vm5268_vm9 = vmpackc.low %vm215_vm0, %vm215_vm0 }
  0x10   :  { %4264 = vmatmul.mubr.msk.f32.vlgmr.msra.gmra.mrb[0].mxu1 %vm215_vm0, %v5123_v20  ;;  %v3896_v46 = vld [vmem:[%s6110_s3 + $0x2] ss:$0 sm:$0xff]  ;;  %v1317_v52 = vld [vmem:[%s6109_s2 + $0xa8] sm:$0xff]  ;;  %v1318_v53 = vld [vmem:[%s6109_s2 + $0xb0] sm:$0xff] }
  0x11   :  { %4653 = vmatpush3.bf16.msra.mxu1 %v4650_v19  ;;  %4285 = vmatprep.mubr.msk.f32.mxu1 %vm215_vm0, %v5110_v16  ;;  %v4712_v56 = vpack.c.bf16 %v1318_v53, %v1317_v52 }
  0x12   :  { %4655 = vmatprep.subr.bf16.mxu1 %v4654_v23 }
  0x15   :  { %4657 = vmatpush3.bf16.msra.mxu1 %v4654_v23 }
  0x16   :  { %4667 = vmatprep.subr.bf16.mxu1 %v4666_v26 }
  0x18   :  { %4286 = vmatmul.mubr.msk.f32.vlgmr.msra.gmra.mrb[2].mxu1 %vm215_vm0, %v5123_v20 }
  0x19   :  { %4669 = vmatpush3.bf16.msra.mxu1 %v4666_v26  ;;  %v5251_v26 = vshra.s32 %v5155_v34, 3 }
  0x1a   :  { %4671 = vmatprep.subr.bf16.mxu1 %v4670_v29 }
  0x1b   :  { %vm129_vm8 = vcmp.eq.s32.totalorder %v5251_v26, 0  ;;  %vm130_vm10 = vcmp.eq.s32.totalorder %v5251_v26, 1  ;;  %vm131_vm11 = vcmp.eq.s32.totalorder %v5251_v26, 2  ;;  %vm132_vm12 = vcmp.eq.s32.totalorder %v5251_v26, 3 }
  0x1d   :  { %4673 = vmatpush3.bf16.msra.mxu1 %v4670_v29 }
  0x1e   :  { %4683 = vmatprep.subr.bf16.mxu1 %v4682_v60 }
  0x82   :  { %v29_v38 = vpop.permute.xlu0 %28 }
  0x83   :  { %vm33_vm2 = vcmp.eq.s32.totalorder %v5155_v34, %v29_v38  ;;  %v1316_v38 = vld [vmem:[%s6109_s2 + $0xa0] sm:$0xff] }
  0x84   :  { %vm39_vm4 = vmor %vm33_vm2, %vm37_vm1 }
  0x85   :  { %v41_v40 = vsel %vm39_vm4, 1.0, %v5045_v39 }
  0x86   :  { %4252 = vmatprep.mubr.msk.f32.mxu0 %vm46_vm3, %v41_v40  ;;  %v32_v43 = vpop.permute.xlu0 %31 }
  0x87   :  { %vm34_vm6 = vcmp.eq.s32.totalorder %v5155_v34, %v32_v43 }
  0x88   :  { %vm40_vm7 = vmor %vm34_vm6, %vm38_vm5 }
  0x89   :  { %v42_v45 = vsel %vm40_vm7, 1.0, %v5045_v39 }
  0x8a   :  { %4253 = vmatmul.mubr.msk.f32.vlgmr.msra.gmra.mrb[0].mxu0 %vm46_vm3, %v42_v45  ;;  %v4708_v45 = vpack.c.bf16 %v1316_v38, %v1315_v37 }
  0x8b   :  { %4645 = vmatpush3.bf16.msra.mxu0 %v4642_v14  ;;  %4274 = vmatprep.mubr.msk.f32.mxu0 %vm215_vm0, %v5110_v16  ;;  %v3881_v14 = vld [vmem:[%s6110_s3 + $0x1e] ss:$0 sm:$0xff] }
  0x8c   :  { %4647 = vmatprep.subr.bf16.mxu0 %v4646_v44 }
  0x8f   :  { %4649 = vmatpush3.bf16.msra.mxu0 %v4646_v44 }
  0x90   :  { %4659 = vmatprep.subr.bf16.mxu0 %v4658_v48 }
  0x92   :  { %4275 = vmatmul.mubr.msk.f32.vlgmr.msra.gmra.mrb[2].mxu0 %vm215_vm0, %v5123_v20 }
  0x93   :  { %4661 = vmatpush3.bf16.msra.mxu0 %v4658_v48  ;;  %4296 = vmatprep.mubr.msk.f32.mxu0 %vm215_vm0, %v5110_v16 }
  0x94   :  { %4663 = vmatprep.subr.bf16.mxu0 %v4662_v51 }
  0x97   :  { %4665 = vmatpush3.bf16.msra.mxu0 %v4662_v51 }
  0x98   :  { %4675 = vmatprep.subr.bf16.mxu0 %v4674_v54 }
  0x9a   :  { %4297 = vmatmul.mubr.msk.f32.vlgmr.msra.gmra.mrb[4].mxu0 %vm215_vm0, %v5123_v20  ;;  %v3887_v20 = vld [vmem:[%s6110_s3 + $0x1f] ss:$0 sm:$0xff] }
  0x9b   :  { %4677 = vmatpush3.bf16.msra.mxu0 %v4674_v54 }
  0x9c   :  { %4679 = vmatprep.subr.bf16.mxu0 %v4678_v57 }
  0x9f   :  { %4681 = vmatpush3.bf16.msra.mxu0 %v4678_v57 }
  0xe3   :  { %v4265_v61 = vpop.f32.mrb[0].mxu1 }
  0xe4   :  { %v294_v63 = vadd.f32 %v4265_v61, %v3878_v62  ;;  %v288_v0 = vpop.f32.mrb[1].mxu1 }
  0xe5   :  { %v289_v1 = vadd.f32 %v3878_v62, %v288_v0 }
  0xe7   :  { %v5211_v2 = vpack.c.bf16 %v294_v63, %v289_v1  ;;  %v140_v63 = vand.u32 15, %v5153_v33  ;;  %v134_v1 = vadd.s32 24, %v5149_v31 }
  0xe9   :  { %v5314_v0 = vshra.s32 %v140_v63, 3 }
  0xeb   :  { %v4287_v3 = vpop.f32.mrb[2].mxu1  ;;  %vm156_vm13 = vcmp.ne.s32.totalorder %v5314_v0, %v5251_v26 }
  0xec   :  { %v462_v5 = vadd.f32 %v4287_v3, %v3884_v4  ;;  %v456_v6 = vpop.f32.mrb[3].mxu1  ;;  %v133_v3 = vadd.s32 16, %v5149_v31 }
  0xed   :  { %v457_v7 = vadd.f32 %v3884_v4, %v456_v6  ;;  %v5319_v4 = vand.u32 7, %v5155_v34  ;;  %v139_v6 = vand.u32 15, %v5149_v31 }
  0xee   :  { %v141_v9 = vand.u32 15, %v133_v3 }
  0xef   :  { %v5216_v8 = vpack.c.bf16 %v462_v5, %v457_v7  ;;  %v165_v5 = vand.u32 7, %v140_v63  ;;  %v142_v7 = vand.u32 15, %v134_v1  ;;  %v5325_v33 = vshra.s32 %v139_v6, 3 }
  0xf0   :  { %v164_v10 = vand.u32 7, %v139_v6 }
  0xf1   :  { %vm173_vm14 = vcmp.gt.s32.totalorder %v5319_v4, %v165_v5  ;;  %v5331_v34 = vshra.s32 %v142_v7, 3  ;;  %vm6112_vm1 = vcmp.ne.s32.totalorder %v5325_v33, %v5251_v26 }
  0xf2   :  { %vm181_vm15 = vmor %vm156_vm13, %vm173_vm14  ;;  %vm172_vm2 = vcmp.gt.s32.totalorder %v5319_v4, %v164_v10  ;;  %vm950_vm14 = vcmask 130048  }
  0xf3   :  { %vm180_vm3 = vmor %vm6112_vm1, %vm172_vm2  ;;  %vm158_vm4 = vcmp.ne.s32.totalorder %v5331_v34, %v5251_v26 }
 0x15d   :  { %v5224_v11 = vpop.f32.mrb[0].mxu0 }
 0x15e   :  { %v5226_v12 = vpop.f32.mrb[1].mxu0 }
 0x15f   :  { %4307 = vmatprep.mubr.msk.f32.mxu1 %vm215_vm0, %v5226_v12  ;;  %4318 = vmatprep.mubr.msk.f32.mxu0 %vm215_vm0, %v5226_v12 }
 0x160   :  { %4308 = vmatmul.mubr.msk.f32.vlgmr.msra.gmra.mrb[4].mxu1 %vm215_vm0, %v5224_v11  ;;  %4319 = vmatmul.mubr.msk.f32.vlgmr.msra.gmra.mrb[6].mxu0 %vm215_vm0, %v5224_v11 }
 0x161   :  { %4685 = vmatpush3.bf16.msra.mxu1 %v4682_v60  ;;  %4329 = vmatprep.mubr.msk.f32.mxu1 %vm215_vm0, %v5226_v12 }
 0x162   :  { %4687 = vmatprep.subr.bf16.mxu1 %v4686_v13 }
 0x165   :  { %4689 = vmatpush3.bf16.msra.mxu1 %v4686_v13  ;;  %v4276_v15 = vpop.f32.mrb[2].mxu0  ;;  %v136_v13 = vadd.s32 40, %v5149_v31 }
 0x166   :  { %v378_v16 = vadd.f32 %v4276_v15, %v3881_v14  ;;  %v372_v17 = vpop.f32.mrb[3].mxu0  ;;  %v166_v15 = vand.u32 7, %v141_v9 }
 0x167   :  { %v373_v18 = vadd.f32 %v3881_v14, %v372_v17  ;;  %v5333_v14 = vshra.s32 %v141_v9, 3  ;;  %v167_v17 = vand.u32 7, %v142_v7 }
 0x168   :  { %4330 = vmatmul.mubr.msk.f32.vlgmr.msra.gmra.mrb[6].mxu1 %vm215_vm0, %v5224_v11  ;;  %vm174_vm6 = vcmp.gt.s32.totalorder %v5319_v4, %v166_v15 }
 0x169   :  { %v5243_v19 = vpack.c.bf16 %v378_v16, %v373_v18  ;;  %v135_v16 = vadd.s32 32, %v5149_v31  ;;  %v144_v18 = vand.u32 15, %v136_v13  ;;  %vm6113_vm5 = vcmp.ne.s32.totalorder %v5333_v14, %v5251_v26 }
 0x16a   :  { %vm175_vm7 = vcmp.gt.s32.totalorder %v5319_v4, %v167_v17 }
 0x16b   :  { %vm183_vm2 = vmor %vm158_vm4, %vm175_vm7 }
 0x16d   :  { %v4298_v21 = vpop.f32.mrb[4].mxu0 }
 0x16e   :  { %v546_v22 = vadd.f32 %v4298_v21, %v3887_v20  ;;  %v540_v23 = vpop.f32.mrb[5].mxu0  ;;  %v143_v21 = vand.u32 15, %v135_v16 }
 0x16f   :  { %v541_v24 = vadd.f32 %v3887_v20, %v540_v23  ;;  %v5340_v20 = vsel %vm181_vm15, -1e+09, %v5045_v39  ;;  %v169_v23 = vand.u32 7, %v144_v18  ;;  %vm182_vm15 = vmor %vm6113_vm5, %vm174_vm6 }
 0x171   :  { %v5248_v25 = vpack.c.bf16 %v546_v22, %v541_v24  ;;  %v5351_v22 = vshra.s32 %v144_v18, 3  ;;  %v137_v24 = vadd.s32 48, %v5149_v31  ;;  %vm177_vm1 = vcmp.gt.s32.totalorder %v5319_v4, %v169_v23 }
 0x173   :  { %v145_v37 = vand.u32 15, %v137_v24 }
 0x233   :  { %v4309_v29 = vpop.f32.mrb[4].mxu1  ;;  %v4320_v30 = vpop.f32.mrb[6].mxu0 }
 0x234   :  { %v720_v32 = vadd.f32 %v4320_v30, %v3893_v27  ;;  %v630_v35 = vpop.f32.mrb[5].mxu1  ;;  %v714_v36 = vpop.f32.mrb[7].mxu0  ;;  %v636_v48 = vadd.f32 %v4309_v29, %v3890_v28 }
 0x235   :  { %v631_v40 = vadd.f32 %v3890_v28, %v630_v35  ;;  %v715_v41 = vadd.f32 %v3893_v27, %v714_v36  ;;  %v5355_v28 = vsel %vm180_vm3, -1e+09, %v5045_v39  ;;  %v138_v35 = vadd.s32 56, %v5149_v31 }
 0x236   :  { %v808_v55 = vsel %vm129_vm8, %v636_v48, 0.0  ;;  %v810_v58 = vsel %vm130_vm10, %v636_v48, 0.0  ;;  %v812_v60 = vsel %vm131_vm11, %v636_v48, 0.0  ;;  %v814_v62 = vsel %vm132_vm12, %v636_v48, 0.0 }
 0x237   :  { %v4690_v43 = vpack.c.bf16 %v720_v32, %v715_v41  ;;  %v807_v44 = vsel %vm129_vm8, %v631_v40, 0.0  ;;  %v809_v57 = vsel %vm130_vm10, %v631_v40, 0.0  ;;  %v811_v59 = vsel %vm131_vm11, %v631_v40, 0.0 }
 0x238   :  { %4336 = vmatprep.mubr.msk.f32.mxu0 %vm215_vm0, %v807_v44  ;;  %v813_v61 = vsel %vm132_vm12, %v631_v40, 0.0  ;;  %v5364_v32 = vshra.s32 %v143_v21, 3  ;;  %vm160_vm3 = vcmp.ne.s32.totalorder %v5351_v22, %v5251_v26  ;;  %v168_v36 = vand.u32 7, %v143_v21 }
 0x239   :  { %4692 = vmatprep.subr.msk.bf16.mxu0 %vm5268_vm9, %v4690_v43  ;;  %v5373_v41 = vsel %vm182_vm15, -1e+09, %v5045_v39  ;;  %vm185_vm6 = vmor %vm160_vm3, %vm177_vm1  ;;  %v170_v48 = vand.u32 7, %v145_v37 }
 0x23a   :  { %4695 = vmatpush3.bf16.xpose.msk.msra.mxu0 %vm5268_vm9, %v4690_v43  ;;  %v5376_v43 = vsel %vm183_vm2, -1e+09, %v5045_v39  ;;  %vm6114_vm7 = vcmp.ne.s32.totalorder %v5364_v32, %v5251_v26  ;;  %vm176_vm5 = vcmp.gt.s32.totalorder %v5319_v4, %v168_v36 }
 0x23b   :  { %v4331_v47 = vpop.f32.mrb[6].mxu1  ;;  %4709 = vmatprep.subr.bf16.mxu0 %v4708_v45  ;;  %vm184_vm1 = vmor %vm6114_vm7, %vm176_vm5  ;;  %vm178_vm2 = vcmp.gt.s32.totalorder %v5319_v4, %v170_v48 }
 0x23c   :  { %v804_v49 = vadd.f32 %v4331_v47, %v3896_v46  ;;  %v798_v50 = vpop.f32.mrb[7].mxu1  ;;  %v5385_v47 = vshra.s32 %v145_v37, 3 }
 0x23d   :  { %v799_v51 = vadd.f32 %v3896_v46, %v798_v50 }
 0x23e   :  { %vm161_vm15 = vcmp.ne.s32.totalorder %v5385_v47, %v5251_v26 }
 0x23f   :  { %v4696_v54 = vpack.c.bf16 %v804_v49, %v799_v51  ;;  %v5390_v51 = vsel %vm185_vm6, -1e+09, %v5045_v39  ;;  %vm186_vm5 = vmor %vm161_vm15, %vm178_vm2 }
 0x240   :  { %v5415_v1 = vsel %vm186_vm5, -1e+09, %v5045_v39 }
 0x241   :  { %4697 = vmatprep.subr.bf16.mxu1 %v4696_v54  ;;  %4337 = vmatmul.mubr.msk.f32.vlgmr.msra.gmra.mrb[8].mxu0 %vm215_vm0, %v808_v55 }
 0x242   :  { %4699 = vmatpush3.bf16.msra.mxu1 %v4696_v54  ;;  %4339 = vmatprep.mubr.msk.f32.mxu0 %vm215_vm0, %v809_v57 }
 0x243   :  { %4711 = vmatpush3.bf16.msra.mxu0 %v4708_v45  ;;  %v146_v45 = vand.u32 15, %v138_v35 }
 0x244   :  { %4713 = vmatprep.subr.bf16.mxu0 %v4712_v56 }
 0x245   :  { %4340 = vmatmul.mubr.msk.f32.gmra.mrb[10].mxu0 %vm215_vm0, %v810_v58  ;;  %v5396_v55 = vshra.s32 %v146_v45, 3 }
 0x246   :  { %4342 = vmatprep.mubr.msk.f32.mxu0 %vm215_vm0, %v811_v59  ;;  %v5404_v59 = vsel %vm184_vm1, -1e+09, %v5045_v39 }
 0x247   :  { %4715 = vmatpush3.bf16.msra.mxu0 %v4712_v56  ;;  %v171_v56 = vand.u32 7, %v146_v45  ;;  %vm162_vm6 = vcmp.ne.s32.totalorder %v5396_v55, %v5251_v26 }
 0x248   :  { %4723 = vmatprep.subr.bf16.mxu0 %v5216_v8 }
 0x249   :  { %4343 = vmatmul.mubr.msk.f32.gmra.mrb[12].mxu0 %vm215_vm0, %v812_v60  ;;  %vm179_vm7 = vcmp.gt.s32.totalorder %v5319_v4, %v171_v56 }
 0x24a   :  { %4345 = vmatprep.mubr.msk.f32.mxu0 %vm215_vm0, %v813_v61  ;;  %vm187_vm1 = vmor %vm162_vm6, %vm179_vm7  ;;  %vm6117_vm7 = vcmp.ne.s32.totalorder %v5325_v33, %v5251_v26 }
 0x24b   :  { %v5423_v6 = vsel %vm187_vm1, -1e+09, %v5045_v39 }
 0x24d   :  { %4346 = vmatmul.mubr.msk.f32.gmra.mrb[14].mxu0 %vm215_vm0, %v814_v62 }
 0x314   :  { %v4338_v27 = vpop.f32.mrb[8].mxu0 }
 0x315   :  { %v917_v29 = vadd.f32 %v4338_v27, %v5340_v20  ;;  %v911_v30 = vpop.f32.mrb[9].mxu0 }
 0x316   :  { %v912_v38 = vadd.f32 %v911_v30, %v5355_v28 }
 0x317   :  { %v954_v40 = vsel %vm950_vm14, %v917_v29, -inf }
 0x318   :  { %955 = vmax.xlane.f32.xlu1 %v954_v40  ;;  %v4341_v44 = vpop.f32.mrb[10].mxu0  ;;  %v951_v50 = vsel %vm950_vm14, %v912_v38, -inf }
 0x319   :  { %v921_v31 = vpop.f32.mrb[11].mxu0  ;;  %v927_v49 = vadd.f32 %v4341_v44, %v5376_v43 }
 0x31a   :  { %v922_v46 = vadd.f32 %v921_v31, %v5373_v41 }
 0x31b   :  { %v960_v58 = vsel %vm950_vm14, %v927_v49, -inf }
 0x31c   :  { %v4344_v52 = vpop.f32.mrb[12].mxu0  ;;  %952 = vmax.xlane.f32.xlu1 %v951_v50  ;;  %v957_v53 = vsel %vm950_vm14, %v922_v46, -inf }
 0x31d   :  { %v931_v54 = vpop.f32.mrb[13].mxu0  ;;  %958 = vmax.xlane.f32.xlu0 %v957_v53  ;;  %v937_v57 = vadd.f32 %v4344_v52, %v5390_v51 }
 0x31e   :  { %v932_v62 = vadd.f32 %v931_v54, %v5404_v59 }
 0x31f   :  { %v966_v63 = vsel %vm950_vm14, %v937_v57, -inf }
 0x320   :  { %v4347_v60 = vpop.f32.mrb[14].mxu0  ;;  %961 = vmax.xlane.f32.xlu1 %v960_v58  ;;  %v963_v5 = vsel %vm950_vm14, %v932_v62, -inf }
 0x321   :  { %v941_v61 = vpop.f32.mrb[15].mxu0  ;;  %v947_v4 = vadd.f32 %v4347_v60, %v5423_v6 }
 0x322   :  { %v942_v3 = vadd.f32 %v941_v61, %v5415_v1 }
 0x323   :  { %v972_v9 = vsel %vm950_vm14, %v947_v4, -inf }
 0x324   :  { %967 = vmax.xlane.f32.xlu1 %v966_v63  ;;  %v969_v7 = vsel %vm950_vm14, %v942_v3, -inf }
 0x328   :  { %964 = vmax.xlane.f32.xlu1 %v963_v5 }
 0x32c   :  { %970 = vmax.xlane.f32.xlu1 %v969_v7 }
 0x330   :  { %973 = vmax.xlane.f32.xlu1 %v972_v9 }
 0x3a5   :  { %v956_v10 = vpop.xlane.xlu1 %955 }
 0x3a6   :  { %v976_v13 = vsub.f32 %v917_v29, %v956_v10 }
 0x3a8   :  { %v985_v15 = vmul.f32 1.442695, %v976_v13 }
 0x3a9   :  { %v953_v16 = vpop.xlane.xlu1 %952 }
 0x3aa   :  { %4864 = vpow2.f32 %v985_v15  ;;  %v975_v17 = vsub.f32 %v912_v38, %v953_v16  ;;  %v959_v18 = vpop.xlane.xlu0 %958  ;;  %v1183_v15 = vld [vmem:[%s6109_s2 + $0x80] sm:$0xff] }
 0x3ab   :  { %v977_v21 = vsub.f32 %v922_v46, %v959_v18 }
 0x3ac   :  { %v983_v23 = vmul.f32 1.442695, %v975_v17 }
 0x3ad   :  { %v987_v24 = vmul.f32 1.442695, %v977_v21  ;;  %v962_v27 = vpop.xlane.xlu1 %961 }
 0x3ae   :  { %4866 = vpow2.f32 %v983_v23  ;;  %v978_v30 = vsub.f32 %v927_v49, %v962_v27 }
 0x3af   :  { %4868 = vpow2.f32 %v987_v24 }
 0x3b0   :  { %v989_v35 = vmul.f32 1.442695, %v978_v30  ;;  %v1184_v30 = vld [vmem:[%s6109_s2 + $0x88] sm:$0xff] }
 0x3b1   :  { %v968_v36 = vpop.xlane.xlu1 %967 }
 0x3b2   :  { %4870 = vpow2.f32 %v989_v35  ;;  %v980_v37 = vsub.f32 %v937_v57, %v968_v36  ;;  %v1185_v35 = vld [vmem:[%s6109_s2 + $0x90] sm:$0xff] }
 0x3b4   :  { %v4865_v40 = vpop.eup %4864  ;;  %v993_v44 = vmul.f32 1.442695, %v980_v37 }
 0x3b5   :  { %v965_v31 = vpop.xlane.xlu1 %964  ;;  %v1002_v29 = vsel %vm950_vm14, %v4865_v40, 0.0 }
 0x3b6   :  { %4872 = vpow2.f32 %v993_v44  ;;  %v979_v45 = vsub.f32 %v932_v62, %v965_v31  ;;  %1003 = vadd.xlane.f32.xlu1 %v1002_v29  ;;  %v4704_v29 = vpack.c.bf16 %v1185_v35, %v1184_v30 }
 0x3b8   :  { %v4867_v38 = vpop.eup %4866  ;;  %v991_v46 = vmul.f32 1.442695, %v979_v45 }
 0x3b9   :  { %v971_v48 = vpop.xlane.xlu1 %970  ;;  %v999_v50 = vsel %vm950_vm14, %v4867_v38, 0.0  ;;  %v4869_v52 = vpop.eup %4868 }
 0x3ba   :  { %4874 = vpow2.f32 %v991_v46  ;;  %v981_v49 = vsub.f32 %v942_v3, %v971_v48  ;;  %1000 = vadd.xlane.f32.xlu1 %v999_v50  ;;  %v1005_v57 = vsel %vm950_vm14, %v4869_v52, 0.0 }
 0x3bc   :  { %v4871_v53 = vpop.eup %4870  ;;  %v995_v54 = vmul.f32 1.442695, %v981_v49 }
 0x3bd   :  { %v974_v56 = vpop.xlane.xlu1 %973  ;;  %v1008_v58 = vsel %vm950_vm14, %v4871_v53, 0.0 }
 0x3be   :  { %4876 = vpow2.f32 %v995_v54  ;;  %v982_v60 = vsub.f32 %v947_v4, %v974_v56  ;;  %1006 = vadd.xlane.f32.xlu1 %v1005_v57  ;;  %1009 = vadd.xlane.f32.xlu0 %v1008_v58  ;;  %v1182_v4 = vld [vmem:[%s6109_s2 + $0x78] sm:$0xff] }
 0x3bf   :  { %v4700_v16 = vpack.c.bf16 %v1183_v15, %v1182_v4 }
 0x3c0   :  { %v4873_v61 = vpop.eup %4872  ;;  %v997_v62 = vmul.f32 1.442695, %v982_v60 }
 0x3c1   :  { %v1014_v63 = vsel %vm950_vm14, %v4873_v61, 0.0  ;;  %4701 = vmatprep.subr.bf16.mxu1 %v4700_v16 }
 0x3c2   :  { %4878 = vpow2.f32 %v997_v62  ;;  %1015 = vadd.xlane.f32.xlu0 %v1014_v63 }
 0x3c4   :  { %v4875_v5 = vpop.eup %4874 }
 0x3c5   :  { %v1011_v3 = vsel %vm950_vm14, %v4875_v5, 0.0 }
 0x3c6   :  { %1012 = vadd.xlane.f32.xlu1 %v1011_v3 }
 0x3c8   :  { %v4877_v7 = vpop.eup %4876 }
 0x3c9   :  { %v1017_v9 = vsel %vm950_vm14, %v4877_v7, 0.0 }
 0x3ca   :  { %1018 = vadd.xlane.f32.xlu1 %v1017_v9 }
 0x3cc   :  { %v4879_v10 = vpop.eup %4878 }
 0x3cd   :  { %v1020_v13 = vsel %vm950_vm14, %v4879_v10, 0.0 }
 0x3ce   :  { %1021 = vadd.xlane.f32.xlu0 %v1020_v13 }
 0x443   :  { %v1004_v17 = vpop.xlane.xlu1 %1003 }
 0x444   :  { %4880 = vrcp.f32 %v1004_v17 }
 0x447   :  { %v1001_v18 = vpop.xlane.xlu1 %1000 }
 0x448   :  { %4882 = vrcp.f32 %v1001_v18 }
 0x44b   :  { %v1010_v21 = vpop.xlane.xlu0 %1009  ;;  %v1007_v23 = vpop.xlane.xlu1 %1006 }
 0x44c   :  { %4884 = vrcp.f32 %v1010_v21 }
 0x44d   :  { %4886 = vrcp.f32 %v1007_v23 }
 0x44e   :  { %v4881_v27 = vpop.eup %4880 }
 0x44f   :  { %v1016_v24 = vpop.xlane.xlu0 %1015  ;;  %v1026_v31 = vmul.f32 %v4881_v27, %v4865_v40 }
 0x450   :  { %4888 = vrcp.f32 %v1016_v24 }
 0x452   :  { %v4883_v36 = vpop.eup %4882 }
 0x453   :  { %v1013_v37 = vpop.xlane.xlu1 %1012  ;;  %v1024_v44 = vmul.f32 %v4883_v36, %v4867_v38 }
 0x454   :  { %4890 = vrcp.f32 %v1013_v37 }
 0x455   :  { %4352 = vmatprep.mubr.msk.f32.mxu1 %vm950_vm14, %v1024_v44  ;;  %v3917_v44 = vld [vmem:[%s6110_s3 + $0x3] ss:$0 sm:$0xff] }
 0x456   :  { %v4885_v45 = vpop.eup %4884  ;;  %4353 = vmatmul.mubr.msk.f32.vlgmr.msra.gmra.mrb[8].mxu1 %vm950_vm14, %v1026_v31 }
 0x457   :  { %v4887_v46 = vpop.eup %4886  ;;  %4703 = vmatpush3.bf16.msra.mxu1 %v4700_v16  ;;  %v1019_v48 = vpop.xlane.xlu1 %1018  ;;  %v1030_v50 = vmul.f32 %v4885_v45, %v4871_v53 }
 0x458   :  { %4892 = vrcp.f32 %v1019_v48  ;;  %v1028_v49 = vmul.f32 %v4887_v46, %v4869_v52  ;;  %4705 = vmatprep.subr.bf16.mxu1 %v4704_v29 }
 0x45a   :  { %4355 = vmatprep.mubr.msk.f32.mxu1 %vm950_vm14, %v1028_v49  ;;  %v4889_v40 = vpop.eup %4888 }
 0x45b   :  { %4356 = vmatmul.mubr.msk.f32.gmra.mrb[10].mxu1 %vm950_vm14, %v1030_v50  ;;  %v1022_v38 = vpop.xlane.xlu0 %1021  ;;  %v1034_v57 = vmul.f32 %v4889_v40, %v4873_v61 }
 0x45c   :  { %4707 = vmatpush3.bf16.msra.mxu1 %v4704_v29  ;;  %4894 = vrcp.f32 %v1022_v38 }
 0x45d   :  { %4718 = vmatprep.subr.msk.bf16.mxu1 %vm5268_vm9, %v5211_v2 }
 0x45e   :  { %v4891_v54 = vpop.eup %4890 }
 0x45f   :  { %v1032_v56 = vmul.f32 %v4891_v54, %v4875_v5 }
 0x461   :  { %4358 = vmatprep.mubr.msk.f32.mxu1 %vm950_vm14, %v1032_v56 }
 0x462   :  { %v4893_v53 = vpop.eup %4892  ;;  %4359 = vmatmul.mubr.msk.f32.gmra.mrb[12].mxu1 %vm950_vm14, %v1034_v57 }
 0x463   :  { %v1036_v52 = vmul.f32 %v4893_v53, %v4877_v7 }
 0x465   :  { %4361 = vmatprep.mubr.msk.f32.mxu1 %vm950_vm14, %v1036_v52 }
 0x466   :  { %v4895_v58 = vpop.eup %4894 }
 0x467   :  { %v1038_v60 = vmul.f32 %v4895_v58, %v4879_v10 }
 0x469   :  { %4362 = vmatmul.mubr.msk.f32.gmra.mrb[14].mxu1 %vm950_vm14, %v1038_v60 }
 0x529   :  { %v4354_v62 = vpop.f32.mrb[8].mxu1 }
 0x52a   :  { %v1129_v63 = vpop.f32.mrb[9].mxu1  ;;  %v1169_v9 = vsel %vm129_vm8, %v4354_v62, 0.0 }
 0x52b   :  { %v1168_v13 = vsel %vm129_vm8, %v1129_v63, 0.0 }
 0x52e   :  { %v4357_v3 = vpop.f32.mrb[10].mxu1 }
 0x52f   :  { %v1171_v61 = vsel %vm130_vm10, %v4357_v3, 0.0  ;;  %v1139_v5 = vpop.f32.mrb[11].mxu1 }
 0x530   :  { %v1173_v7 = vadd.f32 %v1171_v61, %v1169_v9  ;;  %v1170_v4 = vsel %vm130_vm10, %v1139_v5, 0.0 }
 0x531   :  { %v1172_v10 = vadd.f32 %v1170_v4, %v1168_v13  ;;  %v3920_v13 = vld [vmem:[%s6110_s3 + $0x8] ss:$0 sm:$0xff] }
 0x535   :  { %v4360_v15 = vpop.f32.mrb[12].mxu1 }
 0x536   :  { %v1175_v16 = vsel %vm131_vm11, %v4360_v15, 0.0  ;;  %v1149_v17 = vpop.f32.mrb[13].mxu1  ;;  %v3921_v15 = vld [vmem:[%s6110_s3 + $0x9] ss:$0 sm:$0xff] }
 0x537   :  { %v1177_v18 = vadd.f32 %v1175_v16, %v1173_v7  ;;  %v1174_v21 = vsel %vm131_vm11, %v1149_v17, 0.0 }
 0x538   :  { %v1176_v23 = vadd.f32 %v1174_v21, %v1172_v10 }
 0x53c   :  { %v4363_v24 = vpop.f32.mrb[14].mxu1 }
 0x53d   :  { %v1179_v27 = vsel %vm132_vm12, %v4363_v24, 0.0  ;;  %v1159_v30 = vpop.f32.mrb[15].mxu1 }
 0x53e   :  { %v1181_v35 = vadd.f32 %v1179_v27, %v1177_v18  ;;  %v1178_v36 = vsel %vm132_vm12, %v1159_v30, 0.0 }
 0x53f   :  { %v1180_v37 = vadd.f32 %v1178_v36, %v1176_v23  ;;  %v3922_v23 = vld [vmem:[%s6110_s3 + $0x4] ss:$0 sm:$0xff] }
 0x541   :  { %4372 = vmatprep.mubr.msk.f32.mxu1 %vm215_vm0, %v1180_v37 }
 0x542   :  { %4373 = vmatmul.mubr.msk.f32.vlgmr.msra.gmra.mrb[16].mxu1 %vm215_vm0, %v1181_v35 }
 0x543   :  { %4721 = vmatpush3.bf16.xpose.msk.msra.mxu1 %vm5268_vm9, %v5211_v2 }
 0x615   :  { %v4374_v31 = vpop.f32.mrb[16].mxu1 }
 0x616   :  { %v1269_v29 = vadd.f32 %v4374_v31, %v3917_v44  ;;  %v1263_v45 = vpop.f32.mrb[17].mxu1 }
 0x617   :  { %v1264_v46 = vadd.f32 %v3917_v44, %v1263_v45 }
 0x618   :  { %v1273_v48 = vadd.f32 %v5224_v11, %v1269_v29 }
 0x619   :  { %v1272_v50 = vadd.f32 %v1264_v46, %v5226_v12 }
 0x61a   :  { %v1279_v49 = vsel %vm215_vm0, %v1273_v48, 0.0 }
 0x61b   :  { %1280 = vadd.xlane.f32.xlu0 %v1279_v49  ;;  %v1276_v38 = vsel %vm215_vm0, %v1272_v50, 0.0 }
 0x61c   :  { %1277 = vadd.xlane.f32.xlu1 %v1276_v38 }
 0x6a8   :  { %v1281_v40 = vpop.xlane.xlu0 %1280 }
 0x6a9   :  { %v1284_v2 = vmul.f32 0.03125, %v1281_v40  ;;  %v1278_v54 = vpop.xlane.xlu1 %1277 }
 0x6aa   :  { %v1283_v56 = vmul.f32 0.03125, %v1278_v54  ;;  %v5549_v54 = vsel %vm158_vm4, -1e+09, %v5045_v39  ;;  %vm6119_vm4 = vcmp.ne.s32.totalorder %v5364_v32, %v5251_v26 }
 0x6ab   :  { %v1286_v57 = vsub.f32 %v1273_v48, %v1284_v2  ;;  %v5535_v48 = vsel %vm156_vm13, -1e+09, %v5045_v39  ;;  %vm6118_vm13 = vcmp.ne.s32.totalorder %v5333_v14, %v5251_v26 }
 0x6ac   :  { %v1285_v53 = vsub.f32 %v1272_v50, %v1283_v56  ;;  %v5541_v50 = vsel %vm6117_vm7, -1e+09, %v5045_v39  ;;  %v5556_v33 = vsel %vm6118_vm13, -1e+09, %v5045_v39 }
 0x6ad   :  { %v1288_v52 = vmul.f32 %v1286_v57, %v1286_v57 }
 0x6ae   :  { %v1287_v58 = vmul.f32 %v1285_v53, %v1285_v53 }
 0x6af   :  { %v1292_v60 = vsel %vm215_vm0, %v1288_v52, 0.0 }
 0x6b0   :  { %1293 = vadd.xlane.f32.xlu0 %v1292_v60  ;;  %v1289_v11 = vsel %vm215_vm0, %v1287_v58, 0.0  ;;  %v5565_v58 = vsel %vm160_vm3, -1e+09, %v5045_v39  ;;  %v5572_v60 = vsel %vm6119_vm4, -1e+09, %v5045_v39  ;;  %vm2016_vm3 = vcmask 523264  }
 0x6b1   :  { %1290 = vadd.xlane.f32.xlu1 %v1289_v11 }
 0x73d   :  { %v1294_v12 = vpop.xlane.xlu0 %1293 }
 0x73e   :  { %v1296_v62 = vmul.f32 0.03125, %v1294_v12  ;;  %v1291_v63 = vpop.xlane.xlu1 %1290 }
 0x73f   :  { %v1295_v3 = vmul.f32 0.03125, %v1291_v63 }
 0x740   :  { %v1298_v9 = vadd.f32 1e-05, %v1296_v62 }
 0x741   :  { %v1297_v61 = vadd.f32 1e-05, %v1295_v3  ;;  %v5581_v3 = vsel %vm162_vm6, -1e+09, %v5045_v39 }
 0x742   :  { %4896 = vrsqrt.f32 %v1298_v9  ;;  %v5588_v9 = vsel %vm161_vm15, -1e+09, %v5045_v39 }
 0x743   :  { %4898 = vrsqrt.f32 %v1297_v61 }
 0x74c   :  { %v4897_v5 = vpop.eup %4896 }
 0x74d   :  { %v4899_v7 = vpop.eup %4898  ;;  %v1302_v4 = vmul.f32 %v4897_v5, %v1286_v57 }
 0x74e   :  { %v1301_v10 = vmul.f32 %v4899_v7, %v1285_v53 }
 0x74f   :  { %v1308_v16 = vmul.f32 %v3920_v13, %v1302_v4 }
 0x750   :  { %v1307_v17 = vmul.f32 %v3920_v13, %v1301_v10 }
 0x751   :  { %v5497_v21 = vadd.f32 %v3921_v15, %v1308_v16 }
 0x752   :  { %v5495_v18 = vadd.f32 %v3921_v15, %v1307_v17 }
 0x754   :  { %4383 = vmatprep.mubr.msk.f32.mxu0 %vm215_vm0, %v5495_v18 }
 0x755   :  { %4384 = vmatmul.mubr.msk.f32.vlgmr.msra.gmra.mrb[16].mxu0 %vm215_vm0, %v5497_v21 }
 0x756   :  { %4725 = vmatpush3.bf16.msra.mxu0 %v5216_v8 }
 0x828   :  { %v4385_v24 = vpop.f32.mrb[16].mxu0 }
 0x829   :  { %v1402_v27 = vadd.f32 %v4385_v24, %v3922_v23  ;;  %v1396_v30 = vpop.f32.mrb[17].mxu0 }
 0x82a   :  { %v1397_v35 = vadd.f32 %v3922_v23, %v1396_v30 }
 0x82b   :  { %v1406_v37 = vsel %vm129_vm8, %v1402_v27, 0.0  ;;  %v1408_v44 = vsel %vm130_vm10, %v1402_v27, 0.0  ;;  %v1410_v29 = vsel %vm131_vm11, %v1402_v27, 0.0  ;;  %v1412_v46 = vsel %vm132_vm12, %v1402_v27, 0.0 }
 0x82c   :  { %v1405_v36 = vsel %vm129_vm8, %v1397_v35, 0.0  ;;  %v1407_v8 = vsel %vm130_vm10, %v1397_v35, 0.0  ;;  %v1409_v31 = vsel %vm131_vm11, %v1397_v35, 0.0  ;;  %v1411_v45 = vsel %vm132_vm12, %v1397_v35, 0.0 }
 0x82d   :  { %4390 = vmatprep.mubr.msk.f32.mxu1 %vm215_vm0, %v1405_v36 }
 0x82e   :  { %4391 = vmatmul.mubr.msk.f32.vlgmr.msra.gmra.mrb[18].mxu1 %vm215_vm0, %v1406_v37 }
 0x82f   :  { %4393 = vmatprep.mubr.msk.f32.mxu1 %vm215_vm0, %v1407_v8 }
 0x832   :  { %4394 = vmatmul.mubr.msk.f32.gmra.mrb[20].mxu1 %vm215_vm0, %v1408_v44 }
 0x833   :  { %4396 = vmatprep.mubr.msk.f32.mxu1 %vm215_vm0, %v1409_v31 }
 0x836   :  { %4397 = vmatmul.mubr.msk.f32.gmra.mrb[22].mxu1 %vm215_vm0, %v1410_v29 }
 0x837   :  { %4399 = vmatprep.mubr.msk.f32.mxu1 %vm215_vm0, %v1411_v45 }
 0x83a   :  { %4400 = vmatmul.mubr.msk.f32.gmra.mrb[24].mxu1 %vm215_vm0, %v1412_v46 }
 0x901   :  { %v4392_v49 = vpop.f32.mrb[18].mxu1 }
 0x902   :  { %v1515_v38 = vadd.f32 %v4392_v49, %v5535_v48  ;;  %v1509_v40 = vpop.f32.mrb[19].mxu1 }
 0x903   :  { %v1510_v2 = vadd.f32 %v1509_v40, %v5541_v50 }
 0x904   :  { %v1551_v0 = vsel %vm950_vm14, %v1515_v38, -inf }
 0x905   :  { %1552 = vmax.xlane.f32.xlu0 %v1551_v0  ;;  %v4395_v56 = vpop.f32.mrb[20].mxu1  ;;  %v1548_v57 = vsel %vm950_vm14, %v1510_v2, -inf }
 0x906   :  { %v1525_v53 = vadd.f32 %v4395_v56, %v5549_v54  ;;  %v1519_v52 = vpop.f32.mrb[21].mxu1  ;;  %1549 = vmax.xlane.f32.xlu1 %v1548_v57 }
 0x907   :  { %v1520_v34 = vadd.f32 %v1519_v52, %v5556_v33 }
 0x908   :  { %v1557_v14 = vsel %vm950_vm14, %v1525_v53, -inf }
 0x909   :  { %1558 = vmax.xlane.f32.xlu0 %v1557_v14  ;;  %v4398_v11 = vpop.f32.mrb[22].mxu1  ;;  %v1554_v12 = vsel %vm950_vm14, %v1520_v34, -inf }
 0x90a   :  { %v1535_v62 = vadd.f32 %v4398_v11, %v5565_v58  ;;  %v1529_v63 = vpop.f32.mrb[23].mxu1  ;;  %1555 = vmax.xlane.f32.xlu1 %v1554_v12 }
 0x90b   :  { %v1530_v22 = vadd.f32 %v1529_v63, %v5572_v60 }
 0x90c   :  { %v1563_v32 = vsel %vm950_vm14, %v1535_v62, -inf }
 0x90d   :  { %1564 = vmax.xlane.f32.xlu0 %v1563_v32  ;;  %v4401_v61 = vpop.f32.mrb[24].mxu1  ;;  %v1560_v5 = vsel %vm950_vm14, %v1530_v22, -inf }
 0x90e   :  { %v1545_v13 = vadd.f32 %v4401_v61, %v5581_v3  ;;  %v1539_v7 = vpop.f32.mrb[25].mxu1  ;;  %1561 = vmax.xlane.f32.xlu1 %v1560_v5 }
 0x90f   :  { %v1540_v55 = vadd.f32 %v1539_v7, %v5588_v9 }
 0x910   :  { %v1569_v4 = vsel %vm950_vm14, %v1545_v13, -inf }
 0x911   :  { %1570 = vmax.xlane.f32.xlu0 %v1569_v4  ;;  %v1566_v10 = vsel %vm950_vm14, %v1540_v55, -inf }
 0x912   :  { %1567 = vmax.xlane.f32.xlu1 %v1566_v10 }
 0x992   :  { %v1553_v15 = vpop.xlane.xlu0 %1552 }
 0x993   :  { %v1573_v47 = vsub.f32 %v1515_v38, %v1553_v15  ;;  %v1550_v39 = vpop.xlane.xlu1 %1549 }
 0x994   :  { %v1572_v16 = vsub.f32 %v1510_v2, %v1550_v39 }
 0x995   :  { %v1582_v17 = vmul.f32 1.442695, %v1573_v47 }
 0x996   :  { %v1580_v23 = vmul.f32 1.442695, %v1572_v16  ;;  %v1559_v24 = vpop.xlane.xlu0 %1558 }
 0x997   :  { %4900 = vpow2.f32 %v1582_v17  ;;  %v1575_v27 = vsub.f32 %v1525_v53, %v1559_v24  ;;  %v1556_v30 = vpop.xlane.xlu1 %1555 }
 0x998   :  { %4902 = vpow2.f32 %v1580_v23  ;;  %v1574_v35 = vsub.f32 %v1520_v34, %v1556_v30 }
 0x999   :  { %v1586_v36 = vmul.f32 1.442695, %v1575_v27 }
 0x99a   :  { %v1584_v37 = vmul.f32 1.442695, %v1574_v35  ;;  %v1565_v8 = vpop.xlane.xlu0 %1564 }
 0x99b   :  { %4904 = vpow2.f32 %v1586_v36  ;;  %v1577_v44 = vsub.f32 %v1535_v62, %v1565_v8  ;;  %v1562_v31 = vpop.xlane.xlu1 %1561 }
 0x99c   :  { %4906 = vpow2.f32 %v1584_v37  ;;  %v1576_v29 = vsub.f32 %v1530_v22, %v1562_v31 }
 0x99d   :  { %v1590_v45 = vmul.f32 1.442695, %v1577_v44 }
 0x99e   :  { %v1588_v46 = vmul.f32 1.442695, %v1576_v29  ;;  %v1571_v49 = vpop.xlane.xlu0 %1570 }
 0x99f   :  { %4908 = vpow2.f32 %v1590_v45  ;;  %v1579_v38 = vsub.f32 %v1545_v13, %v1571_v49  ;;  %v1568_v40 = vpop.xlane.xlu1 %1567 }
 0x9a0   :  { %4910 = vpow2.f32 %v1588_v46  ;;  %v1578_v2 = vsub.f32 %v1540_v55, %v1568_v40 }
 0x9a1   :  { %v4901_v0 = vpop.eup %4900  ;;  %v1594_v56 = vmul.f32 1.442695, %v1579_v38 }
 0x9a2   :  { %v4903_v57 = vpop.eup %4902  ;;  %v1592_v53 = vmul.f32 1.442695, %v1578_v2  ;;  %v1599_v52 = vsel %vm950_vm14, %v4901_v0, 0.0 }
 0x9a3   :  { %4912 = vpow2.f32 %v1594_v56  ;;  %1600 = vadd.xlane.f32.xlu0 %v1599_v52  ;;  %v1596_v34 = vsel %vm950_vm14, %v4903_v57, 0.0  ;;  %v1780_v56 = vld [vmem:[%s6109_s2 + $0xc0] sm:$0xff]  ;;  %v1782_v52 = vld [vmem:[%s6109_s2 + $0xd0] sm:$0xff] }
 0x9a4   :  { %4914 = vpow2.f32 %v1592_v53  ;;  %1597 = vadd.xlane.f32.xlu1 %v1596_v34  ;;  %v1781_v53 = vld [vmem:[%s6109_s2 + $0xc8] sm:$0xff] }
 0x9a5   :  { %v4905_v14 = vpop.eup %4904  ;;  %v4730_v34 = vpack.c.bf16 %v1782_v52, %v1781_v53  ;;  %v1912_v52 = vld [vmem:[%s6109_s2 + $0xe0] sm:$0xff] }
 0x9a6   :  { %v4907_v11 = vpop.eup %4906  ;;  %v1605_v12 = vsel %vm950_vm14, %v4905_v14, 0.0 }
 0x9a7   :  { %1606 = vadd.xlane.f32.xlu0 %v1605_v12  ;;  %v1602_v62 = vsel %vm950_vm14, %v4907_v11, 0.0 }
 0x9a8   :  { %1603 = vadd.xlane.f32.xlu1 %v1602_v62 }
 0x9a9   :  { %v4909_v63 = vpop.eup %4908 }
 0x9aa   :  { %v4911_v22 = vpop.eup %4910  ;;  %v1611_v32 = vsel %vm950_vm14, %v4909_v63, 0.0 }
 0x9ab   :  { %1612 = vadd.xlane.f32.xlu0 %v1611_v32  ;;  %v1608_v61 = vsel %vm950_vm14, %v4911_v22, 0.0 }
 0x9ac   :  { %1609 = vadd.xlane.f32.xlu1 %v1608_v61 }
 0x9ad   :  { %v4913_v5 = vpop.eup %4912 }
 0x9ae   :  { %v4915_v13 = vpop.eup %4914  ;;  %v1617_v7 = vsel %vm950_vm14, %v4913_v5, 0.0 }
 0x9af   :  { %1618 = vadd.xlane.f32.xlu0 %v1617_v7  ;;  %v1614_v55 = vsel %vm950_vm14, %v4915_v13, 0.0 }
 0x9b0   :  { %1615 = vadd.xlane.f32.xlu1 %v1614_v55 }
 0xa30   :  { %v1601_v4 = vpop.xlane.xlu0 %1600 }
 0xa31   :  { %4916 = vrcp.f32 %v1601_v4  ;;  %v1598_v10 = vpop.xlane.xlu1 %1597 }
 0xa32   :  { %4918 = vrcp.f32 %v1598_v10 }
 0xa34   :  { %v1607_v15 = vpop.xlane.xlu0 %1606 }
 0xa35   :  { %4920 = vrcp.f32 %v1607_v15  ;;  %v1604_v47 = vpop.xlane.xlu1 %1603 }
 0xa36   :  { %4922 = vrcp.f32 %v1604_v47 }
 0xa38   :  { %v1613_v39 = vpop.xlane.xlu0 %1612 }
 0xa39   :  { %4924 = vrcp.f32 %v1613_v39  ;;  %v1610_v16 = vpop.xlane.xlu1 %1609 }
 0xa3a   :  { %4926 = vrcp.f32 %v1610_v16 }
 0xa3b   :  { %v4917_v17 = vpop.eup %4916 }
 0xa3c   :  { %v4919_v23 = vpop.eup %4918  ;;  %v1619_v24 = vpop.xlane.xlu0 %1618  ;;  %v1623_v35 = vmul.f32 %v4917_v17, %v4901_v0  ;;  %v1779_v0 = vld [vmem:[%s6109_s2 + $0xb8] sm:$0xff] }
 0xa3d   :  { %4928 = vrcp.f32 %v1619_v24  ;;  %v1616_v27 = vpop.xlane.xlu1 %1615  ;;  %v1621_v30 = vmul.f32 %v4919_v23, %v4903_v57  ;;  %v4726_v57 = vpack.c.bf16 %v1780_v56, %v1779_v0 }
 0xa3e   :  { %4930 = vrcp.f32 %v1616_v27 }
 0xa3f   :  { %v4921_v36 = vpop.eup %4920  ;;  %4406 = vmatprep.mubr.msk.f32.mxu0 %vm950_vm14, %v1621_v30  ;;  %4727 = vmatprep.subr.bf16.mxu0 %v4726_v57  ;;  %v3943_v30 = vld [vmem:[%s6110_s3 + $0x5] ss:$0 sm:$0xff] }
 0xa40   :  { %v4923_v37 = vpop.eup %4922  ;;  %4407 = vmatmul.mubr.msk.f32.vlgmr.msra.gmra.mrb[18].mxu0 %vm950_vm14, %v1623_v35  ;;  %v1627_v44 = vmul.f32 %v4921_v36, %v4905_v14 }
 0xa41   :  { %v1625_v8 = vmul.f32 %v4923_v37, %v4907_v11  ;;  %4729 = vmatpush3.bf16.msra.mxu0 %v4726_v57 }
 0xa42   :  { %4731 = vmatprep.subr.bf16.mxu0 %v4730_v34 }
 0xa43   :  { %v4925_v31 = vpop.eup %4924  ;;  %4409 = vmatprep.mubr.msk.f32.mxu0 %vm950_vm14, %v1625_v8 }
 0xa44   :  { %v4927_v29 = vpop.eup %4926  ;;  %4410 = vmatmul.mubr.msk.f32.gmra.mrb[20].mxu0 %vm950_vm14, %v1627_v44  ;;  %v1631_v46 = vmul.f32 %v4925_v31, %v4909_v63 }
 0xa45   :  { %v1629_v45 = vmul.f32 %v4927_v29, %v4911_v22  ;;  %4733 = vmatpush3.bf16.msra.mxu0 %v4730_v34 }
 0xa47   :  { %v4929_v49 = vpop.eup %4928  ;;  %4412 = vmatprep.mubr.msk.f32.mxu0 %vm950_vm14, %v1629_v45 }
 0xa48   :  { %v4931_v38 = vpop.eup %4930  ;;  %4413 = vmatmul.mubr.msk.f32.gmra.mrb[22].mxu0 %vm950_vm14, %v1631_v46  ;;  %v1635_v2 = vmul.f32 %v4929_v49, %v4913_v5 }
 0xa49   :  { %v1633_v40 = vmul.f32 %v4931_v38, %v4915_v13 }
 0xa4b   :  { %4415 = vmatprep.mubr.msk.f32.mxu0 %vm950_vm14, %v1633_v40 }
 0xa4c   :  { %4416 = vmatmul.mubr.msk.f32.gmra.mrb[24].mxu0 %vm950_vm14, %v1635_v2 }
 0xb13   :  { %v4408_v14 = vpop.f32.mrb[18].mxu0 }
 0xb14   :  { %v1726_v11 = vpop.f32.mrb[19].mxu0  ;;  %v1766_v62 = vsel %vm129_vm8, %v4408_v14, 0.0  ;;  %v1913_v14 = vld [vmem:[%s6109_s2 + $0xe8] sm:$0xff] }
 0xb15   :  { %v1765_v32 = vsel %vm129_vm8, %v1726_v11, 0.0  ;;  %v1914_v11 = vld [vmem:[%s6109_s2 + $0xf0] sm:$0xff] }
 0xb17   :  { %v4411_v12 = vpop.f32.mrb[20].mxu0 }
 0xb18   :  { %v1768_v63 = vsel %vm130_vm10, %v4411_v12, 0.0  ;;  %v1736_v22 = vpop.f32.mrb[21].mxu0  ;;  %v4738_v12 = vpack.c.bf16 %v1914_v11, %v1913_v14 }
 0xb19   :  { %v1770_v61 = vadd.f32 %v1768_v63, %v1766_v62  ;;  %v1767_v5 = vsel %vm130_vm10, %v1736_v22, 0.0  ;;  %v2003_v62 = vld [vmem:[%s6109_s2 + $0xf8] sm:$0xff]  ;;  %v2004_v63 = vld [vmem:[%s6109_s2 + $0x100] sm:$0xff]  ;;  %v2005_v22 = vld [vmem:[%s6109_s2 + $0x108] sm:$0xff] }
 0xb1a   :  { %v1769_v13 = vadd.f32 %v1767_v5, %v1765_v32  ;;  %v4742_v32 = vpack.c.bf16 %v2004_v63, %v2003_v62 }
 0xb1b   :  { %v4414_v7 = vpop.f32.mrb[22].mxu0 }
 0xb1c   :  { %v1772_v55 = vsel %vm131_vm11, %v4414_v7, 0.0  ;;  %v1746_v4 = vpop.f32.mrb[23].mxu0  ;;  %v2008_v7 = vld [vmem:[%s6109_s2 + $0x120] sm:$0xff]  ;;  %4743 = vmatprep.subr.bf16.mxu0 %v4742_v32 }
 0xb1d   :  { %v1774_v10 = vadd.f32 %v1772_v55, %v1770_v61  ;;  %v1771_v15 = vsel %vm131_vm11, %v1746_v4, 0.0  ;;  %v2006_v61 = vld [vmem:[%s6109_s2 + $0x110] sm:$0xff] }
 0xb1e   :  { %v1773_v47 = vadd.f32 %v1771_v15, %v1769_v13  ;;  %v4746_v5 = vpack.c.bf16 %v2006_v61, %v2005_v22  ;;  %v2007_v13 = vld [vmem:[%s6109_s2 + $0x118] sm:$0xff] }
 0xb1f   :  { %v4417_v39 = vpop.f32.mrb[24].mxu0  ;;  %v4750_v55 = vpack.c.bf16 %v2008_v7, %v2007_v13 }
 0xb20   :  { %v1776_v16 = vsel %vm132_vm12, %v4417_v39, 0.0  ;;  %v1756_v17 = vpop.f32.mrb[25].mxu0 }
 0xb21   :  { %v1778_v23 = vadd.f32 %v1776_v16, %v1774_v10  ;;  %v1775_v24 = vsel %vm132_vm12, %v1756_v17, 0.0 }
 0xb22   :  { %v1777_v27 = vadd.f32 %v1775_v24, %v1773_v47 }
 0xb24   :  { %4426 = vmatprep.mubr.msk.f32.mxu0 %vm215_vm0, %v1777_v27 }
 0xb25   :  { %4427 = vmatmul.mubr.msk.f32.vlgmr.msra.gmra.mrb[26].mxu0 %vm215_vm0, %v1778_v23  ;;  %v3946_v23 = vld [vmem:[%s6110_s3 + $0xa] ss:$0 sm:$0xff] }
 0xb26   :  { %4745 = vmatpush3.bf16.msra.mxu0 %v4742_v32 }
 0xb27   :  { %4747 = vmatprep.subr.bf16.mxu0 %v4746_v5 }
 0xb2a   :  { %4749 = vmatpush3.bf16.msra.mxu0 %v4746_v5 }
 0xb2b   :  { %4751 = vmatprep.subr.bf16.mxu0 %v4750_v55 }
 0xb2e   :  { %4753 = vmatpush3.bf16.msra.mxu0 %v4750_v55 }
 0xbf8   :  { %v4428_v35 = vpop.f32.mrb[26].mxu0 }
 0xbf9   :  { %v1866_v36 = vadd.f32 %v4428_v35, %v3943_v30  ;;  %v1860_v37 = vpop.f32.mrb[27].mxu0  ;;  %v3947_v35 = vld [vmem:[%s6110_s3 + $0xb] ss:$0 sm:$0xff] }
 0xbfa   :  { %v1861_v8 = vadd.f32 %v3943_v30, %v1860_v37 }
 0xbfb   :  { %v1870_v44 = vadd.f32 %v1866_v36, %v5497_v21 }
 0xbfc   :  { %v1869_v31 = vadd.f32 %v1861_v8, %v5495_v18  ;;  %v1911_v18 = vld [vmem:[%s6109_s2 + $0xd8] sm:$0xff] }
 0xbfd   :  { %v1876_v29 = vsel %vm215_vm0, %v1870_v44, 0.0  ;;  %v4734_v34 = vpack.c.bf16 %v1912_v52, %v1911_v18 }
 0xbfe   :  { %1877 = vadd.xlane.f32.xlu0 %v1876_v29  ;;  %v1873_v45 = vsel %vm215_vm0, %v1869_v31, 0.0  ;;  %v2010_v29 = vld [vmem:[%s6109_s2 + $0x130] sm:$0xff] }
 0xbff   :  { %1874 = vadd.xlane.f32.xlu1 %v1873_v45  ;;  %4735 = vmatprep.subr.bf16.mxu1 %v4734_v34 }
 0xc00   :  { %4737 = vmatpush3.bf16.msra.mxu1 %v4734_v34 }
 0xc01   :  { %4739 = vmatprep.subr.bf16.mxu1 %v4738_v12 }
 0xc04   :  { %4741 = vmatpush3.bf16.msra.mxu1 %v4738_v12 }
 0xc8b   :  { %v1878_v46 = vpop.xlane.xlu0 %1877 }
 0xc8c   :  { %v1880_v49 = vmul.f32 0.03125, %v1878_v46  ;;  %v1875_v38 = vpop.xlane.xlu1 %1874  ;;  %v3948_v46 = vld [vmem:[%s6110_s3 + $0x6] ss:$0 sm:$0xff] }
 0xc8d   :  { %v1879_v40 = vmul.f32 0.03125, %v1875_v38 }
 0xc8e   :  { %v1882_v2 = vsub.f32 %v1870_v44, %v1880_v49 }
 0xc8f   :  { %v1881_v0 = vsub.f32 %v1869_v31, %v1879_v40  ;;  %v2009_v31 = vld [vmem:[%s6109_s2 + $0x128] sm:$0xff] }
 0xc90   :  { %v1884_v56 = vmul.f32 %v1882_v2, %v1882_v2  ;;  %v4754_v45 = vpack.c.bf16 %v2010_v29, %v2009_v31 }
 0xc91   :  { %v1883_v57 = vmul.f32 %v1881_v0, %v1881_v0 }
 0xc92   :  { %v1888_v53 = vsel %vm215_vm0, %v1884_v56, 0.0  ;;  %4755 = vmatprep.subr.bf16.mxu0 %v4754_v45 }
 0xc93   :  { %1889 = vadd.xlane.f32.xlu0 %v1888_v53  ;;  %v1885_v21 = vsel %vm215_vm0, %v1883_v57, 0.0  ;;  %4757 = vmatpush3.bf16.msra.mxu0 %v4754_v45  ;;  %v3951_v57 = vld [vmem:[%s6110_s3 + $0x7] ss:$0 sm:$0xff] }
 0xc94   :  { %1886 = vadd.xlane.f32.xlu1 %v1885_v21 }
 0xd20   :  { %v1890_v4 = vpop.xlane.xlu0 %1889 }
 0xd21   :  { %v1892_v10 = vmul.f32 0.03125, %v1890_v4  ;;  %v1887_v15 = vpop.xlane.xlu1 %1886 }
 0xd22   :  { %v1891_v47 = vmul.f32 0.03125, %v1887_v15  ;;  %v2141_v15 = vld [vmem:[%s6109_s2 + $0x140] sm:$0xff] }
 0xd23   :  { %v1894_v39 = vadd.f32 1e-05, %v1892_v10  ;;  %v2140_v10 = vld [vmem:[%s6109_s2 + $0x138] sm:$0xff] }
 0xd24   :  { %v1893_v16 = vadd.f32 1e-05, %v1891_v47  ;;  %v4758_v47 = vpack.c.bf16 %v2141_v15, %v2140_v10  ;;  %v3959_v15 = vld [vmem:[%s6110_s3 + $0xf] ss:$0 sm:$0xff] }
 0xd25   :  { %4932 = vrsqrt.f32 %v1894_v39  ;;  %v2314_v39 = vld [vmem:[%s6109_s2 + $0x178] sm:$0xff] }
 0xd26   :  { %4934 = vrsqrt.f32 %v1893_v16  ;;  %v2315_v16 = vld [vmem:[%s6109_s2 + $0x180] sm:$0xff]  ;;  %4759 = vmatprep.subr.bf16.mxu1 %v4758_v47 }
 0xd2f   :  { %v4933_v17 = vpop.eup %4932 }
 0xd30   :  { %v4935_v24 = vpop.eup %4934  ;;  %v1898_v27 = vmul.f32 %v4933_v17, %v1882_v2  ;;  %v4774_v17 = vpack.c.bf16 %v2315_v16, %v2314_v39 }
 0xd31   :  { %v1897_v30 = vmul.f32 %v4935_v24, %v1881_v0  ;;  %v2143_v24 = vld [vmem:[%s6109_s2 + $0x150] sm:$0xff] }
 0xd32   :  { %v1904_v36 = vmul.f32 %v3946_v23, %v1898_v27  ;;  %v2316_v27 = vld [vmem:[%s6109_s2 + $0x188] sm:$0xff]  ;;  %4775 = vmatprep.subr.bf16.mxu0 %v4774_v17 }
 0xd33   :  { %v1903_v37 = vmul.f32 %v3946_v23, %v1897_v30  ;;  %v2142_v23 = vld [vmem:[%s6109_s2 + $0x148] sm:$0xff] }
 0xd34   :  { %v1910_v44 = vadd.f32 %v3947_v35, %v1904_v36  ;;  %v4762_v30 = vpack.c.bf16 %v2143_v24, %v2142_v23  ;;  %v2773_v23 = vld [vmem:[%s6109_s2 + $0x1a0] sm:$0xff] }
 0xd35   :  { %v1909_v8 = vadd.f32 %v3947_v35, %v1903_v37  ;;  %v2317_v35 = vld [vmem:[%s6109_s2 + $0x190] sm:$0xff]  ;;  %v2230_v37 = vld [vmem:[%s6109_s2 + $0x158] sm:$0xff] }
 0xd36   :  { %v4778_v36 = vpack.c.bf16 %v2317_v35, %v2316_v27 }
 0xd37   :  { %4437 = vmatprep.mubr.msk.f32.mxu1 %vm215_vm0, %v1909_v8 }
 0xd38   :  { %4438 = vmatmul.mubr.msk.f32.vlgmr.msra.gmra.mrb[26].mxu1 %vm215_vm0, %v1910_v44 }
 0xd39   :  { %4761 = vmatpush3.bf16.msra.mxu1 %v4758_v47 }
 0xd3a   :  { %4763 = vmatprep.subr.bf16.mxu1 %v4762_v30 }
 0xd3d   :  { %4765 = vmatpush3.bf16.msra.mxu1 %v4762_v30 }
 0xe0b   :  { %v4439_v49 = vpop.f32.mrb[26].mxu1 }
 0xe0c   :  { %v1998_v38 = vadd.f32 %v4439_v49, %v3948_v46  ;;  %v1992_v40 = vpop.f32.mrb[27].mxu1 }
 0xe0d   :  { %v1993_v2 = vadd.f32 %v3948_v46, %v1992_v40 }
 0xe0e   :  { %v2002_v56 = vmax.f32 %v1998_v38, 0.0 }
 0xe0f   :  { %v2001_v0 = vmax.f32 %v1993_v2, 0.0  ;;  %v3954_v2 = vld [vmem:[%s6110_s3 + $0xc] ss:$0 sm:$0xff] }
 0xe11   :  { %4456 = vmatprep.mubr.msk.f32.mxu0 %vm2016_vm3, %v2001_v0 }
 0xe12   :  { %4457 = vmatmul.mubr.msk.f32.vlgmr.msra.gmra.mrb[28].mxu0 %vm2016_vm3, %v2002_v56 }
 0xe13   :  { %4777 = vmatpush3.bf16.msra.mxu0 %v4774_v17  ;;  %v2772_v17 = vld [vmem:[%s6109_s2 + $0x198] sm:$0xff] }
 0xe14   :  { %4779 = vmatprep.subr.bf16.mxu0 %v4778_v36  ;;  %v4792_v30 = vpack.c.bf16 %v2773_v23, %v2772_v17 }
 0xe17   :  { %4781 = vmatpush3.bf16.msra.mxu0 %v4778_v36  ;;  %v2774_v36 = vld [vmem:[%s6109_s2 + $0x1a8] sm:$0xff] }
 0xee5   :  { %v4458_v53 = vpop.f32.mrb[28].mxu0 }
 0xee6   :  { %v2095_v21 = vadd.f32 %v4458_v53, %v3951_v57  ;;  %v2089_v18 = vpop.f32.mrb[29].mxu0  ;;  %v3955_v53 = vld [vmem:[%s6110_s3 + $0xd] ss:$0 sm:$0xff] }
 0xee7   :  { %v2090_v52 = vadd.f32 %v3951_v57, %v2089_v18 }
 0xee8   :  { %v2099_v34 = vadd.f32 %v2095_v21, %v1910_v44 }
 0xee9   :  { %v2098_v14 = vadd.f32 %v2090_v52, %v1909_v8  ;;  %v2231_v8 = vld [vmem:[%s6109_s2 + $0x160] sm:$0xff]  ;;  %v2232_v52 = vld [vmem:[%s6109_s2 + $0x168] sm:$0xff] }
 0xeea   :  { %v2105_v11 = vsel %vm215_vm0, %v2099_v34, 0.0  ;;  %v4766_v44 = vpack.c.bf16 %v2231_v8, %v2230_v37  ;;  %v2775_v37 = vld [vmem:[%s6109_s2 + $0x1b0] sm:$0xff] }
 0xeeb   :  { %2106 = vadd.xlane.f32.xlu0 %v2105_v11  ;;  %v2102_v12 = vsel %vm215_vm0, %v2098_v14, 0.0  ;;  %v4796_v8 = vpack.c.bf16 %v2775_v37, %v2774_v36 }
 0xeec   :  { %2103 = vadd.xlane.f32.xlu1 %v2102_v12  ;;  %4767 = vmatprep.subr.bf16.mxu1 %v4766_v44 }
 0xf78   :  { %v2107_v62 = vpop.xlane.xlu0 %2106 }
 0xf79   :  { %v2109_v63 = vmul.f32 0.03125, %v2107_v62  ;;  %v2104_v22 = vpop.xlane.xlu1 %2103  ;;  %v3962_v62 = vld [vmem:[%s6110_s3 + $0x10] ss:$0 sm:$0xff] }
 0xf7a   :  { %v2108_v32 = vmul.f32 0.03125, %v2104_v22 }
 0xf7b   :  { %v2111_v61 = vsub.f32 %v2099_v34, %v2109_v63  ;;  %v2233_v34 = vld [vmem:[%s6109_s2 + $0x170] sm:$0xff]  ;;  %v3956_v63 = vld [vmem:[%s6110_s3 + $0xe] ss:$0 sm:$0xff] }
 0xf7c   :  { %v2110_v5 = vsub.f32 %v2098_v14, %v2108_v32  ;;  %v4770_v12 = vpack.c.bf16 %v2233_v34, %v2232_v52 }
 0xf7d   :  { %v2113_v13 = vmul.f32 %v2111_v61, %v2111_v61 }
 0xf7e   :  { %v2112_v7 = vmul.f32 %v2110_v5, %v2110_v5 }
 0xf7f   :  { %v2117_v55 = vsel %vm215_vm0, %v2113_v13, 0.0 }
 0xf80   :  { %2118 = vadd.xlane.f32.xlu0 %v2117_v55  ;;  %v2114_v4 = vsel %vm215_vm0, %v2112_v7, 0.0 }
 0xf81   :  { %2115 = vadd.xlane.f32.xlu1 %v2114_v4 }
0x100d   :  { %v2119_v31 = vpop.xlane.xlu0 %2118 }
0x100e   :  { %v2121_v29 = vmul.f32 0.03125, %v2119_v31  ;;  %v2116_v45 = vpop.xlane.xlu1 %2115 }
0x100f   :  { %v2120_v46 = vmul.f32 0.03125, %v2116_v45 }
0x1010   :  { %v2123_v49 = vadd.f32 1e-05, %v2121_v29 }
0x1011   :  { %v2122_v38 = vadd.f32 1e-05, %v2120_v46 }
0x1012   :  { %4936 = vrsqrt.f32 %v2123_v49 }
0x1013   :  { %4938 = vrsqrt.f32 %v2122_v38 }
0x101c   :  { %v4937_v40 = vpop.eup %4936 }
0x101d   :  { %v4939_v0 = vpop.eup %4938  ;;  %v2127_v56 = vmul.f32 %v4937_v40, %v2111_v61 }
0x101e   :  { %v2126_v57 = vmul.f32 %v4939_v0, %v2110_v5 }
0x101f   :  { %v2133_v21 = vmul.f32 %v3954_v2, %v2127_v56 }
0x1020   :  { %v2132_v18 = vmul.f32 %v3954_v2, %v2126_v57 }
0x1021   :  { %v5750_v11 = vadd.f32 %v3955_v53, %v2133_v21 }
0x1022   :  { %v5748_v14 = vadd.f32 %v3955_v53, %v2132_v18 }
0x1024   :  { %4467 = vmatprep.mubr.msk.f32.mxu1 %vm215_vm0, %v5748_v14  ;;  %4489 = vmatprep.mubr.msk.f32.mxu0 %vm215_vm0, %v5748_v14 }
0x1025   :  { %4468 = vmatmul.mubr.msk.f32.vlgmr.msra.gmra.mrb[28].mxu1 %vm215_vm0, %v5750_v11  ;;  %4490 = vmatmul.mubr.msk.f32.vlgmr.msra.gmra.mrb[30].mxu0 %vm215_vm0, %v5750_v11 }
0x1026   :  { %4769 = vmatpush3.bf16.msra.mxu1 %v4766_v44  ;;  %4478 = vmatprep.mubr.msk.f32.mxu1 %vm215_vm0, %v5748_v14 }
0x1027   :  { %4771 = vmatprep.subr.bf16.mxu1 %v4770_v12 }
0x102a   :  { %4773 = vmatpush3.bf16.msra.mxu1 %v4770_v12 }
0x102d   :  { %4479 = vmatmul.mubr.msk.f32.vlgmr.msra.gmra.mrb[30].mxu1 %vm215_vm0, %v5750_v11 }
0x10f8   :  { %v4469_v22 = vpop.f32.mrb[28].mxu1  ;;  %v4491_v32 = vpop.f32.mrb[30].mxu0 }
0x10f9   :  { %v2395_v61 = vadd.f32 %v4491_v32, %v3962_v62  ;;  %v2221_v5 = vpop.f32.mrb[29].mxu1  ;;  %v2389_v13 = vpop.f32.mrb[31].mxu0  ;;  %v2227_v35 = vadd.f32 %v4469_v22, %v3956_v63 }
0x10fa   :  { %v2222_v7 = vadd.f32 %v3956_v63, %v2221_v5  ;;  %v2390_v55 = vadd.f32 %v3962_v62, %v2389_v13 }
0x10fb   :  { %v2399_v44 = vsel %vm129_vm8, %v2227_v35, 0.0  ;;  %v2401_v29 = vsel %vm130_vm10, %v2227_v35, 0.0  ;;  %v2403_v46 = vsel %vm131_vm11, %v2227_v35, 0.0  ;;  %v2405_v38 = vsel %vm132_vm12, %v2227_v35, 0.0 }
0x10fc   :  { %v4788_v4 = vpack.c.bf16 %v2395_v61, %v2390_v55  ;;  %v2398_v10 = vsel %vm129_vm8, %v2222_v7, 0.0  ;;  %v2400_v31 = vsel %vm130_vm10, %v2222_v7, 0.0  ;;  %v2402_v45 = vsel %vm131_vm11, %v2222_v7, 0.0 }
0x10fd   :  { %4496 = vmatprep.mubr.msk.f32.mxu1 %vm215_vm0, %v2398_v10  ;;  %v2404_v49 = vsel %vm132_vm12, %v2222_v7, 0.0 }
0x10fe   :  { %4789 = vmatprep.subr.bf16.mxu0 %v4788_v4 }
0x10ff   :  { %4791 = vmatpush3.bf16.msra.mxu0 %v4788_v4 }
0x1100   :  { %v4480_v47 = vpop.f32.mrb[30].mxu1 }
0x1101   :  { %v2311_v39 = vadd.f32 %v4480_v47, %v3959_v15  ;;  %v2305_v16 = vpop.f32.mrb[31].mxu1 }
0x1102   :  { %v2306_v24 = vadd.f32 %v3959_v15, %v2305_v16 }
0x1104   :  { %v4782_v27 = vpack.c.bf16 %v2311_v39, %v2306_v24 }
0x1106   :  { %4784 = vmatprep.subr.msk.bf16.mxu1 %vm5268_vm9, %v4782_v27 }
0x1107   :  { %4787 = vmatpush3.bf16.xpose.msk.msra.mxu1 %vm5268_vm9, %v4782_v27 }
0x1108   :  { %4793 = vmatprep.subr.bf16.mxu1 %v4792_v30 }
0x110e   :  { %4497 = vmatmul.mubr.msk.f32.vlgmr.msra.gmra.mrb[32].mxu1 %vm215_vm0, %v2399_v44 }
0x110f   :  { %4499 = vmatprep.mubr.msk.f32.mxu1 %vm215_vm0, %v2400_v31  ;;  %4795 = vmatpush3.bf16.msra.mxu1 %v4792_v30 }
0x1110   :  { %4797 = vmatprep.subr.bf16.mxu1 %v4796_v8 }
0x1112   :  { %4500 = vmatmul.mubr.msk.f32.gmra.mrb[34].mxu1 %vm215_vm0, %v2401_v29 }
0x1113   :  { %4502 = vmatprep.mubr.msk.f32.mxu1 %vm215_vm0, %v2402_v45  ;;  %4799 = vmatpush3.bf16.msra.mxu1 %v4796_v8 }
0x1114   :  { %4810 = vmatprep.subr.msk.bf16.mxu1 %vm5268_vm9, %v5243_v19 }
0x1116   :  { %4503 = vmatmul.mubr.msk.f32.gmra.mrb[36].mxu1 %vm215_vm0, %v2403_v46 }
0x1117   :  { %4505 = vmatprep.mubr.msk.f32.mxu1 %vm215_vm0, %v2404_v49 }
0x111a   :  { %4506 = vmatmul.mubr.msk.f32.gmra.mrb[38].mxu1 %vm215_vm0, %v2405_v38 }
0x11e1   :  { %v4498_v40 = vpop.f32.mrb[32].mxu1 }
0x11e2   :  { %v2508_v2 = vadd.f32 %v4498_v40, %v5340_v20  ;;  %v2502_v0 = vpop.f32.mrb[33].mxu1 }
0x11e3   :  { %v2503_v56 = vadd.f32 %v2502_v0, %v5355_v28 }
0x11e4   :  { %v2544_v57 = vsel %vm950_vm14, %v2508_v2, -inf }
0x11e5   :  { %2545 = vmax.xlane.f32.xlu0 %v2544_v57  ;;  %v4501_v53 = vpop.f32.mrb[34].mxu1  ;;  %v2541_v21 = vsel %vm950_vm14, %v2503_v56, -inf }
0x11e6   :  { %v2518_v18 = vadd.f32 %v4501_v53, %v5376_v43  ;;  %v2512_v52 = vpop.f32.mrb[35].mxu1  ;;  %2542 = vmax.xlane.f32.xlu1 %v2541_v21 }
0x11e7   :  { %v2513_v34 = vadd.f32 %v2512_v52, %v5373_v41 }
0x11e8   :  { %v2550_v12 = vsel %vm950_vm14, %v2518_v18, -inf }
0x11e9   :  { %2551 = vmax.xlane.f32.xlu0 %v2550_v12  ;;  %v4504_v62 = vpop.f32.mrb[36].mxu1  ;;  %v2547_v20 = vsel %vm950_vm14, %v2513_v34, -inf }
0x11ea   :  { %v2528_v28 = vadd.f32 %v4504_v62, %v5390_v51  ;;  %v2522_v63 = vpop.f32.mrb[37].mxu1  ;;  %2548 = vmax.xlane.f32.xlu1 %v2547_v20 }
0x11eb   :  { %v2523_v22 = vadd.f32 %v2522_v63, %v5404_v59  ;;  %v2904_v63 = vld [vmem:[%s6109_s2 + $0x1b8] sm:$0xff] }
0x11ec   :  { %v2556_v32 = vsel %vm950_vm14, %v2528_v28, -inf }
0x11ed   :  { %2557 = vmax.xlane.f32.xlu0 %v2556_v32  ;;  %v4507_v43 = vpop.f32.mrb[38].mxu1  ;;  %v2553_v61 = vsel %vm950_vm14, %v2523_v22, -inf }
0x11ee   :  { %v2538_v41 = vadd.f32 %v4507_v43, %v5423_v6  ;;  %v2532_v5 = vpop.f32.mrb[39].mxu1  ;;  %2554 = vmax.xlane.f32.xlu1 %v2553_v61 }
0x11ef   :  { %v2533_v13 = vadd.f32 %v2532_v5, %v5415_v1 }
0x11f0   :  { %v2562_v7 = vsel %vm950_vm14, %v2538_v41, -inf }
0x11f1   :  { %2563 = vmax.xlane.f32.xlu0 %v2562_v7  ;;  %v2559_v51 = vsel %vm950_vm14, %v2533_v13, -inf }
0x11f2   :  { %2560 = vmax.xlane.f32.xlu1 %v2559_v51 }
0x1272   :  { %v2546_v55 = vpop.xlane.xlu0 %2545 }
0x1273   :  { %v2566_v59 = vsub.f32 %v2508_v2, %v2546_v55  ;;  %v2543_v4 = vpop.xlane.xlu1 %2542  ;;  %v2906_v55 = vld [vmem:[%s6109_s2 + $0x1c8] sm:$0xff] }
0x1274   :  { %v2565_v10 = vsub.f32 %v2503_v56, %v2543_v4 }
0x1275   :  { %v2575_v15 = vmul.f32 1.442695, %v2566_v59  ;;  %v2907_v59 = vld [vmem:[%s6109_s2 + $0x1d0] sm:$0xff] }
0x1276   :  { %v2573_v47 = vmul.f32 1.442695, %v2565_v10  ;;  %v2552_v39 = vpop.xlane.xlu0 %2551 }
0x1277   :  { %4940 = vpow2.f32 %v2575_v15  ;;  %v2568_v16 = vsub.f32 %v2518_v18, %v2552_v39  ;;  %v2549_v6 = vpop.xlane.xlu1 %2548 }
0x1278   :  { %4942 = vpow2.f32 %v2573_v47  ;;  %v2567_v17 = vsub.f32 %v2513_v34, %v2549_v6 }
0x1279   :  { %v2579_v23 = vmul.f32 1.442695, %v2568_v16  ;;  %v4804_v16 = vpack.c.bf16 %v2907_v59, %v2906_v55 }
0x127a   :  { %v2577_v1 = vmul.f32 1.442695, %v2567_v17  ;;  %v2558_v24 = vpop.xlane.xlu0 %2557 }
0x127b   :  { %4944 = vpow2.f32 %v2579_v23  ;;  %v2570_v27 = vsub.f32 %v2528_v28, %v2558_v24  ;;  %v2555_v30 = vpop.xlane.xlu1 %2554 }
0x127c   :  { %4946 = vpow2.f32 %v2577_v1  ;;  %v2569_v35 = vsub.f32 %v2523_v22, %v2555_v30  ;;  %v2905_v22 = vld [vmem:[%s6109_s2 + $0x1c0] sm:$0xff] }
0x127d   :  { %v2583_v36 = vmul.f32 1.442695, %v2570_v27  ;;  %v4800_v32 = vpack.c.bf16 %v2905_v22, %v2904_v63 }
0x127e   :  { %v2581_v37 = vmul.f32 1.442695, %v2569_v35  ;;  %v2564_v8 = vpop.xlane.xlu0 %2563 }
0x127f   :  { %4948 = vpow2.f32 %v2583_v36  ;;  %v2572_v44 = vsub.f32 %v2538_v41, %v2564_v8  ;;  %v2561_v31 = vpop.xlane.xlu1 %2560  ;;  %4801 = vmatprep.subr.bf16.mxu0 %v4800_v32 }
0x1280   :  { %4950 = vpow2.f32 %v2581_v37  ;;  %v2571_v29 = vsub.f32 %v2533_v13, %v2561_v31 }
0x1281   :  { %v4941_v45 = vpop.eup %4940  ;;  %v2587_v46 = vmul.f32 1.442695, %v2572_v44 }
0x1282   :  { %v4943_v49 = vpop.eup %4942  ;;  %v2585_v38 = vmul.f32 1.442695, %v2571_v29  ;;  %v2592_v40 = vsel %vm950_vm14, %v4941_v45, 0.0 }
0x1283   :  { %4952 = vpow2.f32 %v2587_v46  ;;  %2593 = vadd.xlane.f32.xlu0 %v2592_v40  ;;  %v2589_v2 = vsel %vm950_vm14, %v4943_v49, 0.0 }
0x1284   :  { %4954 = vpow2.f32 %v2585_v38  ;;  %2590 = vadd.xlane.f32.xlu1 %v2589_v2 }
0x1285   :  { %v4945_v0 = vpop.eup %4944 }
0x1286   :  { %v4947_v56 = vpop.eup %4946  ;;  %v2598_v57 = vsel %vm950_vm14, %v4945_v0, 0.0 }
0x1287   :  { %2599 = vadd.xlane.f32.xlu0 %v2598_v57  ;;  %v2595_v53 = vsel %vm950_vm14, %v4947_v56, 0.0 }
0x1288   :  { %2596 = vadd.xlane.f32.xlu1 %v2595_v53 }
0x1289   :  { %v4949_v21 = vpop.eup %4948 }
0x128a   :  { %v4951_v18 = vpop.eup %4950  ;;  %v2604_v52 = vsel %vm950_vm14, %v4949_v21, 0.0 }
0x128b   :  { %2605 = vadd.xlane.f32.xlu0 %v2604_v52  ;;  %v2601_v34 = vsel %vm950_vm14, %v4951_v18, 0.0 }
0x128c   :  { %2602 = vadd.xlane.f32.xlu1 %v2601_v34 }
0x128d   :  { %v4953_v12 = vpop.eup %4952 }
0x128e   :  { %v4955_v62 = vpop.eup %4954  ;;  %v2610_v20 = vsel %vm950_vm14, %v4953_v12, 0.0 }
0x128f   :  { %2611 = vadd.xlane.f32.xlu0 %v2610_v20  ;;  %v2607_v28 = vsel %vm950_vm14, %v4955_v62, 0.0 }
0x1290   :  { %2608 = vadd.xlane.f32.xlu1 %v2607_v28 }
0x1310   :  { %v2594_v43 = vpop.xlane.xlu0 %2593 }
0x1311   :  { %4956 = vrcp.f32 %v2594_v43  ;;  %v2591_v61 = vpop.xlane.xlu1 %2590 }
0x1312   :  { %4958 = vrcp.f32 %v2591_v61 }
0x1314   :  { %v2600_v41 = vpop.xlane.xlu0 %2599 }
0x1315   :  { %4960 = vrcp.f32 %v2600_v41  ;;  %v2597_v5 = vpop.xlane.xlu1 %2596 }
0x1316   :  { %4962 = vrcp.f32 %v2597_v5 }
0x1318   :  { %v2606_v13 = vpop.xlane.xlu0 %2605 }
0x1319   :  { %4964 = vrcp.f32 %v2606_v13  ;;  %v2603_v7 = vpop.xlane.xlu1 %2602 }
0x131a   :  { %4966 = vrcp.f32 %v2603_v7 }
0x131b   :  { %v4957_v51 = vpop.eup %4956 }
0x131c   :  { %v4959_v4 = vpop.eup %4958  ;;  %v2612_v10 = vpop.xlane.xlu0 %2611  ;;  %v2616_v39 = vmul.f32 %v4957_v51, %v4941_v45 }
0x131d   :  { %4968 = vrcp.f32 %v2612_v10  ;;  %v2609_v15 = vpop.xlane.xlu1 %2608  ;;  %v2614_v47 = vmul.f32 %v4959_v4, %v4943_v49 }
0x131e   :  { %4970 = vrcp.f32 %v2609_v15 }
0x131f   :  { %v4961_v6 = vpop.eup %4960  ;;  %4512 = vmatprep.mubr.msk.f32.mxu0 %vm950_vm14, %v2614_v47 }
0x1320   :  { %v4963_v17 = vpop.eup %4962  ;;  %4513 = vmatmul.mubr.msk.f32.vlgmr.msra.gmra.mrb[32].mxu0 %vm950_vm14, %v2616_v39  ;;  %v2620_v1 = vmul.f32 %v4961_v6, %v4945_v0 }
0x1321   :  { %4803 = vmatpush3.bf16.msra.mxu0 %v4800_v32  ;;  %v2618_v23 = vmul.f32 %v4963_v17, %v4947_v56  ;;  %v3983_v32 = vld [vmem:[%s6110_s3 + $0x11] ss:$0 sm:$0xff] }
0x1322   :  { %4805 = vmatprep.subr.bf16.mxu0 %v4804_v16 }
0x1323   :  { %v4965_v24 = vpop.eup %4964  ;;  %4515 = vmatprep.mubr.msk.f32.mxu0 %vm950_vm14, %v2618_v23 }
0x1324   :  { %v4967_v27 = vpop.eup %4966  ;;  %4516 = vmatmul.mubr.msk.f32.gmra.mrb[34].mxu0 %vm950_vm14, %v2620_v1  ;;  %v2624_v35 = vmul.f32 %v4965_v24, %v4949_v21 }
0x1325   :  { %4807 = vmatpush3.bf16.msra.mxu0 %v4804_v16  ;;  %v2622_v30 = vmul.f32 %v4967_v27, %v4951_v18 }
0x1326   :  { %4815 = vmatprep.subr.bf16.mxu0 %v5248_v25 }
0x1327   :  { %v4969_v36 = vpop.eup %4968  ;;  %4518 = vmatprep.mubr.msk.f32.mxu0 %vm950_vm14, %v2622_v30  ;;  %v3986_v30 = vld [vmem:[%s6110_s3 + $0x16] ss:$0 sm:$0xff] }
0x1328   :  { %v4971_v37 = vpop.eup %4970  ;;  %4519 = vmatmul.mubr.msk.f32.gmra.mrb[36].mxu0 %vm950_vm14, %v2624_v35  ;;  %v2628_v44 = vmul.f32 %v4969_v36, %v4953_v12 }
0x1329   :  { %v2626_v8 = vmul.f32 %v4971_v37, %v4955_v62 }
0x132b   :  { %4521 = vmatprep.mubr.msk.f32.mxu0 %vm950_vm14, %v2626_v8  ;;  %v3987_v8 = vld [vmem:[%s6110_s3 + $0x17] ss:$0 sm:$0xff] }
0x132c   :  { %4522 = vmatmul.mubr.msk.f32.gmra.mrb[38].mxu0 %vm950_vm14, %v2628_v44 }
0x13f3   :  { %v4514_v31 = vpop.f32.mrb[32].mxu0 }
0x13f4   :  { %v2719_v29 = vpop.f32.mrb[33].mxu0  ;;  %v2759_v46 = vsel %vm129_vm8, %v4514_v31, 0.0 }
0x13f5   :  { %v2758_v40 = vsel %vm129_vm8, %v2719_v29, 0.0 }
0x13f7   :  { %v4517_v45 = vpop.f32.mrb[34].mxu0 }
0x13f8   :  { %v2761_v49 = vsel %vm130_vm10, %v4517_v45, 0.0  ;;  %v2729_v38 = vpop.f32.mrb[35].mxu0 }
0x13f9   :  { %v2763_v2 = vadd.f32 %v2761_v49, %v2759_v46  ;;  %v2760_v0 = vsel %vm130_vm10, %v2729_v38, 0.0  ;;  %v3988_v46 = vld [vmem:[%s6110_s3 + $0x12] ss:$0 sm:$0xff] }
0x13fa   :  { %v2762_v56 = vadd.f32 %v2760_v0, %v2758_v40 }
0x13fb   :  { %v4520_v57 = vpop.f32.mrb[36].mxu0 }
0x13fc   :  { %v2765_v53 = vsel %vm131_vm11, %v4520_v57, 0.0  ;;  %v2739_v21 = vpop.f32.mrb[37].mxu0 }
0x13fd   :  { %v2767_v18 = vadd.f32 %v2765_v53, %v2763_v2  ;;  %v2764_v52 = vsel %vm131_vm11, %v2739_v21, 0.0 }
0x13fe   :  { %v2766_v34 = vadd.f32 %v2764_v52, %v2762_v56 }
0x13ff   :  { %v4523_v12 = vpop.f32.mrb[38].mxu0 }
0x1400   :  { %v2769_v62 = vsel %vm132_vm12, %v4523_v12, 0.0  ;;  %v2749_v20 = vpop.f32.mrb[39].mxu0 }
0x1401   :  { %v2771_v28 = vadd.f32 %v2769_v62, %v2767_v18  ;;  %v2768_v63 = vsel %vm132_vm12, %v2749_v20, 0.0 }
0x1402   :  { %v2770_v22 = vadd.f32 %v2768_v63, %v2766_v34 }
0x1404   :  { %4532 = vmatprep.mubr.msk.f32.mxu1 %vm215_vm0, %v2770_v22 }
0x1405   :  { %4533 = vmatmul.mubr.msk.f32.vlgmr.msra.gmra.mrb[40].mxu1 %vm215_vm0, %v2771_v28 }
0x1406   :  { %4813 = vmatpush3.bf16.xpose.msk.msra.mxu1 %vm5268_vm9, %v5243_v19 }
0x14d8   :  { %v4534_v43 = vpop.f32.mrb[40].mxu1 }
0x14d9   :  { %v2859_v61 = vadd.f32 %v4534_v43, %v3983_v32  ;;  %v2853_v41 = vpop.f32.mrb[41].mxu1 }
0x14da   :  { %v2854_v5 = vadd.f32 %v3983_v32, %v2853_v41 }
0x14db   :  { %v2863_v13 = vadd.f32 %v2859_v61, %v5750_v11 }
0x14dc   :  { %v2862_v7 = vadd.f32 %v2854_v5, %v5748_v14 }
0x14dd   :  { %v2869_v51 = vsel %vm215_vm0, %v2863_v13, 0.0 }
0x14de   :  { %2870 = vadd.xlane.f32.xlu0 %v2869_v51  ;;  %v2866_v55 = vsel %vm215_vm0, %v2862_v7, 0.0 }
0x14df   :  { %2867 = vadd.xlane.f32.xlu1 %v2866_v55 }
0x156b   :  { %v2871_v42 = vpop.xlane.xlu0 %2870 }
0x156c   :  { %v2873_v19 = vmul.f32 0.03125, %v2871_v42  ;;  %v2868_v59 = vpop.xlane.xlu1 %2867 }
0x156d   :  { %v2872_v4 = vmul.f32 0.03125, %v2868_v59 }
0x156e   :  { %v2875_v10 = vsub.f32 %v2863_v13, %v2873_v19 }
0x156f   :  { %v2874_v15 = vsub.f32 %v2862_v7, %v2872_v4 }
0x1570   :  { %v2877_v47 = vmul.f32 %v2875_v10, %v2875_v10 }
0x1571   :  { %v2876_v39 = vmul.f32 %v2874_v15, %v2874_v15 }
0x1572   :  { %v2881_v16 = vsel %vm215_vm0, %v2877_v47, 0.0 }
0x1573   :  { %2882 = vadd.xlane.f32.xlu0 %v2881_v16  ;;  %v2878_v11 = vsel %vm215_vm0, %v2876_v39, 0.0 }
0x1574   :  { %2879 = vadd.xlane.f32.xlu1 %v2878_v11 }
0x1600   :  { %v2883_v14 = vpop.xlane.xlu0 %2882 }
0x1601   :  { %v2885_v6 = vmul.f32 0.03125, %v2883_v14  ;;  %v2880_v17 = vpop.xlane.xlu1 %2879 }
0x1602   :  { %v2884_v23 = vmul.f32 0.03125, %v2880_v17 }
0x1603   :  { %v2887_v1 = vadd.f32 1e-05, %v2885_v6 }
0x1604   :  { %v2886_v24 = vadd.f32 1e-05, %v2884_v23 }
0x1605   :  { %4972 = vrsqrt.f32 %v2887_v1 }
0x1606   :  { %4974 = vrsqrt.f32 %v2886_v24 }
0x160f   :  { %v4973_v27 = vpop.eup %4972 }
0x1610   :  { %v4975_v35 = vpop.eup %4974  ;;  %v2891_v36 = vmul.f32 %v4973_v27, %v2875_v10 }
0x1611   :  { %v2890_v37 = vmul.f32 %v4975_v35, %v2874_v15 }
0x1612   :  { %v2897_v44 = vmul.f32 %v3986_v30, %v2891_v36 }
0x1613   :  { %v2896_v31 = vmul.f32 %v3986_v30, %v2890_v37 }
0x1614   :  { %v5899_v45 = vadd.f32 %v3987_v8, %v2897_v44 }
0x1615   :  { %v5897_v29 = vadd.f32 %v3987_v8, %v2896_v31 }
0x1617   :  { %4543 = vmatprep.mubr.msk.f32.mxu0 %vm215_vm0, %v5897_v29 }
0x1618   :  { %4544 = vmatmul.mubr.msk.f32.vlgmr.msra.gmra.mrb[40].mxu0 %vm215_vm0, %v5899_v45 }
0x1619   :  { %4817 = vmatpush3.bf16.msra.mxu0 %v5248_v25 }
0x16eb   :  { %v4545_v49 = vpop.f32.mrb[40].mxu0 }
0x16ec   :  { %v2991_v38 = vadd.f32 %v4545_v49, %v3988_v46  ;;  %v2985_v40 = vpop.f32.mrb[41].mxu0 }
0x16ed   :  { %v2986_v2 = vadd.f32 %v3988_v46, %v2985_v40 }
0x16ee   :  { %v2995_v56 = vsel %vm129_vm8, %v2991_v38, 0.0  ;;  %v2997_v57 = vsel %vm130_vm10, %v2991_v38, 0.0  ;;  %v2999_v21 = vsel %vm131_vm11, %v2991_v38, 0.0  ;;  %v3001_v52 = vsel %vm132_vm12, %v2991_v38, 0.0 }
0x16ef   :  { %v2994_v0 = vsel %vm129_vm8, %v2986_v2, 0.0  ;;  %v2996_v25 = vsel %vm130_vm10, %v2986_v2, 0.0  ;;  %v2998_v53 = vsel %vm131_vm11, %v2986_v2, 0.0  ;;  %v3000_v18 = vsel %vm132_vm12, %v2986_v2, 0.0 }
0x16f0   :  { %4550 = vmatprep.mubr.msk.f32.mxu1 %vm215_vm0, %v2994_v0 }
0x16f1   :  { %4551 = vmatmul.mubr.msk.f32.vlgmr.msra.gmra.mrb[42].mxu1 %vm215_vm0, %v2995_v56 }
0x16f2   :  { %4553 = vmatprep.mubr.msk.f32.mxu1 %vm215_vm0, %v2996_v25 }
0x16f5   :  { %4554 = vmatmul.mubr.msk.f32.gmra.mrb[44].mxu1 %vm215_vm0, %v2997_v57 }
0x16f6   :  { %4556 = vmatprep.mubr.msk.f32.mxu1 %vm215_vm0, %v2998_v53 }
0x16f9   :  { %4557 = vmatmul.mubr.msk.f32.gmra.mrb[46].mxu1 %vm215_vm0, %v2999_v21 }
0x16fa   :  { %4559 = vmatprep.mubr.msk.f32.mxu1 %vm215_vm0, %v3000_v18 }
0x16fd   :  { %4560 = vmatmul.mubr.msk.f32.gmra.mrb[48].mxu1 %vm215_vm0, %v3001_v52 }
0x17c4   :  { %v4552_v34 = vpop.f32.mrb[42].mxu1 }
0x17c5   :  { %v3104_v12 = vadd.f32 %v4552_v34, %v5535_v48  ;;  %v3098_v62 = vpop.f32.mrb[43].mxu1 }
0x17c6   :  { %v3099_v20 = vadd.f32 %v3098_v62, %v5541_v50 }
0x17c7   :  { %v3140_v28 = vsel %vm950_vm14, %v3104_v12, -inf }
0x17c8   :  { %3141 = vmax.xlane.f32.xlu0 %v3140_v28  ;;  %v4555_v63 = vpop.f32.mrb[44].mxu1  ;;  %v3137_v22 = vsel %vm950_vm14, %v3099_v20, -inf }
0x17c9   :  { %v3114_v32 = vadd.f32 %v4555_v63, %v5549_v54  ;;  %v3108_v43 = vpop.f32.mrb[45].mxu1  ;;  %3138 = vmax.xlane.f32.xlu1 %v3137_v22 }
0x17ca   :  { %v3109_v61 = vadd.f32 %v3108_v43, %v5556_v33 }
0x17cb   :  { %v3146_v41 = vsel %vm950_vm14, %v3114_v32, -inf }
0x17cc   :  { %3147 = vmax.xlane.f32.xlu0 %v3146_v41  ;;  %v4558_v5 = vpop.f32.mrb[46].mxu1  ;;  %v3143_v48 = vsel %vm950_vm14, %v3109_v61, -inf }
0x17cd   :  { %v3124_v50 = vadd.f32 %v4558_v5, %v5565_v58  ;;  %v3118_v13 = vpop.f32.mrb[47].mxu1  ;;  %3144 = vmax.xlane.f32.xlu1 %v3143_v48 }
0x17ce   :  { %v3119_v7 = vadd.f32 %v3118_v13, %v5572_v60 }
0x17cf   :  { %v3152_v51 = vsel %vm950_vm14, %v3124_v50, -inf }
0x17d0   :  { %3153 = vmax.xlane.f32.xlu0 %v3152_v51  ;;  %v4561_v54 = vpop.f32.mrb[48].mxu1  ;;  %v3149_v55 = vsel %vm950_vm14, %v3119_v7, -inf }
0x17d1   :  { %v3134_v33 = vadd.f32 %v4561_v54, %v5581_v3  ;;  %v3128_v42 = vpop.f32.mrb[49].mxu1  ;;  %3150 = vmax.xlane.f32.xlu1 %v3149_v55 }
0x17d2   :  { %v3129_v19 = vadd.f32 %v3128_v42, %v5588_v9 }
0x17d3   :  { %v3158_v59 = vsel %vm950_vm14, %v3134_v33, -inf }
0x17d4   :  { %3159 = vmax.xlane.f32.xlu0 %v3158_v59  ;;  %v3155_v58 = vsel %vm950_vm14, %v3129_v19, -inf }
0x17d5   :  { %3156 = vmax.xlane.f32.xlu1 %v3155_v58 }
0x1855   :  { %v3142_v4 = vpop.xlane.xlu0 %3141 }
0x1856   :  { %v3162_v60 = vsub.f32 %v3104_v12, %v3142_v4  ;;  %v3139_v10 = vpop.xlane.xlu1 %3138 }
0x1857   :  { %v3161_v15 = vsub.f32 %v3099_v20, %v3139_v10 }
0x1858   :  { %v3171_v47 = vmul.f32 1.442695, %v3162_v60 }
0x1859   :  { %v3169_v39 = vmul.f32 1.442695, %v3161_v15  ;;  %v3148_v16 = vpop.xlane.xlu0 %3147  ;;  %v3368_v15 = vld [vmem:[%s6109_s2 + $0x1d8] sm:$0xff] }
0x185a   :  { %4976 = vpow2.f32 %v3171_v47  ;;  %v3164_v11 = vsub.f32 %v3114_v32, %v3148_v16  ;;  %v3145_v3 = vpop.xlane.xlu1 %3144  ;;  %v3369_v47 = vld [vmem:[%s6109_s2 + $0x1e0] sm:$0xff]  ;;  %v3370_v16 = vld [vmem:[%s6109_s2 + $0x1e8] sm:$0xff] }
0x185b   :  { %4978 = vpow2.f32 %v3169_v39  ;;  %v3163_v14 = vsub.f32 %v3109_v61, %v3145_v3  ;;  %v4818_v39 = vpack.c.bf16 %v3369_v47, %v3368_v15 }
0x185c   :  { %v3175_v6 = vmul.f32 1.442695, %v3164_v11  ;;  %v3371_v11 = vld [vmem:[%s6109_s2 + $0x1f0] sm:$0xff] }
0x185d   :  { %v3173_v9 = vmul.f32 1.442695, %v3163_v14  ;;  %v3154_v17 = vpop.xlane.xlu0 %3153  ;;  %4819 = vmatprep.subr.bf16.mxu0 %v4818_v39  ;;  %v4822_v3 = vpack.c.bf16 %v3371_v11, %v3370_v16 }
0x185e   :  { %4980 = vpow2.f32 %v3175_v6  ;;  %v3166_v23 = vsub.f32 %v3124_v50, %v3154_v17  ;;  %v3151_v1 = vpop.xlane.xlu1 %3150 }
0x185f   :  { %4982 = vpow2.f32 %v3173_v9  ;;  %v3165_v24 = vsub.f32 %v3119_v7, %v3151_v1 }
0x1860   :  { %v3179_v27 = vmul.f32 1.442695, %v3166_v23 }
0x1861   :  { %v3177_v30 = vmul.f32 1.442695, %v3165_v24  ;;  %v3160_v35 = vpop.xlane.xlu0 %3159 }
0x1862   :  { %4984 = vpow2.f32 %v3179_v27  ;;  %v3168_v36 = vsub.f32 %v3134_v33, %v3160_v35  ;;  %v3157_v37 = vpop.xlane.xlu1 %3156 }
0x1863   :  { %4986 = vpow2.f32 %v3177_v30  ;;  %v3167_v8 = vsub.f32 %v3129_v19, %v3157_v37 }
0x1864   :  { %v4977_v44 = vpop.eup %4976  ;;  %v3183_v31 = vmul.f32 1.442695, %v3168_v36 }
0x1865   :  { %v4979_v46 = vpop.eup %4978  ;;  %v3181_v49 = vmul.f32 1.442695, %v3167_v8  ;;  %v3188_v38 = vsel %vm950_vm14, %v4977_v44, 0.0 }
0x1866   :  { %4988 = vpow2.f32 %v3183_v31  ;;  %3189 = vadd.xlane.f32.xlu0 %v3188_v38  ;;  %v3185_v40 = vsel %vm950_vm14, %v4979_v46, 0.0 }
0x1867   :  { %4990 = vpow2.f32 %v3181_v49  ;;  %3186 = vadd.xlane.f32.xlu1 %v3185_v40 }
0x1868   :  { %v4981_v2 = vpop.eup %4980 }
0x1869   :  { %v4983_v0 = vpop.eup %4982  ;;  %v3194_v56 = vsel %vm950_vm14, %v4981_v2, 0.0 }
0x186a   :  { %3195 = vadd.xlane.f32.xlu0 %v3194_v56  ;;  %v3191_v25 = vsel %vm950_vm14, %v4983_v0, 0.0 }
0x186b   :  { %3192 = vadd.xlane.f32.xlu1 %v3191_v25  ;;  %v4009_v25 = vld [vmem:[%s6110_s3 + $0x13] ss:$0 sm:$0xff] }
0x186c   :  { %v4985_v57 = vpop.eup %4984 }
0x186d   :  { %v4987_v53 = vpop.eup %4986  ;;  %v3200_v21 = vsel %vm950_vm14, %v4985_v57, 0.0 }
0x186e   :  { %3201 = vadd.xlane.f32.xlu0 %v3200_v21  ;;  %v3197_v18 = vsel %vm950_vm14, %v4987_v53, 0.0 }
0x186f   :  { %3198 = vadd.xlane.f32.xlu1 %v3197_v18 }
0x1870   :  { %v4989_v52 = vpop.eup %4988 }
0x1871   :  { %v4991_v34 = vpop.eup %4990  ;;  %v3206_v12 = vsel %vm950_vm14, %v4989_v52, 0.0 }
0x1872   :  { %3207 = vadd.xlane.f32.xlu0 %v3206_v12  ;;  %v3203_v62 = vsel %vm950_vm14, %v4991_v34, 0.0 }
0x1873   :  { %3204 = vadd.xlane.f32.xlu1 %v3203_v62 }
0x18f3   :  { %v3190_v20 = vpop.xlane.xlu0 %3189 }
0x18f4   :  { %4992 = vrcp.f32 %v3190_v20  ;;  %v3187_v28 = vpop.xlane.xlu1 %3186 }
0x18f5   :  { %4994 = vrcp.f32 %v3187_v28 }
0x18f7   :  { %v3196_v63 = vpop.xlane.xlu0 %3195 }
0x18f8   :  { %4996 = vrcp.f32 %v3196_v63  ;;  %v3193_v22 = vpop.xlane.xlu1 %3192 }
0x18f9   :  { %4998 = vrcp.f32 %v3193_v22 }
0x18fb   :  { %v3202_v32 = vpop.xlane.xlu0 %3201 }
0x18fc   :  { %5000 = vrcp.f32 %v3202_v32  ;;  %v3199_v43 = vpop.xlane.xlu1 %3198 }
0x18fd   :  { %5002 = vrcp.f32 %v3199_v43 }
0x18fe   :  { %v4993_v61 = vpop.eup %4992 }
0x18ff   :  { %v4995_v41 = vpop.eup %4994  ;;  %v3208_v5 = vpop.xlane.xlu0 %3207  ;;  %v3212_v13 = vmul.f32 %v4993_v61, %v4977_v44 }
0x1900   :  { %5004 = vrcp.f32 %v3208_v5  ;;  %v3205_v48 = vpop.xlane.xlu1 %3204  ;;  %v3210_v50 = vmul.f32 %v4995_v41, %v4979_v46  ;;  %v3501_v5 = vld [vmem:[%s6109_s2 + $0x200] sm:$0xff] }
0x1901   :  { %5006 = vrcp.f32 %v3205_v48 }
0x1902   :  { %v4997_v7 = vpop.eup %4996  ;;  %4566 = vmatprep.mubr.msk.f32.mxu0 %vm950_vm14, %v3210_v50  ;;  %v3502_v50 = vld [vmem:[%s6109_s2 + $0x208] sm:$0xff] }
0x1903   :  { %v4999_v51 = vpop.eup %4998  ;;  %4567 = vmatmul.mubr.msk.f32.vlgmr.msra.gmra.mrb[42].mxu0 %vm950_vm14, %v3212_v13  ;;  %v3216_v55 = vmul.f32 %v4997_v7, %v4981_v2  ;;  %v3503_v13 = vld [vmem:[%s6109_s2 + $0x210] sm:$0xff] }
0x1904   :  { %v3214_v54 = vmul.f32 %v4999_v51, %v4983_v0  ;;  %4821 = vmatpush3.bf16.msra.mxu0 %v4818_v39  ;;  %v4830_v7 = vpack.c.bf16 %v3503_v13, %v3502_v50  ;;  %v3592_v51 = vld [vmem:[%s6109_s2 + $0x218] sm:$0xff] }
0x1905   :  { %4823 = vmatprep.subr.bf16.mxu0 %v4822_v3  ;;  %v4020_v50 = vld [vmem:[%s6110_s3 + $0x1a] ss:$0 sm:$0xff] }
0x1906   :  { %v5001_v33 = vpop.eup %5000  ;;  %4569 = vmatprep.mubr.msk.f32.mxu0 %vm950_vm14, %v3214_v54  ;;  %v3593_v54 = vld [vmem:[%s6109_s2 + $0x220] sm:$0xff] }
0x1907   :  { %v5003_v42 = vpop.eup %5002  ;;  %4570 = vmatmul.mubr.msk.f32.gmra.mrb[44].mxu0 %vm950_vm14, %v3216_v55  ;;  %v3220_v59 = vmul.f32 %v5001_v33, %v4985_v57  ;;  %v3594_v55 = vld [vmem:[%s6109_s2 + $0x228] sm:$0xff]  ;;  %v4834_v33 = vpack.c.bf16 %v3593_v54, %v3592_v51  ;;  %v4021_v51 = vld [vmem:[%s6110_s3 + $0x1b] ss:$0 sm:$0xff] }
0x1908   :  { %v3218_v19 = vmul.f32 %v5003_v42, %v4987_v53  ;;  %4825 = vmatpush3.bf16.msra.mxu0 %v4822_v3  ;;  %v3595_v42 = vld [vmem:[%s6109_s2 + $0x230] sm:$0xff]  ;;  %v4012_v3 = vld [vmem:[%s6110_s3 + $0x18] ss:$0 sm:$0xff] }
0x1909   :  { %4835 = vmatprep.subr.bf16.mxu0 %v4834_v33 }
0x190a   :  { %v5005_v58 = vpop.eup %5004  ;;  %4572 = vmatprep.mubr.msk.f32.mxu0 %vm950_vm14, %v3218_v19  ;;  %v4838_v19 = vpack.c.bf16 %v3595_v42, %v3594_v55 }
0x190b   :  { %v5007_v4 = vpop.eup %5006  ;;  %4573 = vmatmul.mubr.msk.f32.gmra.mrb[46].mxu0 %vm950_vm14, %v3220_v59  ;;  %v3224_v10 = vmul.f32 %v5005_v58, %v4989_v52  ;;  %v3596_v59 = vld [vmem:[%s6109_s2 + $0x238] sm:$0xff]  ;;  %v3597_v58 = vld [vmem:[%s6109_s2 + $0x240] sm:$0xff] }
0x190c   :  { %v3222_v60 = vmul.f32 %v5007_v4, %v4991_v34  ;;  %v4842_v4 = vpack.c.bf16 %v3597_v58, %v3596_v59 }
0x190e   :  { %4575 = vmatprep.mubr.msk.f32.mxu0 %vm950_vm14, %v3222_v60 }
0x190f   :  { %4576 = vmatmul.mubr.msk.f32.gmra.mrb[48].mxu0 %vm950_vm14, %v3224_v10 }
0x19d6   :  { %v4568_v14 = vpop.f32.mrb[42].mxu0 }
0x19d7   :  { %v3315_v6 = vpop.f32.mrb[43].mxu0  ;;  %v3355_v17 = vsel %vm129_vm8, %v4568_v14, 0.0 }
0x19d8   :  { %v3354_v24 = vsel %vm129_vm8, %v3315_v6, 0.0 }
0x19da   :  { %v4571_v9 = vpop.f32.mrb[44].mxu0 }
0x19db   :  { %v3357_v23 = vsel %vm130_vm10, %v4571_v9, 0.0  ;;  %v3325_v1 = vpop.f32.mrb[45].mxu0 }
0x19dc   :  { %v3359_v27 = vadd.f32 %v3357_v23, %v3355_v17  ;;  %v3356_v30 = vsel %vm130_vm10, %v3325_v1, 0.0  ;;  %v4013_v17 = vld [vmem:[%s6110_s3 + $0x19] ss:$0 sm:$0xff] }
0x19dd   :  { %v3358_v35 = vadd.f32 %v3356_v30, %v3354_v24  ;;  %v3598_v30 = vld [vmem:[%s6109_s2 + $0x248] sm:$0xff] }
0x19de   :  { %v4574_v36 = vpop.f32.mrb[46].mxu0 }
0x19df   :  { %v3361_v37 = vsel %vm131_vm11, %v4574_v36, 0.0  ;;  %v3335_v8 = vpop.f32.mrb[47].mxu0 }
0x19e0   :  { %v3363_v44 = vadd.f32 %v3361_v37, %v3359_v27  ;;  %v3360_v31 = vsel %vm131_vm11, %v3335_v8, 0.0  ;;  %v4014_v37 = vld [vmem:[%s6110_s3 + $0x14] ss:$0 sm:$0xff] }
0x19e1   :  { %v3362_v46 = vadd.f32 %v3360_v31, %v3358_v35  ;;  %v3599_v35 = vld [vmem:[%s6109_s2 + $0x250] sm:$0xff] }
0x19e2   :  { %v4577_v49 = vpop.f32.mrb[48].mxu0  ;;  %v4846_v36 = vpack.c.bf16 %v3599_v35, %v3598_v30 }
0x19e3   :  { %v3365_v38 = vsel %vm132_vm12, %v4577_v49, 0.0  ;;  %v3345_v40 = vpop.f32.mrb[49].mxu0 }
0x19e4   :  { %v3367_v2 = vadd.f32 %v3365_v38, %v3363_v44  ;;  %v3364_v0 = vsel %vm132_vm12, %v3345_v40, 0.0  ;;  %v4017_v40 = vld [vmem:[%s6110_s3 + $0x15] ss:$0 sm:$0xff] }
0x19e5   :  { %v3366_v56 = vadd.f32 %v3364_v0, %v3362_v46 }
0x19e7   :  { %4586 = vmatprep.mubr.msk.f32.mxu0 %vm215_vm0, %v3366_v56 }
0x19e8   :  { %4587 = vmatmul.mubr.msk.f32.vlgmr.msra.gmra.mrb[50].mxu0 %vm215_vm0, %v3367_v2 }
0x19e9   :  { %4837 = vmatpush3.bf16.msra.mxu0 %v4834_v33 }
0x19ea   :  { %4839 = vmatprep.subr.bf16.mxu0 %v4838_v19 }
0x19ed   :  { %4841 = vmatpush3.bf16.msra.mxu0 %v4838_v19 }
0x19ee   :  { %4843 = vmatprep.subr.bf16.mxu0 %v4842_v4 }
0x19f1   :  { %4845 = vmatpush3.bf16.msra.mxu0 %v4842_v4 }
0x19f2   :  { %4847 = vmatprep.subr.bf16.mxu0 %v4846_v36 }
0x19f5   :  { %4849 = vmatpush3.bf16.msra.mxu0 %v4846_v36 }
0x1abb   :  { %v4588_v57 = vpop.f32.mrb[50].mxu0 }
0x1abc   :  { %v3455_v53 = vadd.f32 %v4588_v57, %v4009_v25  ;;  %v3449_v21 = vpop.f32.mrb[51].mxu0 }
0x1abd   :  { %v3450_v18 = vadd.f32 %v4009_v25, %v3449_v21 }
0x1abe   :  { %v3459_v52 = vadd.f32 %v3455_v53, %v5899_v45 }
0x1abf   :  { %v3458_v34 = vadd.f32 %v3450_v18, %v5897_v29  ;;  %v3500_v29 = vld [vmem:[%s6109_s2 + $0x1f8] sm:$0xff] }
0x1ac0   :  { %v3465_v26 = vsel %vm215_vm0, %v3459_v52, 0.0  ;;  %v4826_v48 = vpack.c.bf16 %v3501_v5, %v3500_v29 }
0x1ac1   :  { %3466 = vadd.xlane.f32.xlu0 %v3465_v26  ;;  %v3462_v12 = vsel %vm215_vm0, %v3458_v34, 0.0 }
0x1ac2   :  { %3463 = vadd.xlane.f32.xlu1 %v3462_v12  ;;  %4827 = vmatprep.subr.bf16.mxu1 %v4826_v48 }
0x1ac3   :  { %4829 = vmatpush3.bf16.msra.mxu1 %v4826_v48 }
0x1ac4   :  { %4831 = vmatprep.subr.bf16.mxu1 %v4830_v7 }
0x1ac7   :  { %4833 = vmatpush3.bf16.msra.mxu1 %v4830_v7 }
0x1b4e   :  { %v3467_v62 = vpop.xlane.xlu0 %3466 }
0x1b4f   :  { %v3469_v20 = vmul.f32 0.03125, %v3467_v62  ;;  %v3464_v28 = vpop.xlane.xlu1 %3463 }
0x1b50   :  { %v3468_v63 = vmul.f32 0.03125, %v3464_v28 }
0x1b51   :  { %v3471_v22 = vsub.f32 %v3459_v52, %v3469_v20 }
0x1b52   :  { %v3470_v32 = vsub.f32 %v3458_v34, %v3468_v63 }
0x1b53   :  { %v3473_v43 = vmul.f32 %v3471_v22, %v3471_v22 }
0x1b54   :  { %v3472_v61 = vmul.f32 %v3470_v32, %v3470_v32 }
0x1b55   :  { %v3477_v41 = vsel %vm215_vm0, %v3473_v43, 0.0 }
0x1b56   :  { %3478 = vadd.xlane.f32.xlu0 %v3477_v41  ;;  %v3474_v45 = vsel %vm215_vm0, %v3472_v61, 0.0 }
0x1b57   :  { %3475 = vadd.xlane.f32.xlu1 %v3474_v45 }
0x1be3   :  { %v3479_v60 = vpop.xlane.xlu0 %3478 }
0x1be4   :  { %v3481_v10 = vmul.f32 0.03125, %v3479_v60  ;;  %v3476_v15 = vpop.xlane.xlu1 %3475 }
0x1be5   :  { %v3480_v47 = vmul.f32 0.03125, %v3476_v15 }
0x1be6   :  { %v3483_v39 = vadd.f32 1e-05, %v3481_v10 }
0x1be7   :  { %v3482_v16 = vadd.f32 1e-05, %v3480_v47 }
0x1be8   :  { %5008 = vrsqrt.f32 %v3483_v39 }
0x1be9   :  { %5010 = vrsqrt.f32 %v3482_v16 }
0x1bf2   :  { %v5009_v11 = vpop.eup %5008 }
0x1bf3   :  { %v5011_v14 = vpop.eup %5010  ;;  %v3487_v6 = vmul.f32 %v5009_v11, %v3471_v22 }
0x1bf4   :  { %v3486_v9 = vmul.f32 %v5011_v14, %v3470_v32 }
0x1bf5   :  { %v3493_v23 = vmul.f32 %v4012_v3, %v3487_v6  ;;  %v3768_v6 = vld [vmem:[%s6109_s2 + $0x2d8] sm:$0xff] }
0x1bf6   :  { %v3492_v1 = vmul.f32 %v4012_v3, %v3486_v9  ;;  %v3769_v9 = vld [vmem:[%s6109_s2 + $0x2e0] sm:$0xff] }
0x1bf7   :  { %v3499_v27 = vadd.f32 %v4013_v17, %v3493_v23  ;;  %v3770_v23 = vld [vmem:[%s6109_s2 + $0x2e8] sm:$0xff] }
0x1bf8   :  { %v3498_v24 = vadd.f32 %v4013_v17, %v3492_v1  ;;  %v4850_v17 = vpack.c.bf16 %v3769_v9, %v3768_v6  ;;  %v3771_v1 = vld [vmem:[%s6109_s2 + $0x2f0] sm:$0xff] }
0x1bfa   :  { %4597 = vmatprep.mubr.msk.f32.mxu1 %vm215_vm0, %v3498_v24  ;;  %4851 = vmatprep.subr.bf16.mxu1 %v4850_v17 }
0x1bfb   :  { %4598 = vmatmul.mubr.msk.f32.vlgmr.msra.gmra.mrb[50].mxu1 %vm215_vm0, %v3499_v27 }
0x1bfc   :  { %4853 = vmatpush3.bf16.msra.mxu1 %v4850_v17 }
0x1cce   :  { %v4599_v8 = vpop.f32.mrb[50].mxu1 }
0x1ccf   :  { %v3587_v44 = vadd.f32 %v4599_v8, %v4014_v37  ;;  %v3581_v31 = vpop.f32.mrb[51].mxu1 }
0x1cd0   :  { %v3582_v46 = vadd.f32 %v4014_v37, %v3581_v31  ;;  %v4022_v31 = vld [vmem:[%s6110_s3 + $0x20] ss:$0 sm:$0xff] }
0x1cd1   :  { %v3591_v38 = vmax.f32 %v3587_v44, 0.0 }
0x1cd2   :  { %v3590_v49 = vmax.f32 %v3582_v46, 0.0 }
0x1cd4   :  { %4616 = vmatprep.mubr.msk.f32.mxu0 %vm2016_vm3, %v3590_v49 }
0x1cd5   :  { %4617 = vmatmul.mubr.msk.f32.vlgmr.msra.gmra.mrb[52].mxu0 %vm2016_vm3, %v3591_v38 }
0x1da8   :  { %v4618_v2 = vpop.f32.mrb[52].mxu0 }
0x1da9   :  { %v3683_v0 = vadd.f32 %v4618_v2, %v4017_v40  ;;  %v3677_v56 = vpop.f32.mrb[53].mxu0 }
0x1daa   :  { %v3678_v25 = vadd.f32 %v4017_v40, %v3677_v56  ;;  %v4023_v40 = vld [vmem:[%s6110_s3 + $0x21] ss:$0 sm:$0xff] }
0x1dab   :  { %v3687_v57 = vadd.f32 %v3683_v0, %v3499_v27 }
0x1dac   :  { %v3686_v53 = vadd.f32 %v3678_v25, %v3498_v24  ;;  %v4854_v24 = vpack.c.bf16 %v3771_v1, %v3770_v23 }
0x1dad   :  { %v3693_v21 = vsel %vm215_vm0, %v3687_v57, 0.0 }
0x1dae   :  { %3694 = vadd.xlane.f32.xlu0 %v3693_v21  ;;  %v3690_v18 = vsel %vm215_vm0, %v3686_v53, 0.0  ;;  %4855 = vmatprep.subr.bf16.mxu1 %v4854_v24 }
0x1daf   :  { %3691 = vadd.xlane.f32.xlu1 %v3690_v18  ;;  %4857 = vmatpush3.bf16.msra.mxu1 %v4854_v24 }
0x1e3b   :  { %v3695_v52 = vpop.xlane.xlu0 %3694 }
0x1e3c   :  { %v3697_v34 = vmul.f32 0.03125, %v3695_v52  ;;  %v3692_v26 = vpop.xlane.xlu1 %3691 }
0x1e3d   :  { %v3696_v12 = vmul.f32 0.03125, %v3692_v26 }
0x1e3e   :  { %v3699_v62 = vsub.f32 %v3687_v57, %v3697_v34  ;;  %v4024_v57 = vld [vmem:[%s6110_s3 + $0x22] ss:$0 sm:$0xff] }
0x1e3f   :  { %v3698_v20 = vsub.f32 %v3686_v53, %v3696_v12 }
0x1e40   :  { %v3701_v28 = vmul.f32 %v3699_v62, %v3699_v62 }
0x1e41   :  { %v3700_v63 = vmul.f32 %v3698_v20, %v3698_v20 }
0x1e42   :  { %v3705_v22 = vsel %vm215_vm0, %v3701_v28, 0.0 }
0x1e43   :  { %3706 = vadd.xlane.f32.xlu0 %v3705_v22  ;;  %v3702_v32 = vsel %vm215_vm0, %v3700_v63, 0.0 }
0x1e44   :  { %3703 = vadd.xlane.f32.xlu1 %v3702_v32 }
0x1ed0   :  { %v3707_v43 = vpop.xlane.xlu0 %3706 }
0x1ed1   :  { %v3709_v61 = vmul.f32 0.03125, %v3707_v43  ;;  %v3704_v41 = vpop.xlane.xlu1 %3703 }
0x1ed2   :  { %v3708_v45 = vmul.f32 0.03125, %v3704_v41 }
0x1ed3   :  { %v3711_v29 = vadd.f32 1e-05, %v3709_v61 }
0x1ed4   :  { %v3710_v5 = vadd.f32 1e-05, %v3708_v45 }
0x1ed5   :  { %5012 = vrsqrt.f32 %v3711_v29 }
0x1ed6   :  { %5014 = vrsqrt.f32 %v3710_v5 }
0x1edf   :  { %v5013_v48 = vpop.eup %5012 }
0x1ee0   :  { %v5015_v13 = vpop.eup %5014  ;;  %v3715_v7 = vmul.f32 %v5013_v48, %v3699_v62 }
0x1ee1   :  { %v3714_v54 = vmul.f32 %v5015_v13, %v3698_v20 }
0x1ee2   :  { %v3721_v55 = vmul.f32 %v4020_v50, %v3715_v7 }
0x1ee3   :  { %v3720_v33 = vmul.f32 %v4020_v50, %v3714_v54 }
0x1ee4   :  { %v3727_v42 = vadd.f32 %v4021_v51, %v3721_v55 }
0x1ee5   :  { %v3726_v19 = vadd.f32 %v4021_v51, %v3720_v33 }
0x1ee6   :  { %v3733_v59 = vsel %vm215_vm0, %v3727_v42, 0.0 }
0x1ee7   :  { %3734 = vadd.xlane.f32.xlu0 %v3733_v59  ;;  %v3730_v58 = vsel %vm215_vm0, %v3726_v19, 0.0 }
0x1ee8   :  { %3731 = vadd.xlane.f32.xlu1 %v3730_v58 }
0x1f74   :  { %v3735_v4 = vpop.xlane.xlu0 %3734 }
0x1f75   :  { %v3737_v60 = vmul.f32 0.03125, %v3735_v4  ;;  %v3732_v10 = vpop.xlane.xlu1 %3731 }
0x1f76   :  { %v3736_v15 = vmul.f32 0.03125, %v3732_v10 }
0x1f77   :  { %v3739_v47 = vsub.f32 %v3727_v42, %v3737_v60 }
0x1f78   :  { %v3738_v39 = vsub.f32 %v3726_v19, %v3736_v15 }
0x1f79   :  { %v3741_v16 = vmul.f32 %v3739_v47, %v3739_v47 }
0x1f7a   :  { %v3740_v11 = vmul.f32 %v3738_v39, %v3738_v39 }
0x1f7b   :  { %v3745_v3 = vsel %vm215_vm0, %v3741_v16, 0.0 }
0x1f7c   :  { %3746 = vadd.xlane.f32.xlu0 %v3745_v3  ;;  %v3742_v14 = vsel %vm215_vm0, %v3740_v11, 0.0 }
0x1f7d   :  { %3743 = vadd.xlane.f32.xlu1 %v3742_v14 }
0x2009   :  { %v3747_v27 = vpop.xlane.xlu0 %3746 }
0x200a   :  { %v3749_v30 = vmul.f32 0.03125, %v3747_v27  ;;  %v3744_v35 = vpop.xlane.xlu1 %3743 }
0x200b   :  { %v3748_v36 = vmul.f32 0.03125, %v3744_v35 }
0x200c   :  { %v3751_v37 = vadd.f32 1e-05, %v3749_v30 }
0x200d   :  { %v3750_v8 = vadd.f32 1e-05, %v3748_v36 }
0x200e   :  { %5016 = vrsqrt.f32 %v3751_v37 }
0x200f   :  { %5018 = vrsqrt.f32 %v3750_v8 }
0x2018   :  { %v5017_v44 = vpop.eup %5016 }
0x2019   :  { %v5019_v46 = vpop.eup %5018  ;;  %v3755_v49 = vmul.f32 %v5017_v44, %v3739_v47 }
0x201a   :  { %v3754_v38 = vmul.f32 %v5019_v46, %v3738_v39 }
0x201b   :  { %v3761_v2 = vmul.f32 %v4022_v31, %v3755_v49 }
0x201c   :  { %v3760_v0 = vmul.f32 %v4022_v31, %v3754_v38 }
0x201d   :  { %v3767_v25 = vadd.f32 %v4023_v40, %v3761_v2 }
0x201e   :  { %v3766_v56 = vadd.f32 %v4023_v40, %v3760_v0 }
0x2020   :  { %4627 = vmatprep.mubr.msk.f32.mxu1 %vm215_vm0, %v3766_v56 }
0x2021   :  { %4628 = vmatmul.mubr.msk.f32.vlgmr.msra.gmra.mrb[52].mxu1 %vm215_vm0, %v3767_v25 }
0x20f4   :  { %v4629_v53 = vpop.f32.mrb[52].mxu1 }
0x20f5   :  { %v3855_v21 = vadd.f32 %v4629_v53, %v4024_v57  ;;  %v3849_v18 = vpop.f32.mrb[53].mxu1 }
0x20f6   :  { %v3850_v52 = vadd.f32 %v4024_v57, %v3849_v18 }
0x20f7   :  { %3859 = vst.msk [vmem:[#allocation2 + $0x8] sm:$0xff] %vm950_vm14, %v3855_v21 }
0x20f8   :  { %3858 = vst.msk [vmem:[#allocation2] sm:$0xff] %vm950_vm14, %v3850_v52 }
0x20f9   :  { %5031 = shalt.err (!%p5028_p4)
}
0x20fa   :  { %s5032_s7 = scalar_lea.hbm %s6111_s4, 256 }
0x20fb   :  { %p5033_p5 = scmp.ne.s32.totalorder %s6111_s4, %s5032_s7  ;;  %p5036_p6 = scmp.lt.u32.totalorder %s5032_s7, %s6111_s4 }
0x20fd   :  { %p5038_p7 = pnand %p5036_p6, %p5033_p5 }
0x20ff   :  { %5041 = shalt.err (!%p5038_p7)
}
0x2100   :  { %s5047_s12 = smov 128   ;;  %s5048_s13 = smov 8  }
0x2101   :  { %3871 = dma.vmem_to_hbm [thread:$0]  %s3866_s0, 256, %s6111_s4, [#allocation3], %s5047_s12, %s5047_s12, %s5048_s13  }
0x2102   :  { %5042 = dma.done.wait [#allocation3], 256  }
0x2103   :  { %5043 = vsyncadd [#allocation3], 4294967040 }
0x2104   :  { %3875 = vsyncpa [#allocation3], 1 }

</bundles_post_ra>
